<compile_context>
chip_gen: v6e
topology: v6e:2x2x1
jax: 0.10.0
libtpu: 0.0.40
codegen_flags: <defaults>
</compile_context>

<pallas_src>
import functools

import jax
import jax.numpy as jnp
from jax.experimental import pallas as pl
from jax.experimental.pallas import tpu as pltpu

_LANE = 128


def _activation_unit_kernel(scalars_ref, beh_ref, w_eff_ref, c_ref, w2_ref,
                            out_ref):
    # Per grid step:
    #   scalars_ref : SMEM [2]        -> [dice_alpha, b2]
    #   beh_ref     : [B, E, T]       behaviors tile, behavior axis on lanes
    #   w_eff_ref   : [B, A, E]       W1_beh + ad-folded W1_p (per batch row)
    #   c_ref       : [B, A, 1]       ad @ W1_ad + b1
    #   w2_ref      : [1, A, 1]       second-linear weights
    #   out_ref     : [B, T]          attention scores (lane-dense)
    w_eff = w_eff_ref[...]
    w2 = w2_ref[...]
    alpha = scalars_ref[0]
    b2 = scalars_ref[1]

    B, E, T = beh_ref.shape
    A = w_eff.shape[1]
    n_chunks = T // _LANE                     # static; T is a multiple of 128

    # Hoisted loop-invariant broadcast (JAX does not CSE broadcast_in_dim).
    c_b = jnp.broadcast_to(c_ref[...], (B, A, _LANE))

    # Process the tile in 128-lane chunks: h stays [B, A, 128] (~32 vregs for
    # B=8, A=32), so Dice + the head live in registers without spilling.
    @pl.loop(0, n_chunks)
    def _(ci):
        off = pl.multiple_of(ci * _LANE, _LANE)
        beh = beh_ref[:, :, pl.ds(off, _LANE)]               # [B, E, 128]

        # Contraction over E as unrolled VPU broadcast-FMAs (K=E is tiny;
        # the MXU would run at <1% utilization, so keep it idle).
        h = c_b
        for e in range(E):                                    # E static & small
            h = h + w_eff[:, :, e:e + 1] * beh[:, e:e + 1, :]

        # Dice (training-mode batch stats, unbiased variance; needs B >= 2).
        mean = jnp.mean(h, axis=0, keepdims=True)
        var = jnp.sum((h - mean) ** 2, axis=0, keepdims=True) / (B - 1)
        norm = (h - mean) * jax.lax.rsqrt(var + 1e-9)
        # sigmoid(x) = 0.5*(tanh(0.5*x)+1): a single EUP op per element.
        gate = 0.5 * (jnp.tanh(0.5 * norm) + 1.0)
        hg = h * (alpha + (1.0 - alpha) * gate)   # == gate*h + alpha*(1-gate)*h

        # Second linear (A -> 1): weighted sublane reduction (XLU), no MXU.
        score = jnp.sum(hg * w2, axis=1) + b2                 # [B, 128]
        out_ref[:, pl.ds(off, _LANE)] = score.astype(out_ref.dtype)


def _tile_plan(n, tile_n):
    """Pick lane-dense tile width (multiple of 128), tile count, padded N."""
    nb = pl.cdiv(n, _LANE)                    # 128-lane blocks needed
    if nb <= 1:
        t_blocks = 1
    else:
        # >= 2 tiles so both v7x TensorCores get work; cap width at tile_n.
        t_blocks = min(max(tile_n // _LANE, 1), pl.cdiv(nb, 2))
    t = t_blocks * _LANE
    num_tiles = pl.cdiv(nb, t_blocks)
    return t, num_tiles, num_tiles * t


@functools.partial(jax.jit, static_argnames=("tile_n",))
def activation_unit(x, params, tile_n=512):
    """x: [B, N+1, E] float32 -> [B, N, 1] float32."""
    w1, b1, alpha, w2, b2 = params
    B, n_plus_1, E = x.shape
    N = n_plus_1 - 1
    A = w1.shape[1]
    feat_dim = E * (E + 2)
    assert w1.shape == (feat_dim, A)
    assert N >= 1 and B >= 2               # B >= 2 needed for unbiased Dice var
    assert tile_n >= _LANE and tile_n % _LANE == 0

    # ---- Once-per-call ad-dependent precompute (tiny: O(B*E*E*A)) ----
    ad = x[:, -1, :]                                   # [B, E]
    w1_beh = w1[:E]                                    # [E, A]
    w1_p = w1[E:E + E * E].reshape(E, E, A)            # [E, E, A]  (i, j, a)
    w1_ad = w1[E + E * E:]                             # [E, A]
    # w_eff[b, a, i] = W1_beh[i, a] + sum_j ad[b, j] * W1_p[i, j, a]
    w_eff = w1_beh.T[None] + jnp.einsum('bj,ija->bai', ad, w1_p)   # [B, A, E]
    c = (ad @ w1_ad + b1)[:, :, None]                  # [B, A, 1]
    w2_col = w2.reshape(1, A, 1)                       # [1, A, 1]
    scalars = jnp.concatenate(
        [alpha.reshape(1), b2.reshape(1)]).astype(jnp.float32)     # [alpha, b2]

    # ---- Lane-dense behaviors: [B, E, N], zero-padded to the tile grid ----
    t, num_tiles, n_pad = _tile_plan(N, tile_n)
    beh = jnp.transpose(x[:, :-1, :], (0, 2, 1))       # [B, E, N]
    if n_pad != N:
        beh = jnp.pad(beh, ((0, 0), (0, 0), (0, n_pad - N)))

    out = pl.pallas_call(
        _activation_unit_kernel,
        out_shape=jax.ShapeDtypeStruct((B, n_pad), jnp.float32),
        grid_spec=pltpu.PrefetchScalarGridSpec(
            num_scalar_prefetch=0,
            grid=(num_tiles,),
            in_specs=[
                pl.BlockSpec(memory_space=pltpu.MemorySpace.SMEM),  # [alpha,b2]
                pl.BlockSpec((B, E, t), lambda n: (0, 0, n)),       # behaviors
                pl.BlockSpec((B, A, E), lambda n: (0, 0, 0)),       # w_eff
                pl.BlockSpec((B, A, 1), lambda n: (0, 0, 0)),       # c
                pl.BlockSpec((1, A, 1), lambda n: (0, 0, 0)),       # w2
            ],
            out_specs=pl.BlockSpec((B, t), lambda n: (0, n)),       # lane-dense
        ),
        compiler_params=pltpu.CompilerParams(
            dimension_semantics=("parallel",)),   # both v7x TCs get tiles
    )(scalars, beh, w_eff, c, w2_col)

    return out[:, :N, None]                            # [B, N, 1]


def activation_unit_ref(x, params):
    """Pure-JAX reference mirroring the PyTorch module (for verification)."""
    w1, b1, alpha, w2, b2 = params
    behaviors = x[:, :-1, :]
    B, N, E = behaviors.shape
    ads = jnp.broadcast_to(x[:, -1:, :], behaviors.shape)
    p = (behaviors[:, :, :, None] * ads[:, :, None, :]).reshape(B, N, E * E)
    feat = jnp.concatenate([behaviors, p, ads], axis=2)
    h = feat @ w1 + b1
    mean = h.mean(axis=0, keepdims=True)
    var = jnp.sum((h - mean) ** 2, axis=0, keepdims=True) / (B - 1)
    norm = (h - mean) / jnp.sqrt(var + 1e-9)
    gate = jax.nn.sigmoid(norm)
    h = gate * h + alpha[0, 0] * (1.0 - gate) * h
    return h @ w2 + b2


def init_params(key, embed_dim, activation_dim):
    """Deterministic nn.Linear-style init (U(-1/sqrt(fan_in), 1/sqrt(fan_in)))."""
    feat_dim = embed_dim * (embed_dim + 2)
    k1, k2, k3, k4 = jax.random.split(key, 4)
    s1 = 1.0 / jnp.sqrt(feat_dim)
    s2 = 1.0 / jnp.sqrt(activation_dim)
    w1 = jax.random.uniform(k1, (feat_dim, activation_dim), jnp.float32, -s1, s1)
    b1 = jax.random.uniform(k2, (1, activation_dim), jnp.float32, -s1, s1)
    alpha = jnp.zeros((1, 1), jnp.float32)              # Dice alpha init = 0
    w2 = jax.random.uniform(k3, (activation_dim, 1), jnp.float32, -s2, s2)
    b2 = jax.random.uniform(k4, (1, 1), jnp.float32, -s2, s2)
    return (w1, b1, alpha, w2, b2)


if __name__ == "__main__":
    B, E, A = 8, 8, 32

    key = jax.random.PRNGKey(0)
    kp, kx1, kx2, kx3 = jax.random.split(key, 4)
    params = init_params(kp, E, A)

    # N=256  -> 2 lane-dense tiles of 128 (exercises the parallel grid)
    # N=12   -> single 128-wide tile with zero padding (ragged tail path)
    # N=1280 -> 512-wide tiles, 3 grid steps, in-kernel 128-lane chunk loop
    cases = [(256, kx1), (12, kx2), (1280, kx3)]
    for n_behaviors, kx in cases:
        x = jax.random.normal(kx, (B, n_behaviors + 1, E), dtype=jnp.float32)
        out = jax.block_until_ready(activation_unit(x, params))
        ref = jax.block_until_ready(activation_unit_ref(x, params))
        assert out.shape == (B, n_behaviors, 1), out.shape
        # atol/rtol allow f32 reassociation from the split-W1 / FMA formulation.
        err = float(jnp.max(jnp.abs(out - ref)))
        assert err < 2e-4, (n_behaviors, err)

    print("KERNEL_OK")
</pallas_src>

<mosaic_0001>
module attributes {stable_mosaic.version = 11 : i64} {
  func.func @_activation_unit_kernel(%arg0: i32, %arg1: memref<2xf32, #tpu.memory_space<smem>>, %arg2: memref<8x8x128xf32, #tpu.memory_space<vmem>>, %arg3: memref<8x32x8xf32, #tpu.memory_space<vmem>>, %arg4: memref<8x32x1xf32, #tpu.memory_space<vmem>>, %arg5: memref<1x32x1xf32, #tpu.memory_space<vmem>>, %arg6: memref<8x128xf32, #tpu.memory_space<vmem>>) attributes {dimension_semantics = [#tpu.dimension_semantics<parallel>], iteration_bounds = array<i64: 2>, scalar_prefetch = 0 : i64, scratch_operands = 0 : i64, tpu.core_type = #tpu.core_type<tc>, window_params = [{transform_indices = @transform_0, window_bounds = array<i64: 2>}, {transform_indices = @transform_1, window_bounds = array<i64: 8, 8, 128>}, {pipeline_mode = #tpu.pipeline_mode<synchronous>, transform_indices = @transform_2, window_bounds = array<i64: 8, 32, 8>}, {pipeline_mode = #tpu.pipeline_mode<synchronous>, transform_indices = @transform_3, window_bounds = array<i64: 8, 32, 1>}, {pipeline_mode = #tpu.pipeline_mode<synchronous>, transform_indices = @transform_4, window_bounds = array<i64: 1, 32, 1>}, {transform_indices = @transform_5, window_bounds = array<i64: 8, 128>}]} {
    %c0 = arith.constant 0 : index
    %c0_0 = arith.constant 0 : index
    %c0_1 = arith.constant 0 : index
    %0 = vector.load %arg3[%c0, %c0_0, %c0_1] : memref<8x32x8xf32, #tpu.memory_space<vmem>>, vector<8x32x8xf32>
    %c0_2 = arith.constant 0 : index
    %c0_3 = arith.constant 0 : index
    %c0_4 = arith.constant 0 : index
    %1 = vector.load %arg5[%c0_2, %c0_3, %c0_4] : memref<1x32x1xf32, #tpu.memory_space<vmem>>, vector<1x32x1xf32>
    %c0_5 = arith.constant 0 : index
    %2 = memref.load %arg1[%c0_5] : memref<2xf32, #tpu.memory_space<smem>>
    %c1 = arith.constant 1 : index
    %3 = memref.load %arg1[%c1] : memref<2xf32, #tpu.memory_space<smem>>
    %c0_6 = arith.constant 0 : index
    %c0_7 = arith.constant 0 : index
    %c0_8 = arith.constant 0 : index
    %4 = vector.load %arg4[%c0_6, %c0_7, %c0_8] : memref<8x32x1xf32, #tpu.memory_space<vmem>>, vector<8x32x1xf32>
    %5 = vector.shape_cast %4 : vector<8x32x1xf32> to vector<8x32x1xf32>
    %6 = vector.broadcast %5 : vector<8x32x1xf32> to vector<8x32x128xf32>
    %c0_i32 = arith.constant 0 : i32
    %c1_i32 = arith.constant 1 : i32
    %7 = arith.muli %c0_i32, %c1_i32 : i32
    %c0_i32_9 = arith.constant 0 : i32
    %8 = arith.addi %c0_i32_9, %7 : i32
    %c128_i32 = arith.constant 128 : i32
    %9 = arith.muli %8, %c128_i32 : i32
    %10 = tpu.assume_multiple %9, 128 : i32
    %c0_10 = arith.constant 0 : index
    %c0_11 = arith.constant 0 : index
    %11 = arith.index_cast %10 : i32 to index
    %12 = vector.load %arg2[%c0_10, %c0_11, %11] : memref<8x8x128xf32, #tpu.memory_space<vmem>>, vector<8x8x128xf32>
    %13 = vector.extract_strided_slice %0 {offsets = [0, 0, 0], sizes = [8, 32, 1], strides = [1, 1, 1]} : vector<8x32x8xf32> to vector<8x32x1xf32>
    %14 = vector.extract_strided_slice %12 {offsets = [0, 0, 0], sizes = [8, 1, 128], strides = [1, 1, 1]} : vector<8x8x128xf32> to vector<8x1x128xf32>
    %15 = vector.broadcast %13 : vector<8x32x1xf32> to vector<8x32x128xf32>
    %16 = vector.broadcast %14 : vector<8x1x128xf32> to vector<8x32x128xf32>
    %17 = arith.mulf %15, %16 : vector<8x32x128xf32>
    %18 = arith.addf %6, %17 : vector<8x32x128xf32>
    %19 = vector.extract_strided_slice %0 {offsets = [0, 0, 1], sizes = [8, 32, 1], strides = [1, 1, 1]} : vector<8x32x8xf32> to vector<8x32x1xf32>
    %20 = vector.extract_strided_slice %12 {offsets = [0, 1, 0], sizes = [8, 1, 128], strides = [1, 1, 1]} : vector<8x8x128xf32> to vector<8x1x128xf32>
    %21 = vector.broadcast %19 : vector<8x32x1xf32> to vector<8x32x128xf32>
    %22 = vector.broadcast %20 : vector<8x1x128xf32> to vector<8x32x128xf32>
    %23 = arith.mulf %21, %22 : vector<8x32x128xf32>
    %24 = arith.addf %18, %23 : vector<8x32x128xf32>
    %25 = vector.extract_strided_slice %0 {offsets = [0, 0, 2], sizes = [8, 32, 1], strides = [1, 1, 1]} : vector<8x32x8xf32> to vector<8x32x1xf32>
    %26 = vector.extract_strided_slice %12 {offsets = [0, 2, 0], sizes = [8, 1, 128], strides = [1, 1, 1]} : vector<8x8x128xf32> to vector<8x1x128xf32>
    %27 = vector.broadcast %25 : vector<8x32x1xf32> to vector<8x32x128xf32>
    %28 = vector.broadcast %26 : vector<8x1x128xf32> to vector<8x32x128xf32>
    %29 = arith.mulf %27, %28 : vector<8x32x128xf32>
    %30 = arith.addf %24, %29 : vector<8x32x128xf32>
    %31 = vector.extract_strided_slice %0 {offsets = [0, 0, 3], sizes = [8, 32, 1], strides = [1, 1, 1]} : vector<8x32x8xf32> to vector<8x32x1xf32>
    %32 = vector.extract_strided_slice %12 {offsets = [0, 3, 0], sizes = [8, 1, 128], strides = [1, 1, 1]} : vector<8x8x128xf32> to vector<8x1x128xf32>
    %33 = vector.broadcast %31 : vector<8x32x1xf32> to vector<8x32x128xf32>
    %34 = vector.broadcast %32 : vector<8x1x128xf32> to vector<8x32x128xf32>
    %35 = arith.mulf %33, %34 : vector<8x32x128xf32>
    %36 = arith.addf %30, %35 : vector<8x32x128xf32>
    %37 = vector.extract_strided_slice %0 {offsets = [0, 0, 4], sizes = [8, 32, 1], strides = [1, 1, 1]} : vector<8x32x8xf32> to vector<8x32x1xf32>
    %38 = vector.extract_strided_slice %12 {offsets = [0, 4, 0], sizes = [8, 1, 128], strides = [1, 1, 1]} : vector<8x8x128xf32> to vector<8x1x128xf32>
    %39 = vector.broadcast %37 : vector<8x32x1xf32> to vector<8x32x128xf32>
    %40 = vector.broadcast %38 : vector<8x1x128xf32> to vector<8x32x128xf32>
    %41 = arith.mulf %39, %40 : vector<8x32x128xf32>
    %42 = arith.addf %36, %41 : vector<8x32x128xf32>
    %43 = vector.extract_strided_slice %0 {offsets = [0, 0, 5], sizes = [8, 32, 1], strides = [1, 1, 1]} : vector<8x32x8xf32> to vector<8x32x1xf32>
    %44 = vector.extract_strided_slice %12 {offsets = [0, 5, 0], sizes = [8, 1, 128], strides = [1, 1, 1]} : vector<8x8x128xf32> to vector<8x1x128xf32>
    %45 = vector.broadcast %43 : vector<8x32x1xf32> to vector<8x32x128xf32>
    %46 = vector.broadcast %44 : vector<8x1x128xf32> to vector<8x32x128xf32>
    %47 = arith.mulf %45, %46 : vector<8x32x128xf32>
    %48 = arith.addf %42, %47 : vector<8x32x128xf32>
    %49 = vector.extract_strided_slice %0 {offsets = [0, 0, 6], sizes = [8, 32, 1], strides = [1, 1, 1]} : vector<8x32x8xf32> to vector<8x32x1xf32>
    %50 = vector.extract_strided_slice %12 {offsets = [0, 6, 0], sizes = [8, 1, 128], strides = [1, 1, 1]} : vector<8x8x128xf32> to vector<8x1x128xf32>
    %51 = vector.broadcast %49 : vector<8x32x1xf32> to vector<8x32x128xf32>
    %52 = vector.broadcast %50 : vector<8x1x128xf32> to vector<8x32x128xf32>
    %53 = arith.mulf %51, %52 : vector<8x32x128xf32>
    %54 = arith.addf %48, %53 : vector<8x32x128xf32>
    %55 = vector.extract_strided_slice %0 {offsets = [0, 0, 7], sizes = [8, 32, 1], strides = [1, 1, 1]} : vector<8x32x8xf32> to vector<8x32x1xf32>
    %56 = vector.extract_strided_slice %12 {offsets = [0, 7, 0], sizes = [8, 1, 128], strides = [1, 1, 1]} : vector<8x8x128xf32> to vector<8x1x128xf32>
    %57 = vector.broadcast %55 : vector<8x32x1xf32> to vector<8x32x128xf32>
    %58 = vector.broadcast %56 : vector<8x1x128xf32> to vector<8x32x128xf32>
    %59 = arith.mulf %57, %58 : vector<8x32x128xf32>
    %60 = arith.addf %54, %59 : vector<8x32x128xf32>
    %cst = arith.constant dense<0.000000e+00> : vector<32x128xf32>
    %61 = vector.multi_reduction <add>, %60, %cst [0] : vector<8x32x128xf32> to vector<32x128xf32>
    %62 = vector.shape_cast %61 : vector<32x128xf32> to vector<1x32x128xf32>
    %cst_12 = arith.constant 8.000000e+00 : f32
    %63 = vector.broadcast %cst_12 : f32 to vector<1x32x128xf32>
    %64 = arith.divf %62, %63 : vector<1x32x128xf32>
    %65 = vector.broadcast %64 : vector<1x32x128xf32> to vector<8x32x128xf32>
    %66 = arith.subf %60, %65 : vector<8x32x128xf32>
    %67 = arith.mulf %66, %66 : vector<8x32x128xf32>
    %cst_13 = arith.constant dense<0.000000e+00> : vector<32x128xf32>
    %68 = vector.multi_reduction <add>, %67, %cst_13 [0] : vector<8x32x128xf32> to vector<32x128xf32>
    %69 = vector.shape_cast %68 : vector<32x128xf32> to vector<1x32x128xf32>
    %cst_14 = arith.constant 7.000000e+00 : f32
    %70 = vector.broadcast %cst_14 : f32 to vector<1x32x128xf32>
    %71 = arith.divf %69, %70 : vector<1x32x128xf32>
    %72 = vector.broadcast %64 : vector<1x32x128xf32> to vector<8x32x128xf32>
    %73 = arith.subf %60, %72 : vector<8x32x128xf32>
    %cst_15 = arith.constant 9.99999971E-10 : f32
    %74 = vector.broadcast %cst_15 : f32 to vector<1x32x128xf32>
    %75 = arith.addf %71, %74 : vector<1x32x128xf32>
    %76 = math.rsqrt %75 : vector<1x32x128xf32>
    %77 = vector.broadcast %76 : vector<1x32x128xf32> to vector<8x32x128xf32>
    %78 = arith.mulf %73, %77 : vector<8x32x128xf32>
    %cst_16 = arith.constant 5.000000e-01 : f32
    %79 = vector.broadcast %cst_16 : f32 to vector<8x32x128xf32>
    %80 = arith.mulf %79, %78 : vector<8x32x128xf32>
    %81 = math.tanh %80 : vector<8x32x128xf32>
    %cst_17 = arith.constant 1.000000e+00 : f32
    %82 = vector.broadcast %cst_17 : f32 to vector<8x32x128xf32>
    %83 = arith.addf %81, %82 : vector<8x32x128xf32>
    %cst_18 = arith.constant 5.000000e-01 : f32
    %84 = vector.broadcast %cst_18 : f32 to vector<8x32x128xf32>
    %85 = arith.mulf %84, %83 : vector<8x32x128xf32>
    %cst_19 = arith.constant 1.000000e+00 : f32
    %86 = arith.subf %cst_19, %2 : f32
    %87 = vector.broadcast %86 : f32 to vector<8x32x128xf32>
    %88 = arith.mulf %87, %85 : vector<8x32x128xf32>
    %89 = vector.broadcast %2 : f32 to vector<8x32x128xf32>
    %90 = arith.addf %89, %88 : vector<8x32x128xf32>
    %91 = arith.mulf %60, %90 : vector<8x32x128xf32>
    %92 = vector.broadcast %1 : vector<1x32x1xf32> to vector<8x32x128xf32>
    %93 = arith.mulf %91, %92 : vector<8x32x128xf32>
    %cst_20 = arith.constant dense<0.000000e+00> : vector<8x128xf32>
    %94 = vector.multi_reduction <add>, %93, %cst_20 [1] : vector<8x32x128xf32> to vector<8x128xf32>
    %95 = vector.broadcast %3 : f32 to vector<8x128xf32>
    %96 = arith.addf %94, %95 : vector<8x128xf32>
    %c0_21 = arith.constant 0 : index
    %97 = arith.index_cast %10 : i32 to index
    %98 = vector.load %arg6[%c0_21, %97] : memref<8x128xf32, #tpu.memory_space<vmem>>, vector<8x128xf32>
    tpu.vector_store %arg6[%c0_21, %97], %96 {strides = array<i32>} : memref<8x128xf32, #tpu.memory_space<vmem>>, vector<8x128xf32>,
    %c1_i32_22 = arith.constant 1 : i32
    return
  }
  func.func @transform_0(%arg0: i32) -> i32 {
    %c0_i32 = arith.constant 0 : i32
    %c0_i32_0 = arith.constant 0 : i32
    return %c0_i32 : i32
  }
  func.func @transform_1(%arg0: i32) -> (i32, i32, i32) {
    %c0_i32 = arith.constant 0 : i32
    %c0_i32_0 = arith.constant 0 : i32
    %c0_i32_1 = arith.constant 0 : i32
    return %c0_i32, %c0_i32_0, %arg0 : i32, i32, i32
  }
  func.func @transform_2(%arg0: i32) -> (i32, i32, i32) {
    %c0_i32 = arith.constant 0 : i32
    %c0_i32_0 = arith.constant 0 : i32
    %c0_i32_1 = arith.constant 0 : i32
    %c0_i32_2 = arith.constant 0 : i32
    return %c0_i32, %c0_i32_0, %c0_i32_1 : i32, i32, i32
  }
  func.func @transform_3(%arg0: i32) -> (i32, i32, i32) {
    %c0_i32 = arith.constant 0 : i32
    %c0_i32_0 = arith.constant 0 : i32
    %c0_i32_1 = arith.constant 0 : i32
    %c0_i32_2 = arith.constant 0 : i32
    return %c0_i32, %c0_i32_0, %c0_i32_1 : i32, i32, i32
  }
  func.func @transform_4(%arg0: i32) -> (i32, i32, i32) {
    %c0_i32 = arith.constant 0 : i32
    %c0_i32_0 = arith.constant 0 : i32
    %c0_i32_1 = arith.constant 0 : i32
    %c0_i32_2 = arith.constant 0 : i32
    return %c0_i32, %c0_i32_0, %c0_i32_1 : i32, i32, i32
  }
  func.func @transform_5(%arg0: i32) -> (i32, i32) {
    %c0_i32 = arith.constant 0 : i32
    %c0_i32_0 = arith.constant 0 : i32
    return %c0_i32, %arg0 : i32, i32
  }
}

</mosaic_0001>

<bundles_post_ra>
// kernel: activation_unit.1
= control target key start
LH: loop header
LB: loop body
LE: loop exit
PB: predicated region body
PF: predicated region fallthrough
CT: control target
= control target key end

     0   :  { %10 = vsyncpa [#allocation3], 0  ;;  %s3240_s18 = smov 0   ;;  %s3242_s19 = smov 0   ;;  %s5810_s0 = inlined_call_operand.vmem [shape: f32[2], index: 0, kind: input, shape index: {}]   ;;  %s5811_s1 = inlined_call_operand.vmem [shape: f32[8,8,256], index: 1, kind: input, shape index: {}]   ;;  %s5812_s2 = inlined_call_operand.vmem [shape: f32[8,32,8], index: 2, kind: input, shape index: {}]   ;;  %s5813_s3 = inlined_call_operand.vmem [shape: f32[8,32,1], index: 3, kind: input, shape index: {}]   ;;  %s5814_s4 = inlined_call_operand.vmem [shape: f32[1,32,1], index: 4, kind: input, shape index: {}]   ;;  %s5815_s5 = inlined_call_operand.vmem [shape: f32[8,256], index: 5, kind: output, shape index: {}]  }
   0x1   :  { %s3244_s20 = smov 0  }
   0x2 LB: > { %s3256_s21 = sadd.s32 4294967295, %s3199_s20   ;;  %s3259_s22 = sadd.s32 1, %s3199_s20   ;;  %s3199_s20 = sphi %s3244_s20, %s6451_s20   ;;  %s3195_s19 = sphi %s3242_s19, %s6450_s19   ;;  %s3191_s18 = sphi %s3240_s18, %s6449_s18  }
   0x3   : > { %s41_s23 = ssub.s32 %s3199_s20, %s3259_s22  ;;  %s44_s24 = sadd.s32 1, %s3195_s19 }
   0x4   : > { %p42_p0 = scmp.eq.s32.totalorder %s41_s23, 0  ;;  %p51_p1 = scmp.ne.s32.totalorder %s3195_s19, %s3191_s18 }
   0x5   : > { %p52_p2 = scmp.eq.s32.totalorder %s3199_s20, 0  ;;  %p2989_p3 = scmp.ge.s32.totalorder %s3199_s20, 1 }
   0x6   : > { %s3269_s25 = scalar_select %p42_p0, %s3195_s19, %s44_s24  }
   0x7   : > { %p3271_p4 = por %p52_p2, %p51_p1  ;;  %p157_p5 = scmp.lt.s32.totalorder %s3199_s20, 3 }
   0x8   : > { %p3009_p6 = scmp.eq.s32.totalorder %s3256_s21, 0  ;;  %s170_s30 = sshll.u32 %s5810_s0, 4  ;;  %s171_s30 = int_to_ptr.vmem [resolvable:$true] %s170_s30 }
   0x9   : > { %p3277_p7 = pnand %p2989_p3, %p157_p5  ;;  %s3158_s6 = scalar_lea.vmem %s171_s30, 16 }
   0xa   : > { %p3159_p10 = scmp.ne.s32.totalorder %s171_s30, %s3158_s6  ;;  %p3166_p0 = scmp.lt.s32.totalorder %s171_s30, %s171_s30 }
   0xb   : > { %p3005_p8 = pneg %p3277_p7  ;;  %p3167_p1 = scmp.lt.s32.totalorder %s3158_s6, %s3158_s6 }
   0xd   : > { %p3006_p9 = pnand %p3009_p6, %p3005_p8  ;;  %p3168_p2 = por %p3167_p1, %p3166_p0 }
   0xf   : > { %p3160_p11 = pneg %p3006_p9 }
  0x11   : > { %p3161_p12 = pnand %p3160_p11, %p3159_p10 }
  0x13   : > { %p3162_p13 = pneg %p3161_p12 }
  0x15   : > { %p3169_p3 = pnand %p3168_p2, %p3162_p13 }
  0x17   : > { %3172 = shalt.err (!%p3169_p3)
}
  0x18   : > { %s3201_s7 = smov [#allocation2]   ;;  %p2991_p5 = scmp.ge.s32.totalorder %s3199_s20, 2 }
  0x19   : > { %3008 = dma.vmem_to_smem (!%p3006_p9), %s171_s30, 16, %s3201_s7, [#allocation3]  }
  0x1a   : > { %186 = sbr.rel (%p2991_p5) target bundleno = 39 (0x27), region = 32 }
  0x1f   : > { %189 = sbr.rel (!%p3271_p4) target bundleno = 39 (0x27), region = 36  ;;  %s191_s8 = sand.u32 (%p3271_p4), 1, %s3195_s19  }
  0x20   : > { %s2993_s9 = sshll.u32 (%p3271_p4), %s3199_s20, 3  ;;  %s2992_s10 = sshll.u32 (%p3271_p4), %s191_s8, 6 }
  0x21   : > { %s195_s13 = scalar_lea.vmem (%p3271_p4), %s5811_s1, %s2993_s9  ;;  %s193_s14 = scalar_lea.vmem (%p3271_p4), [#allocation4], %s2992_s10 }
  0x22   : > { %v238_v0 = vld [vmem:[%s195_s13] sm:$0xff] (%p3271_p4)  ;;  %v240_v1 = vld [vmem:[%s195_s13 + $0x10] sm:$0xff] (%p3271_p4) }
  0x23   : > { %v242_v2 = vld [vmem:[%s195_s13 + $0x20] sm:$0xff] (%p3271_p4)  ;;  %239 = vst [vmem:[%s193_s14] sm:$0xff] (%p3271_p4), %v238_v0  ;;  %241 = vst [vmem:[%s193_s14 + $0x8] sm:$0xff] (%p3271_p4), %v240_v1  ;;  %v244_v3 = vld [vmem:[%s195_s13 + $0x30] sm:$0xff] (%p3271_p4) }
  0x24   : > { %243 = vst [vmem:[%s193_s14 + $0x10] sm:$0xff] %v242_v2  ;;  %v246_v4 = vld [vmem:[%s195_s13 + $0x40] sm:$0xff]  ;;  %v248_v5 = vld [vmem:[%s195_s13 + $0x50] sm:$0xff]  ;;  %245 = vst [vmem:[%s193_s14 + $0x18] sm:$0xff] %v244_v3 }
  0x25   : > { %247 = vst [vmem:[%s193_s14 + $0x20] sm:$0xff] %v246_v4  ;;  %249 = vst [vmem:[%s193_s14 + $0x28] sm:$0xff] %v248_v5  ;;  %v250_v6 = vld [vmem:[%s195_s13 + $0x60] sm:$0xff]  ;;  %v252_v7 = vld [vmem:[%s195_s13 + $0x70] sm:$0xff] }
  0x26   : > { %251 = vst [vmem:[%s193_s14 + $0x30] sm:$0xff] %v250_v6  ;;  %253 = vst [vmem:[%s193_s14 + $0x38] sm:$0xff] %v252_v7 }
  0x27 PF: > { %262 = sbr.rel (%p3277_p7) target bundleno = 924 (0x39c), region = 74 }
  0x2c   : > { %3186 = dma.done.wait (%p3009_p6), [#allocation3], 16  }
  0x2d   : > { %3188 = vsyncadd (%p3009_p6), [#allocation3], 4294967280  ;;  %s269_s15 = sand.u32 1, %s3191_s18  }
  0x2e   : > { %s2996_s16 = sshll.u32 %s269_s15, 6 }
  0x2f   : > { %s3303_s17 = scalar_lea.vmem [#allocation4], %s2996_s16 }
  0x30   : > { %275 = sfence }
  0x31   : > { %v340_v8 = vld [vmem:[%s5813_s3 + $0x10] sm:$0xff]  ;;  %v338_v9 = vld [vmem:[%s5813_s3] sm:$0xff]  ;;  %v5816_v10 = vmov 0   ;;  %v341_v11 = vld [vmem:[%s5813_s3 + $0x18] sm:$0xff]  ;;  %s2998_s23 = sld [smem:[#allocation2 + $0x1]]  ;;  %p296_p4 = scmp.lt.s32.totalorder %s3256_s21, 1 }
  0x32   : > { %3045 = vset.pattern.permute.xlu1 %v5816_v10  ;;  %3044 = vset.pattern.permute.xlu0 %v5816_v10  ;;  %v339_v12 = vld [vmem:[%s5813_s3 + $0x8] sm:$0xff]  ;;  %v342_v14 = vld [vmem:[%s5813_s3 + $0x20] sm:$0xff]  ;;  %v345_v15 = vld [vmem:[%s5813_s3 + $0x38] sm:$0xff]  ;;  %vm2900_vm0 = vcmask 1041409   ;;  %vm2902_vm1 = vcmask 1042434   ;;  %vm2904_vm2 = vcmask 1043459  }
  0x33   : > { %382 = vperm.xlu1 %3045, %v340_v8   ;;  %372 = vperm.xlu0 %3044, %v338_v9   ;;  %v343_v13 = vld [vmem:[%s5813_s3 + $0x28] sm:$0xff]  ;;  %v344_v16 = vld [vmem:[%s5813_s3 + $0x30] sm:$0xff]  ;;  %v346_v18 = vld [vmem:[%s5813_s3 + $0x40] sm:$0xff]  ;;  %s6453_s21 = smov (!%p296_p4, %s3256_s21), 1  ;;  %vm2906_vm3 = vcmask 1044484   ;;  %vm2908_vm4 = vcmask 1045509  }
  0x34   : > { %v347_v17 = vld [vmem:[%s5813_s3 + $0x48] sm:$0xff]  ;;  %v349_v19 = vld [vmem:[%s5813_s3 + $0x58] sm:$0xff]  ;;  %v348_v20 = vld [vmem:[%s5813_s3 + $0x50] sm:$0xff]  ;;  %s2997_s24 = sshll.u32 %s6453_s21, 3  ;;  %vm2910_vm5 = vcmask 1046534   ;;  %vm2912_vm6 = vcmask 1047559  }
  0x35   : > { %v351_v21 = vld [vmem:[%s5813_s3 + $0x68] sm:$0xff]  ;;  %v350_v22 = vld [vmem:[%s5813_s3 + $0x60] sm:$0xff]  ;;  %v353_v23 = vld [vmem:[%s5813_s3 + $0x78] sm:$0xff]  ;;  %s299_s27 = scalar_lea.vmem %s5815_s5, %s2997_s24 }
  0x36   : > { %v352_v24 = vld [vmem:[%s5813_s3 + $0x70] sm:$0xff]  ;;  %v355_v25 = vld [vmem:[%s5813_s3 + $0x88] sm:$0xff]  ;;  %v354_v26 = vld [vmem:[%s5813_s3 + $0x80] sm:$0xff] }
  0x37   : > { %387 = vperm.xlu1 %3045, %v341_v11   ;;  %377 = vperm.xlu0 %3044, %v339_v12   ;;  %v357_v27 = vld [vmem:[%s5813_s3 + $0x98] sm:$0xff]  ;;  %v356_v28 = vld [vmem:[%s5813_s3 + $0x90] sm:$0xff]  ;;  %v359_v29 = vld [vmem:[%s5813_s3 + $0xa8] sm:$0xff] }
  0x38   : > { %v358_v30 = vld [vmem:[%s5813_s3 + $0xa0] sm:$0xff]  ;;  %v361_v31 = vld [vmem:[%s5813_s3 + $0xb8] sm:$0xff]  ;;  %v360_v32 = vld [vmem:[%s5813_s3 + $0xb0] sm:$0xff] }
  0x39   : > { %v363_v33 = vld [vmem:[%s5813_s3 + $0xc8] sm:$0xff]  ;;  %v362_v34 = vld [vmem:[%s5813_s3 + $0xc0] sm:$0xff]  ;;  %v365_v35 = vld [vmem:[%s5813_s3 + $0xd8] sm:$0xff] }
  0x3a   : > { %v364_v36 = vld [vmem:[%s5813_s3 + $0xd0] sm:$0xff]  ;;  %v367_v37 = vld [vmem:[%s5813_s3 + $0xe8] sm:$0xff]  ;;  %v366_v38 = vld [vmem:[%s5813_s3 + $0xe0] sm:$0xff] }
  0x3b   : > { %397 = vperm.xlu1 %3045, %v343_v13   ;;  %392 = vperm.xlu0 %3044, %v342_v14   ;;  %v369_v39 = vld [vmem:[%s5813_s3 + $0xf8] sm:$0xff]  ;;  %v368_v40 = vld [vmem:[%s5813_s3 + $0xf0] sm:$0xff]  ;;  %v3406_v41 = vld [vmem:[%s5812_s2 + $0x8] sm:$0xff]  ;;  %v3203_v14 = vmov 1  }
  0x3c   : > { %v3411_v42 = vld [vmem:[%s5812_s2] sm:$0xff]  ;;  %v3418_v43 = vld [vmem:[%s5812_s2 + $0x18] sm:$0xff]  ;;  %v3423_v44 = vld [vmem:[%s5812_s2 + $0x10] sm:$0xff] }
  0x3d   : > { %v3430_v45 = vld [vmem:[%s5812_s2 + $0x28] sm:$0xff]  ;;  %v3435_v46 = vld [vmem:[%s5812_s2 + $0x20] sm:$0xff]  ;;  %v3442_v47 = vld [vmem:[%s5812_s2 + $0x38] sm:$0xff] }
  0x3e   : > { %v3447_v48 = vld [vmem:[%s5812_s2 + $0x30] sm:$0xff]  ;;  %v3454_v49 = vld [vmem:[%s5812_s2 + $0x48] sm:$0xff]  ;;  %v3459_v50 = vld [vmem:[%s5812_s2 + $0x40] sm:$0xff] }
  0x3f   : > { %407 = vperm.xlu1 %3045, %v345_v15   ;;  %402 = vperm.xlu0 %3044, %v344_v16   ;;  %v3466_v51 = vld [vmem:[%s5812_s2 + $0x58] sm:$0xff]  ;;  %v3471_v52 = vld [vmem:[%s5812_s2 + $0x50] sm:$0xff]  ;;  %v3478_v53 = vld [vmem:[%s5812_s2 + $0x68] sm:$0xff] }
  0x40   : > { %v3483_v54 = vld [vmem:[%s5812_s2 + $0x60] sm:$0xff]  ;;  %v3490_v55 = vld [vmem:[%s5812_s2 + $0x78] sm:$0xff]  ;;  %v3495_v56 = vld [vmem:[%s5812_s2 + $0x70] sm:$0xff] }
  0x41   : > { %v3502_v57 = vld [vmem:[%s5812_s2 + $0x88] sm:$0xff]  ;;  %v3507_v58 = vld [vmem:[%s5812_s2 + $0x80] sm:$0xff]  ;;  %v3514_v59 = vld [vmem:[%s5812_s2 + $0x98] sm:$0xff] }
  0x42   : > { %v3519_v60 = vld [vmem:[%s5812_s2 + $0x90] sm:$0xff]  ;;  %v3526_v61 = vld [vmem:[%s5812_s2 + $0xa8] sm:$0xff]  ;;  %v3531_v62 = vld [vmem:[%s5812_s2 + $0xa0] sm:$0xff] }
  0x43   : > { %417 = vperm.xlu1 %3045, %v347_v17   ;;  %412 = vperm.xlu0 %3044, %v346_v18   ;;  %v3538_v63 = vld [vmem:[%s5812_s2 + $0xb8] sm:$0xff]  ;;  %v3543_v0 = vld [vmem:[%s5812_s2 + $0xb0] sm:$0xff]  ;;  %v3550_v1 = vld [vmem:[%s5812_s2 + $0xc8] sm:$0xff] }
  0x44   : > { %v3555_v2 = vld [vmem:[%s5812_s2 + $0xc0] sm:$0xff]  ;;  %v3562_v3 = vld [vmem:[%s5812_s2 + $0xd8] sm:$0xff]  ;;  %v3567_v4 = vld [vmem:[%s5812_s2 + $0xd0] sm:$0xff] }
  0x45   : > { %v3574_v5 = vld [vmem:[%s5812_s2 + $0xe8] sm:$0xff]  ;;  %v3579_v6 = vld [vmem:[%s5812_s2 + $0xe0] sm:$0xff]  ;;  %v3586_v7 = vld [vmem:[%s5812_s2 + $0xf8] sm:$0xff] }
  0x46   : > { %v3591_v8 = vld [vmem:[%s5812_s2 + $0xf0] sm:$0xff] }
  0x47   : > { %427 = vperm.xlu1 %3045, %v349_v19   ;;  %422 = vperm.xlu0 %3044, %v348_v20  }
  0x4b   : > { %437 = vperm.xlu1 %3045, %v351_v21   ;;  %432 = vperm.xlu0 %3044, %v350_v22  }
  0x4f   : > { %447 = vperm.xlu1 %3045, %v353_v23   ;;  %442 = vperm.xlu0 %3044, %v352_v24  }
  0x53   : > { %457 = vperm.xlu1 %3045, %v355_v25   ;;  %452 = vperm.xlu0 %3044, %v354_v26  }
  0x57   : > { %467 = vperm.xlu1 %3045, %v357_v27   ;;  %462 = vperm.xlu0 %3044, %v356_v28  }
  0x5b   : > { %477 = vperm.xlu1 %3045, %v359_v29   ;;  %472 = vperm.xlu0 %3044, %v358_v30  }
  0x5f   : > { %487 = vperm.xlu1 %3045, %v361_v31   ;;  %482 = vperm.xlu0 %3044, %v360_v32  }
  0x63   : > { %497 = vperm.xlu1 %3045, %v363_v33   ;;  %492 = vperm.xlu0 %3044, %v362_v34  }
  0x67   : > { %507 = vperm.xlu1 %3045, %v365_v35   ;;  %502 = vperm.xlu0 %3044, %v364_v36  }
  0x6b   : > { %517 = vperm.xlu1 %3045, %v367_v37   ;;  %512 = vperm.xlu0 %3044, %v366_v38  }
  0x6f   : > { %527 = vperm.xlu1 %3045, %v369_v39   ;;  %522 = vperm.xlu0 %3044, %v368_v40  }
  0x73   : > { %545 = vperm.xlu1 %3045, %v3406_v41   ;;  %540 = vperm.xlu0 %3044, %v3411_v42  }
  0x77   : > { %555 = vperm.xlu1 %3045, %v3418_v43   ;;  %550 = vperm.xlu0 %3044, %v3423_v44  }
  0x7b   : > { %565 = vperm.xlu1 %3045, %v3430_v45   ;;  %560 = vperm.xlu0 %3044, %v3435_v46  }
  0x7f   : > { %575 = vperm.xlu1 %3045, %v3442_v47   ;;  %570 = vperm.xlu0 %3044, %v3447_v48  }
  0x83   : > { %585 = vperm.xlu1 %3045, %v3454_v49   ;;  %580 = vperm.xlu0 %3044, %v3459_v50  }
  0x87   : > { %595 = vperm.xlu1 %3045, %v3466_v51   ;;  %590 = vperm.xlu0 %3044, %v3471_v52  }
  0x8b   : > { %605 = vperm.xlu1 %3045, %v3478_v53   ;;  %600 = vperm.xlu0 %3044, %v3483_v54  }
  0x8f   : > { %615 = vperm.xlu1 %3045, %v3490_v55   ;;  %610 = vperm.xlu0 %3044, %v3495_v56  }
  0x93   : > { %625 = vperm.xlu1 %3045, %v3502_v57   ;;  %620 = vperm.xlu0 %3044, %v3507_v58  }
  0x97   : > { %635 = vperm.xlu1 %3045, %v3514_v59   ;;  %630 = vperm.xlu0 %3044, %v3519_v60  }
  0x9b   : > { %645 = vperm.xlu1 %3045, %v3526_v61   ;;  %640 = vperm.xlu0 %3044, %v3531_v62  }
  0x9f   : > { %655 = vperm.xlu1 %3045, %v3538_v63   ;;  %650 = vperm.xlu0 %3044, %v3543_v0  }
  0xa3   : > { %665 = vperm.xlu1 %3045, %v3550_v1   ;;  %660 = vperm.xlu0 %3044, %v3555_v2  }
  0xa7   : > { %675 = vperm.xlu1 %3045, %v3562_v3   ;;  %670 = vperm.xlu0 %3044, %v3567_v4  }
  0xab   : > { %685 = vperm.xlu1 %3045, %v3574_v5   ;;  %680 = vperm.xlu0 %3044, %v3579_v6  }
  0xae   : > { %v3593_v9 = vpop.permute.xlu1 %382  ;;  %v3595_v11 = vpop.permute.xlu0 %372 }
  0xaf   : > { %5893 = vst [vmem:[#allocation6_spill] sm:$0xff] %v3593_v9  ;;  %695 = vperm.xlu1 %3045, %v3586_v7   ;;  %690 = vperm.xlu0 %3044, %v3591_v8  }
  0xb2   : > { %v3599_v12 = vpop.permute.xlu1 %387  ;;  %v3601_v13 = vpop.permute.xlu0 %377 }
  0xb3   : > { %5894 = vst [vmem:[#allocation7_spill] sm:$0xff] %v3601_v13  ;;  %3047 = vset.pattern.permute.xlu1 %v3203_v14  ;;  %3046 = vset.pattern.permute.xlu0 %v3203_v14 }
  0xb4   : > { %799 = vperm.xlu1 %3047, %v3406_v41   ;;  %795 = vperm.xlu0 %3046, %v3411_v42  }
  0xb6   : > { %v3605_v15 = vpop.permute.xlu1 %397  ;;  %v3607_v16 = vpop.permute.xlu0 %392 }
  0xb7   : > { %5895 = vst [vmem:[#allocation8_spill] sm:$0xff] %v3607_v16 }
  0xb8   : > { %803 = vperm.xlu1 %3047, %v3423_v44   ;;  %807 = vperm.xlu0 %3046, %v3418_v43  }
  0xba   : > { %v3611_v17 = vpop.permute.xlu1 %407  ;;  %v3613_v18 = vpop.permute.xlu0 %402 }
  0xbb   : > { %5896 = vst [vmem:[#allocation9_spill] sm:$0xff] %v3613_v18 }
  0xbc   : > { %811 = vperm.xlu1 %3047, %v3435_v46   ;;  %815 = vperm.xlu0 %3046, %v3430_v45  }
  0xbe   : > { %v3617_v19 = vpop.permute.xlu1 %417  ;;  %v3619_v20 = vpop.permute.xlu0 %412 }
  0xbf   : > { %5897 = vst [vmem:[#allocation10_spill] sm:$0xff] %v3619_v20 }
  0xc0   : > { %819 = vperm.xlu1 %3047, %v3447_v48   ;;  %823 = vperm.xlu0 %3046, %v3442_v47  }
  0xc2   : > { %v3623_v21 = vpop.permute.xlu1 %427  ;;  %v3625_v22 = vpop.permute.xlu0 %422 }
  0xc3   : > { %5898 = vst [vmem:[#allocation11_spill] sm:$0xff] %v3625_v22 }
  0xc4   : > { %827 = vperm.xlu1 %3047, %v3459_v50   ;;  %831 = vperm.xlu0 %3046, %v3454_v49  }
  0xc6   : > { %v3629_v23 = vpop.permute.xlu1 %437  ;;  %v3631_v24 = vpop.permute.xlu0 %432 }
  0xc8   : > { %835 = vperm.xlu1 %3047, %v3471_v52   ;;  %839 = vperm.xlu0 %3046, %v3466_v51  }
  0xca   : > { %v3635_v25 = vpop.permute.xlu1 %447  ;;  %v3637_v26 = vpop.permute.xlu0 %442 }
  0xcb   : > { %5899 = vst [vmem:[#allocation12_spill] sm:$0xff] %v3635_v25 }
  0xcc   : > { %843 = vperm.xlu1 %3047, %v3483_v54   ;;  %847 = vperm.xlu0 %3046, %v3478_v53  }
  0xce   : > { %v3641_v27 = vpop.permute.xlu1 %457  ;;  %v3643_v28 = vpop.permute.xlu0 %452 }
  0xcf   : > { %5900 = vst [vmem:[#allocation13_spill] sm:$0xff] %v3641_v27 }
  0xd0   : > { %851 = vperm.xlu1 %3047, %v3495_v56   ;;  %855 = vperm.xlu0 %3046, %v3490_v55  }
  0xd2   : > { %v3647_v29 = vpop.permute.xlu1 %467  ;;  %v3649_v30 = vpop.permute.xlu0 %462 }
  0xd3   : > { %5901 = vst [vmem:[#allocation14_spill] sm:$0xff] %v3647_v29 }
  0xd4   : > { %859 = vperm.xlu1 %3047, %v3507_v58   ;;  %863 = vperm.xlu0 %3046, %v3502_v57  }
  0xd6   : > { %v3653_v31 = vpop.permute.xlu1 %477  ;;  %v3655_v32 = vpop.permute.xlu0 %472 }
  0xd7   : > { %5902 = vst [vmem:[#allocation15_spill] sm:$0xff] %v3653_v31  ;;  %5903 = vst [vmem:[#allocation16_spill] sm:$0xff] %v3655_v32  ;;  %v3204_v32 = vmov 2  }
  0xd8   : > { %867 = vperm.xlu1 %3047, %v3519_v60   ;;  %871 = vperm.xlu0 %3046, %v3514_v59  }
  0xda   : > { %v3659_v33 = vpop.permute.xlu1 %487  ;;  %v3661_v34 = vpop.permute.xlu0 %482 }
  0xdb   : > { %5904 = vst [vmem:[#allocation17_spill] sm:$0xff] %v3659_v33  ;;  %5905 = vst [vmem:[#allocation18_spill] sm:$0xff] %v3661_v34 }
  0xdc   : > { %875 = vperm.xlu1 %3047, %v3531_v62   ;;  %879 = vperm.xlu0 %3046, %v3526_v61  }
  0xde   : > { %v3665_v35 = vpop.permute.xlu1 %497  ;;  %v3667_v36 = vpop.permute.xlu0 %492 }
  0xdf   : > { %5906 = vst [vmem:[#allocation19_spill] sm:$0xff] %v3665_v35  ;;  %5907 = vst [vmem:[#allocation20_spill] sm:$0xff] %v3667_v36 }
  0xe0   : > { %883 = vperm.xlu1 %3047, %v3543_v0   ;;  %887 = vperm.xlu0 %3046, %v3538_v63  }
  0xe2   : > { %v3671_v37 = vpop.permute.xlu1 %507  ;;  %v3673_v38 = vpop.permute.xlu0 %502 }
  0xe3   : > { %5908 = vst [vmem:[#allocation21_spill] sm:$0xff] %v3671_v37  ;;  %5909 = vst [vmem:[#allocation22_spill] sm:$0xff] %v3673_v38 }
  0xe4   : > { %891 = vperm.xlu1 %3047, %v3555_v2   ;;  %895 = vperm.xlu0 %3046, %v3550_v1  }
  0xe6   : > { %v3677_v39 = vpop.permute.xlu1 %517  ;;  %v3679_v40 = vpop.permute.xlu0 %512 }
  0xe7   : > { %5910 = vst [vmem:[#allocation23_spill] sm:$0xff] %v3677_v39  ;;  %5911 = vst [vmem:[#allocation24_spill] sm:$0xff] %v3679_v40 }
  0xe8   : > { %899 = vperm.xlu1 %3047, %v3567_v4   ;;  %903 = vperm.xlu0 %3046, %v3562_v3  }
  0xea   : > { %v3683_v14 = vpop.permute.xlu1 %527  ;;  %v3685_v10 = vpop.permute.xlu0 %522 }
  0xeb   : > { %5912 = vst [vmem:[#allocation25_spill] sm:$0xff] %v3683_v14  ;;  %5913 = vst [vmem:[#allocation26_spill] sm:$0xff] %v3685_v10 }
  0xec   : > { %907 = vperm.xlu1 %3047, %v3579_v6   ;;  %911 = vperm.xlu0 %3046, %v3574_v5  }
  0xee   : > { %v3689_v37 = vpop.permute.xlu1 %545  ;;  %v3691_v35 = vpop.permute.xlu0 %540 }
  0xef   : > { %5914 = vst [vmem:[#allocation27_spill] sm:$0xff] %v3689_v37 }
  0xf0   : > { %915 = vperm.xlu1 %3047, %v3591_v8   ;;  %919 = vperm.xlu0 %3046, %v3586_v7  }
  0xf2   : > { %v3695_v39 = vpop.permute.xlu1 %555  ;;  %v3697_v34 = vpop.permute.xlu0 %550 }
  0xf3   : > { %5915 = vst [vmem:[#allocation28_spill] sm:$0xff] %v3697_v34 }
  0xf4   : > { %3048 = vset.pattern.permute.xlu1 %v3204_v32  ;;  %3049 = vset.pattern.permute.xlu0 %v3204_v32 }
  0xf5   : > { %1019 = vperm.xlu1 %3048, %v3411_v42   ;;  %1023 = vperm.xlu0 %3049, %v3406_v41  }
  0xf6   : > { %v3701_v14 = vpop.permute.xlu1 %565  ;;  %v3703_v22 = vpop.permute.xlu0 %560 }
  0xf7   : > { %5916 = vst [vmem:[#allocation29_spill] sm:$0xff] %v3703_v22 }
  0xf9   : > { %1027 = vperm.xlu1 %3048, %v3423_v44   ;;  %1035 = vperm.xlu0 %3049, %v3435_v46  }
  0xfa   : > { %v3707_v18 = vpop.permute.xlu1 %575  ;;  %v3709_v20 = vpop.permute.xlu0 %570 }
  0xfb   : > { %5917 = vst [vmem:[#allocation30_spill] sm:$0xff] %v3709_v20 }
  0xfd   : > { %1031 = vperm.xlu1 %3048, %v3418_v43   ;;  %1043 = vperm.xlu0 %3049, %v3447_v48  }
  0xfe   : > { %v3713_v32 = vpop.permute.xlu1 %585  ;;  %v3715_v16 = vpop.permute.xlu0 %580 }
  0xff   : > { %5918 = vst [vmem:[#allocation31_spill] sm:$0xff] %v3715_v16 }
 0x101   : > { %1039 = vperm.xlu1 %3048, %v3430_v45   ;;  %1051 = vperm.xlu0 %3049, %v3459_v50  }
 0x102   : > { %v3719_v9 = vpop.permute.xlu1 %595  ;;  %v3721_v22 = vpop.permute.xlu0 %590 }
 0x103   : > { %5919 = vst [vmem:[#allocation32_spill] sm:$0xff] %v3721_v22 }
 0x105   : > { %1047 = vperm.xlu1 %3048, %v3442_v47   ;;  %1059 = vperm.xlu0 %3049, %v3471_v52  }
 0x106   : > { %v3725_v20 = vpop.permute.xlu1 %605  ;;  %v3727_v13 = vpop.permute.xlu0 %600 }
 0x109   : > { %1055 = vperm.xlu1 %3048, %v3454_v49   ;;  %1067 = vperm.xlu0 %3049, %v3483_v54  }
 0x10a   : > { %v3731_v16 = vpop.permute.xlu1 %615  ;;  %v3733_v33 = vpop.permute.xlu0 %610 }
 0x10b   : > { %5920 = vst [vmem:[#allocation33_spill] sm:$0xff] %v3731_v16 }
 0x10d   : > { %1063 = vperm.xlu1 %3048, %v3466_v51   ;;  %1075 = vperm.xlu0 %3049, %v3495_v56  }
 0x10e   : > { %v3737_v22 = vpop.permute.xlu1 %625  ;;  %v3739_v34 = vpop.permute.xlu0 %620 }
 0x10f   : > { %5921 = vst [vmem:[#allocation34_spill] sm:$0xff] %v3737_v22 }
 0x111   : > { %1071 = vperm.xlu1 %3048, %v3478_v53   ;;  %1083 = vperm.xlu0 %3049, %v3507_v58  }
 0x112   : > { %v3743_v37 = vpop.permute.xlu1 %635  ;;  %v3745_v31 = vpop.permute.xlu0 %630 }
 0x113   : > { %5922 = vst [vmem:[#allocation35_spill] sm:$0xff] %v3743_v37 }
 0x115   : > { %1079 = vperm.xlu1 %3048, %v3490_v55   ;;  %1091 = vperm.xlu0 %3049, %v3519_v60  }
 0x116   : > { %v3749_v29 = vpop.permute.xlu1 %645  ;;  %v3751_v27 = vpop.permute.xlu0 %640 }
 0x117   : > { %5923 = vst [vmem:[#allocation36_spill] sm:$0xff] %v3749_v29  ;;  %5924 = vst [vmem:[#allocation37_spill] sm:$0xff] %v3751_v27 }
 0x119   : > { %1087 = vperm.xlu1 %3048, %v3502_v57   ;;  %1099 = vperm.xlu0 %3049, %v3531_v62  }
 0x11a   : > { %v3755_v22 = vpop.permute.xlu1 %655  ;;  %v3757_v25 = vpop.permute.xlu0 %650 }
 0x11b   : > { %5925 = vst [vmem:[#allocation38_spill] sm:$0xff] %v3755_v22  ;;  %5926 = vst [vmem:[#allocation39_spill] sm:$0xff] %v3757_v25 }
 0x11d   : > { %1095 = vperm.xlu1 %3048, %v3514_v59   ;;  %1107 = vperm.xlu0 %3049, %v3543_v0  }
 0x11e   : > { %v3761_v37 = vpop.permute.xlu1 %665  ;;  %v3763_v16 = vpop.permute.xlu0 %660 }
 0x11f   : > { %5927 = vst [vmem:[#allocation40_spill] sm:$0xff] %v3761_v37 }
 0x121   : > { %1103 = vperm.xlu1 %3048, %v3526_v61   ;;  %1115 = vperm.xlu0 %3049, %v3555_v2  }
 0x122   : > { %v3767_v27 = vpop.permute.xlu1 %675  ;;  %v3769_v29 = vpop.permute.xlu0 %670 }
 0x123   : > { %5928 = vst [vmem:[#allocation41_spill] sm:$0xff] %v3767_v27 }
 0x125   : > { %1111 = vperm.xlu1 %3048, %v3538_v63   ;;  %1123 = vperm.xlu0 %3049, %v3567_v4  }
 0x126   : > { %v3773_v25 = vpop.permute.xlu1 %685  ;;  %v3775_v22 = vpop.permute.xlu0 %680 }
 0x127   : > { %5929 = vst [vmem:[#allocation42_spill] sm:$0xff] %v3773_v25  ;;  %v3205_v25 = vmov 3  }
 0x129   : > { %1119 = vperm.xlu1 %3048, %v3550_v1   ;;  %1131 = vperm.xlu0 %3049, %v3579_v6  }
 0x12a   : > { %v3779_v37 = vpop.permute.xlu1 %695  ;;  %v3781_v10 = vpop.permute.xlu0 %690 }
 0x12b   : > { %5930 = vst [vmem:[#allocation43_spill] sm:$0xff] %v3779_v37  ;;  %5931 = vst [vmem:[#allocation44_spill] sm:$0xff] %v3781_v10 }
 0x12d   : > { %1127 = vperm.xlu1 %3048, %v3562_v3   ;;  %1139 = vperm.xlu0 %3049, %v3591_v8  }
 0x12f   : > { %v3785_v27 = vpop.permute.xlu1 %799  ;;  %v3787_v40 = vpop.permute.xlu0 %795 }
 0x130   : > { %5932 = vst [vmem:[#allocation45_spill] sm:$0xff] %v3785_v27  ;;  %5933 = vst [vmem:[#allocation46_spill] sm:$0xff] %v3787_v40 }
 0x131   : > { %1135 = vperm.xlu1 %3048, %v3574_v5   ;;  %3050 = vset.pattern.permute.xlu0 %v3205_v25 }
 0x132   : > { %1243 = vperm.xlu0 %3050, %v3411_v42  }
 0x133   : > { %v3791_v38 = vpop.permute.xlu1 %803  ;;  %v3793_v36 = vpop.permute.xlu0 %807 }
 0x134   : > { %5934 = vst [vmem:[#allocation47_spill] sm:$0xff] %v3791_v38  ;;  %5935 = vst [vmem:[#allocation48_spill] sm:$0xff] %v3793_v36 }
 0x135   : > { %1143 = vperm.xlu1 %3048, %v3586_v7  }
 0x136   : > { %1255 = vperm.xlu0 %3050, %v3418_v43  }
 0x137   : > { %v3797_v37 = vpop.permute.xlu1 %811  ;;  %v3799_v10 = vpop.permute.xlu0 %815 }
 0x138   : > { %5936 = vst [vmem:[#allocation49_spill] sm:$0xff] %v3797_v37  ;;  %5937 = vst [vmem:[#allocation50_spill] sm:$0xff] %v3799_v10 }
 0x139   : > { %3051 = vset.pattern.permute.xlu1 %v3205_v25 }
 0x13a   : > { %1247 = vperm.xlu1 %3051, %v3406_v41   ;;  %1263 = vperm.xlu0 %3050, %v3430_v45  }
 0x13b   : > { %v3803_v27 = vpop.permute.xlu1 %819  ;;  %v3805_v40 = vpop.permute.xlu0 %823 }
 0x13c   : > { %5938 = vst [vmem:[#allocation51_spill] sm:$0xff] %v3803_v27  ;;  %5939 = vst [vmem:[#allocation52_spill] sm:$0xff] %v3805_v40 }
 0x13e   : > { %1251 = vperm.xlu1 %3051, %v3423_v44   ;;  %1271 = vperm.xlu0 %3050, %v3442_v47  }
 0x13f   : > { %v3809_v38 = vpop.permute.xlu1 %827  ;;  %v3811_v36 = vpop.permute.xlu0 %831 }
 0x140   : > { %5940 = vst [vmem:[#allocation53_spill] sm:$0xff] %v3809_v38  ;;  %5941 = vst [vmem:[#allocation54_spill] sm:$0xff] %v3811_v36 }
 0x142   : > { %1259 = vperm.xlu1 %3051, %v3435_v46   ;;  %1279 = vperm.xlu0 %3050, %v3454_v49  }
 0x143   : > { %v3815_v25 = vpop.permute.xlu1 %835  ;;  %v3817_v37 = vpop.permute.xlu0 %839 }
 0x144   : > { %5942 = vst [vmem:[#allocation55_spill] sm:$0xff] %v3815_v25  ;;  %5943 = vst [vmem:[#allocation56_spill] sm:$0xff] %v3817_v37 }
 0x146   : > { %1267 = vperm.xlu1 %3051, %v3447_v48   ;;  %1287 = vperm.xlu0 %3050, %v3466_v51  }
 0x147   : > { %v3821_v27 = vpop.permute.xlu1 %843  ;;  %v3823_v40 = vpop.permute.xlu0 %847 }
 0x148   : > { %5944 = vst [vmem:[#allocation57_spill] sm:$0xff] %v3821_v27  ;;  %5945 = vst [vmem:[#allocation58_spill] sm:$0xff] %v3823_v40 }
 0x14a   : > { %1275 = vperm.xlu1 %3051, %v3459_v50   ;;  %1295 = vperm.xlu0 %3050, %v3478_v53  }
 0x14b   : > { %v3827_v38 = vpop.permute.xlu1 %851  ;;  %v3829_v36 = vpop.permute.xlu0 %855 }
 0x14c   : > { %5946 = vst [vmem:[#allocation59_spill] sm:$0xff] %v3827_v38  ;;  %5947 = vst [vmem:[#allocation60_spill] sm:$0xff] %v3829_v36 }
 0x14e   : > { %1283 = vperm.xlu1 %3051, %v3471_v52   ;;  %1303 = vperm.xlu0 %3050, %v3490_v55  }
 0x14f   : > { %v3833_v25 = vpop.permute.xlu1 %859  ;;  %v3835_v37 = vpop.permute.xlu0 %863 }
 0x150   : > { %5948 = vst [vmem:[#allocation61_spill] sm:$0xff] %v3833_v25  ;;  %5949 = vst [vmem:[#allocation62_spill] sm:$0xff] %v3835_v37 }
 0x152   : > { %1291 = vperm.xlu1 %3051, %v3483_v54   ;;  %1311 = vperm.xlu0 %3050, %v3502_v57  }
 0x153   : > { %v3839_v40 = vpop.permute.xlu1 %867  ;;  %v3841_v27 = vpop.permute.xlu0 %871 }
 0x154   : > { %5950 = vst [vmem:[#allocation63_spill] sm:$0xff] %v3839_v40  ;;  %5951 = vst [vmem:[#allocation64_spill] sm:$0xff] %v3841_v27 }
 0x156   : > { %1299 = vperm.xlu1 %3051, %v3495_v56   ;;  %1319 = vperm.xlu0 %3050, %v3514_v59  }
 0x157   : > { %v3845_v36 = vpop.permute.xlu1 %875  ;;  %v3847_v38 = vpop.permute.xlu0 %879 }
 0x158   : > { %5952 = vst [vmem:[#allocation65_spill] sm:$0xff] %v3845_v36  ;;  %5953 = vst [vmem:[#allocation66_spill] sm:$0xff] %v3847_v38 }
 0x15a   : > { %1307 = vperm.xlu1 %3051, %v3507_v58   ;;  %1327 = vperm.xlu0 %3050, %v3526_v61  }
 0x15b   : > { %v3851_v37 = vpop.permute.xlu1 %883  ;;  %v3853_v25 = vpop.permute.xlu0 %887 }
 0x15c   : > { %5954 = vst [vmem:[#allocation67_spill] sm:$0xff] %v3851_v37  ;;  %5955 = vst [vmem:[#allocation68_spill] sm:$0xff] %v3853_v25 }
 0x15e   : > { %1315 = vperm.xlu1 %3051, %v3519_v60   ;;  %1335 = vperm.xlu0 %3050, %v3538_v63  }
 0x15f   : > { %v3857_v27 = vpop.permute.xlu1 %891  ;;  %v3859_v40 = vpop.permute.xlu0 %895 }
 0x160   : > { %5956 = vst [vmem:[#allocation69_spill] sm:$0xff] %v3857_v27  ;;  %5957 = vst [vmem:[#allocation70_spill] sm:$0xff] %v3859_v40 }
 0x162   : > { %1323 = vperm.xlu1 %3051, %v3531_v62   ;;  %1343 = vperm.xlu0 %3050, %v3550_v1  }
 0x163   : > { %v3863_v36 = vpop.permute.xlu1 %899  ;;  %v3865_v38 = vpop.permute.xlu0 %903 }
 0x164   : > { %5958 = vst [vmem:[#allocation71_spill] sm:$0xff] %v3863_v36  ;;  %5959 = vst [vmem:[#allocation72_spill] sm:$0xff] %v3865_v38 }
 0x166   : > { %1331 = vperm.xlu1 %3051, %v3543_v0   ;;  %1351 = vperm.xlu0 %3050, %v3562_v3  }
 0x167   : > { %v3869_v37 = vpop.permute.xlu1 %907  ;;  %v3871_v25 = vpop.permute.xlu0 %911 }
 0x168   : > { %5960 = vst [vmem:[#allocation73_spill] sm:$0xff] %v3869_v37  ;;  %5961 = vst [vmem:[#allocation74_spill] sm:$0xff] %v3871_v25  ;;  %v3206_v37 = vmov 4  }
 0x16a   : > { %1339 = vperm.xlu1 %3051, %v3555_v2   ;;  %1359 = vperm.xlu0 %3050, %v3574_v5  }
 0x16b   : > { %v3875_v40 = vpop.permute.xlu1 %915  ;;  %v3877_v27 = vpop.permute.xlu0 %919 }
 0x16c   : > { %5962 = vst [vmem:[#allocation75_spill] sm:$0xff] %v3875_v40  ;;  %5963 = vst [vmem:[#allocation76_spill] sm:$0xff] %v3877_v27 }
 0x16e   : > { %1347 = vperm.xlu1 %3051, %v3567_v4   ;;  %1367 = vperm.xlu0 %3050, %v3586_v7  }
 0x170   : > { %v3881_v38 = vpop.permute.xlu1 %1019  ;;  %v3883_v36 = vpop.permute.xlu0 %1023 }
 0x171   : > { %5964 = vst [vmem:[#allocation77_spill] sm:$0xff] %v3881_v38  ;;  %5965 = vst [vmem:[#allocation78_spill] sm:$0xff] %v3883_v36 }
 0x172   : > { %1355 = vperm.xlu1 %3051, %v3579_v6   ;;  %3053 = vset.pattern.permute.xlu0 %v3206_v37 }
 0x173   : > { %1471 = vperm.xlu0 %3053, %v3406_v41  }
 0x174   : > { %v3887_v25 = vpop.permute.xlu1 %1027  ;;  %v3889_v10 = vpop.permute.xlu0 %1035 }
 0x175   : > { %5966 = vst [vmem:[#allocation79_spill] sm:$0xff] %v3887_v25  ;;  %5967 = vst [vmem:[#allocation80_spill] sm:$0xff] %v3889_v10 }
 0x176   : > { %1363 = vperm.xlu1 %3051, %v3591_v8  }
 0x177   : > { %1483 = vperm.xlu0 %3053, %v3435_v46  }
 0x178   : > { %v3893_v27 = vpop.permute.xlu1 %1031  ;;  %v3895_v40 = vpop.permute.xlu0 %1043 }
 0x179   : > { %5968 = vst [vmem:[#allocation81_spill] sm:$0xff] %v3893_v27  ;;  %5969 = vst [vmem:[#allocation82_spill] sm:$0xff] %v3895_v40 }
 0x17a   : > { %3052 = vset.pattern.permute.xlu1 %v3206_v37 }
 0x17b   : > { %1467 = vperm.xlu1 %3052, %v3411_v42   ;;  %1491 = vperm.xlu0 %3053, %v3447_v48  }
 0x17c   : > { %v3899_v36 = vpop.permute.xlu1 %1039  ;;  %v3901_v38 = vpop.permute.xlu0 %1051 }
 0x17d   : > { %5970 = vst [vmem:[#allocation83_spill] sm:$0xff] %v3899_v36  ;;  %5971 = vst [vmem:[#allocation84_spill] sm:$0xff] %v3901_v38 }
 0x17f   : > { %1475 = vperm.xlu1 %3052, %v3423_v44   ;;  %1499 = vperm.xlu0 %3053, %v3459_v50  }
 0x180   : > { %v3905_v25 = vpop.permute.xlu1 %1047  ;;  %v3907_v10 = vpop.permute.xlu0 %1059 }
 0x181   : > { %5972 = vst [vmem:[#allocation85_spill] sm:$0xff] %v3905_v25  ;;  %5973 = vst [vmem:[#allocation86_spill] sm:$0xff] %v3907_v10 }
 0x183   : > { %1479 = vperm.xlu1 %3052, %v3418_v43   ;;  %1507 = vperm.xlu0 %3053, %v3471_v52  }
 0x184   : > { %v3911_v37 = vpop.permute.xlu1 %1055  ;;  %v3913_v40 = vpop.permute.xlu0 %1067 }
 0x185   : > { %5974 = vst [vmem:[#allocation87_spill] sm:$0xff] %v3911_v37  ;;  %5975 = vst [vmem:[#allocation88_spill] sm:$0xff] %v3913_v40 }
 0x187   : > { %1487 = vperm.xlu1 %3052, %v3430_v45   ;;  %1515 = vperm.xlu0 %3053, %v3483_v54  }
 0x188   : > { %v3917_v38 = vpop.permute.xlu1 %1063  ;;  %v3919_v36 = vpop.permute.xlu0 %1075 }
 0x189   : > { %5976 = vst [vmem:[#allocation89_spill] sm:$0xff] %v3917_v38  ;;  %5977 = vst [vmem:[#allocation90_spill] sm:$0xff] %v3919_v36 }
 0x18b   : > { %1495 = vperm.xlu1 %3052, %v3442_v47   ;;  %1523 = vperm.xlu0 %3053, %v3495_v56  }
 0x18c   : > { %v3923_v10 = vpop.permute.xlu1 %1071  ;;  %v3925_v25 = vpop.permute.xlu0 %1083 }
 0x18d   : > { %5978 = vst [vmem:[#allocation91_spill] sm:$0xff] %v3923_v10  ;;  %5979 = vst [vmem:[#allocation92_spill] sm:$0xff] %v3925_v25 }
 0x18f   : > { %1503 = vperm.xlu1 %3052, %v3454_v49   ;;  %1531 = vperm.xlu0 %3053, %v3507_v58  }
 0x190   : > { %v3929_v37 = vpop.permute.xlu1 %1079  ;;  %v3931_v40 = vpop.permute.xlu0 %1091 }
 0x191   : > { %5980 = vst [vmem:[#allocation93_spill] sm:$0xff] %v3929_v37  ;;  %5981 = vst [vmem:[#allocation94_spill] sm:$0xff] %v3931_v40 }
 0x193   : > { %1511 = vperm.xlu1 %3052, %v3466_v51   ;;  %1539 = vperm.xlu0 %3053, %v3519_v60  }
 0x194   : > { %v3935_v38 = vpop.permute.xlu1 %1087  ;;  %v3937_v36 = vpop.permute.xlu0 %1099 }
 0x195   : > { %5982 = vst [vmem:[#allocation95_spill] sm:$0xff] %v3935_v38  ;;  %5983 = vst [vmem:[#allocation96_spill] sm:$0xff] %v3937_v36 }
 0x197   : > { %1519 = vperm.xlu1 %3052, %v3478_v53   ;;  %1547 = vperm.xlu0 %3053, %v3531_v62  }
 0x198   : > { %v3941_v10 = vpop.permute.xlu1 %1095  ;;  %v3943_v25 = vpop.permute.xlu0 %1107 }
 0x199   : > { %5984 = vst [vmem:[#allocation97_spill] sm:$0xff] %v3941_v10  ;;  %5985 = vst [vmem:[#allocation98_spill] sm:$0xff] %v3943_v25 }
 0x19b   : > { %1527 = vperm.xlu1 %3052, %v3490_v55   ;;  %1555 = vperm.xlu0 %3053, %v3543_v0  }
 0x19c   : > { %v3947_v37 = vpop.permute.xlu1 %1103  ;;  %v3949_v40 = vpop.permute.xlu0 %1115 }
 0x19d   : > { %5986 = vst [vmem:[#allocation99_spill] sm:$0xff] %v3947_v37  ;;  %5987 = vst [vmem:[#allocation100_spill] sm:$0xff] %v3949_v40 }
 0x19f   : > { %1535 = vperm.xlu1 %3052, %v3502_v57   ;;  %1563 = vperm.xlu0 %3053, %v3555_v2  }
 0x1a0   : > { %v3953_v36 = vpop.permute.xlu1 %1111  ;;  %v3955_v38 = vpop.permute.xlu0 %1123 }
 0x1a1   : > { %5988 = vst [vmem:[#allocation101_spill] sm:$0xff] %v3953_v36  ;;  %5989 = vst [vmem:[#allocation102_spill] sm:$0xff] %v3955_v38 }
 0x1a3   : > { %1543 = vperm.xlu1 %3052, %v3514_v59   ;;  %1571 = vperm.xlu0 %3053, %v3567_v4  }
 0x1a4   : > { %v3959_v25 = vpop.permute.xlu1 %1119  ;;  %v3961_v10 = vpop.permute.xlu0 %1131 }
 0x1a5   : > { %5990 = vst [vmem:[#allocation103_spill] sm:$0xff] %v3959_v25  ;;  %5991 = vst [vmem:[#allocation104_spill] sm:$0xff] %v3961_v10  ;;  %v3207_v25 = vmov 5  }
 0x1a7   : > { %1551 = vperm.xlu1 %3052, %v3526_v61   ;;  %1579 = vperm.xlu0 %3053, %v3579_v6  }
 0x1a8   : > { %v3965_v37 = vpop.permute.xlu1 %1127  ;;  %v3967_v27 = vpop.permute.xlu0 %1139 }
 0x1a9   : > { %5992 = vst [vmem:[#allocation105_spill] sm:$0xff] %v3965_v37  ;;  %5993 = vst [vmem:[#allocation106_spill] sm:$0xff] %v3967_v27 }
 0x1ab   : > { %1559 = vperm.xlu1 %3052, %v3538_v63   ;;  %1587 = vperm.xlu0 %3053, %v3591_v8  }
 0x1ac   : > { %v3971_v36 = vpop.permute.xlu1 %1135 }
 0x1ad   : > { %5994 = vst [vmem:[#allocation107_spill] sm:$0xff] %v3971_v36  ;;  %v3973_v38 = vpop.permute.xlu0 %1243 }
 0x1ae   : > { %5995 = vst [vmem:[#allocation108_spill] sm:$0xff] %v3973_v38 }
 0x1af   : > { %1567 = vperm.xlu1 %3052, %v3550_v1   ;;  %3054 = vset.pattern.permute.xlu0 %v3207_v25 }
 0x1b0   : > { %v3976_v10 = vpop.permute.xlu1 %1143  ;;  %1691 = vperm.xlu0 %3054, %v3411_v42  }
 0x1b1   : > { %5996 = vst [vmem:[#allocation109_spill] sm:$0xff] %v3976_v10  ;;  %v3979_v40 = vpop.permute.xlu0 %1255 }
 0x1b2   : > { %5997 = vst [vmem:[#allocation110_spill] sm:$0xff] %v3979_v40 }
 0x1b3   : > { %1575 = vperm.xlu1 %3052, %v3562_v3  }
 0x1b4   : > { %1703 = vperm.xlu0 %3054, %v3418_v43  }
 0x1b5   : > { %v3983_v37 = vpop.permute.xlu1 %1247  ;;  %v3985_v27 = vpop.permute.xlu0 %1263 }
 0x1b6   : > { %5998 = vst [vmem:[#allocation111_spill] sm:$0xff] %v3983_v37  ;;  %5999 = vst [vmem:[#allocation112_spill] sm:$0xff] %v3985_v27 }
 0x1b7   : > { %1583 = vperm.xlu1 %3052, %v3574_v5  }
 0x1b8   : > { %1711 = vperm.xlu0 %3054, %v3430_v45  }
 0x1b9   : > { %v3989_v36 = vpop.permute.xlu1 %1251  ;;  %v3991_v38 = vpop.permute.xlu0 %1271 }
 0x1ba   : > { %6000 = vst [vmem:[#allocation113_spill] sm:$0xff] %v3989_v36  ;;  %6001 = vst [vmem:[#allocation114_spill] sm:$0xff] %v3991_v38 }
 0x1bb   : > { %1591 = vperm.xlu1 %3052, %v3586_v7  }
 0x1bc   : > { %1719 = vperm.xlu0 %3054, %v3442_v47  }
 0x1bd   : > { %v3995_v10 = vpop.permute.xlu1 %1259  ;;  %v3997_v40 = vpop.permute.xlu0 %1279 }
 0x1be   : > { %6002 = vst [vmem:[#allocation115_spill] sm:$0xff] %v3995_v10  ;;  %6003 = vst [vmem:[#allocation116_spill] sm:$0xff] %v3997_v40 }
 0x1bf   : > { %3055 = vset.pattern.permute.xlu1 %v3207_v25 }
 0x1c0   : > { %1695 = vperm.xlu1 %3055, %v3406_v41   ;;  %1727 = vperm.xlu0 %3054, %v3454_v49  }
 0x1c1   : > { %v4001_v37 = vpop.permute.xlu1 %1267  ;;  %v4003_v27 = vpop.permute.xlu0 %1287 }
 0x1c2   : > { %6004 = vst [vmem:[#allocation117_spill] sm:$0xff] %v4001_v37  ;;  %6005 = vst [vmem:[#allocation118_spill] sm:$0xff] %v4003_v27 }
 0x1c4   : > { %1699 = vperm.xlu1 %3055, %v3423_v44   ;;  %1735 = vperm.xlu0 %3054, %v3466_v51  }
 0x1c5   : > { %v4007_v36 = vpop.permute.xlu1 %1275  ;;  %v4009_v38 = vpop.permute.xlu0 %1295 }
 0x1c6   : > { %6006 = vst [vmem:[#allocation119_spill] sm:$0xff] %v4007_v36  ;;  %6007 = vst [vmem:[#allocation120_spill] sm:$0xff] %v4009_v38 }
 0x1c8   : > { %1707 = vperm.xlu1 %3055, %v3435_v46   ;;  %1743 = vperm.xlu0 %3054, %v3478_v53  }
 0x1c9   : > { %v4013_v25 = vpop.permute.xlu1 %1283  ;;  %v4015_v10 = vpop.permute.xlu0 %1303 }
 0x1ca   : > { %6008 = vst [vmem:[#allocation121_spill] sm:$0xff] %v4013_v25  ;;  %6009 = vst [vmem:[#allocation122_spill] sm:$0xff] %v4015_v10 }
 0x1cc   : > { %1715 = vperm.xlu1 %3055, %v3447_v48   ;;  %1751 = vperm.xlu0 %3054, %v3490_v55  }
 0x1cd   : > { %v4019_v37 = vpop.permute.xlu1 %1291  ;;  %v4021_v27 = vpop.permute.xlu0 %1311 }
 0x1ce   : > { %6010 = vst [vmem:[#allocation123_spill] sm:$0xff] %v4019_v37  ;;  %6011 = vst [vmem:[#allocation124_spill] sm:$0xff] %v4021_v27  ;;  %v5818_v37 = vmov 6  }
 0x1d0   : > { %1723 = vperm.xlu1 %3055, %v3459_v50   ;;  %1759 = vperm.xlu0 %3054, %v3502_v57  }
 0x1d1   : > { %v4025_v36 = vpop.permute.xlu1 %1299  ;;  %v4027_v38 = vpop.permute.xlu0 %1319 }
 0x1d2   : > { %6012 = vst [vmem:[#allocation125_spill] sm:$0xff] %v4025_v36  ;;  %6013 = vst [vmem:[#allocation126_spill] sm:$0xff] %v4027_v38 }
 0x1d4   : > { %1731 = vperm.xlu1 %3055, %v3471_v52   ;;  %1767 = vperm.xlu0 %3054, %v3514_v59  }
 0x1d5   : > { %v4031_v25 = vpop.permute.xlu1 %1307  ;;  %v4033_v10 = vpop.permute.xlu0 %1327 }
 0x1d6   : > { %6014 = vst [vmem:[#allocation127_spill] sm:$0xff] %v4031_v25  ;;  %6015 = vst [vmem:[#allocation128_spill] sm:$0xff] %v4033_v10 }
 0x1d8   : > { %1739 = vperm.xlu1 %3055, %v3483_v54   ;;  %1775 = vperm.xlu0 %3054, %v3526_v61  }
 0x1d9   : > { %v4037_v27 = vpop.permute.xlu1 %1315  ;;  %v4039_v40 = vpop.permute.xlu0 %1335 }
 0x1da   : > { %6016 = vst [vmem:[#allocation129_spill] sm:$0xff] %v4037_v27  ;;  %6017 = vst [vmem:[#allocation130_spill] sm:$0xff] %v4039_v40 }
 0x1dc   : > { %1747 = vperm.xlu1 %3055, %v3495_v56   ;;  %1783 = vperm.xlu0 %3054, %v3538_v63  }
 0x1dd   : > { %v4043_v38 = vpop.permute.xlu1 %1323  ;;  %v4045_v36 = vpop.permute.xlu0 %1343 }
 0x1de   : > { %6018 = vst [vmem:[#allocation131_spill] sm:$0xff] %v4043_v38  ;;  %6019 = vst [vmem:[#allocation132_spill] sm:$0xff] %v4045_v36 }
 0x1e0   : > { %1755 = vperm.xlu1 %3055, %v3507_v58   ;;  %1791 = vperm.xlu0 %3054, %v3550_v1  }
 0x1e1   : > { %v4049_v10 = vpop.permute.xlu1 %1331  ;;  %v4051_v25 = vpop.permute.xlu0 %1351 }
 0x1e2   : > { %6020 = vst [vmem:[#allocation133_spill] sm:$0xff] %v4049_v10  ;;  %6021 = vst [vmem:[#allocation134_spill] sm:$0xff] %v4051_v25 }
 0x1e4   : > { %1763 = vperm.xlu1 %3055, %v3519_v60   ;;  %1799 = vperm.xlu0 %3054, %v3562_v3  }
 0x1e5   : > { %v4055_v40 = vpop.permute.xlu1 %1339  ;;  %v4057_v27 = vpop.permute.xlu0 %1359 }
 0x1e6   : > { %6022 = vst [vmem:[#allocation135_spill] sm:$0xff] %v4057_v27 }
 0x1e8   : > { %1771 = vperm.xlu1 %3055, %v3531_v62   ;;  %1807 = vperm.xlu0 %3054, %v3574_v5  }
 0x1e9   : > { %v4061_v36 = vpop.permute.xlu1 %1347  ;;  %v4063_v38 = vpop.permute.xlu0 %1367 }
 0x1ea   : > { %6023 = vst [vmem:[#allocation136_spill] sm:$0xff] %v4061_v36  ;;  %6024 = vst [vmem:[#allocation137_spill] sm:$0xff] %v4063_v38  ;;  %v6035_v36 = vmov 6  }
 0x1ec   : > { %1779 = vperm.xlu1 %3055, %v3543_v0   ;;  %1815 = vperm.xlu0 %3054, %v3586_v7  }
 0x1ed   : > { %v4067_v25 = vpop.permute.xlu1 %1355 }
 0x1ee   : > { %6025 = vst [vmem:[#allocation138_spill] sm:$0xff] %v4067_v25  ;;  %v4069_v10 = vpop.permute.xlu0 %1471 }
 0x1ef   : > { %6026 = vst [vmem:[#allocation139_spill] sm:$0xff] %v4069_v10 }
 0x1f0   : > { %1787 = vperm.xlu1 %3055, %v3555_v2   ;;  %3057 = vset.pattern.permute.xlu0 %v5818_v37 }
 0x1f1   : > { %v4073_v27 = vpop.permute.xlu1 %1363  ;;  %1919 = vperm.xlu0 %3057, %v3406_v41  }
 0x1f2   : > { %6027 = vst [vmem:[#allocation140_spill] sm:$0xff] %v4073_v27  ;;  %v4076_v5 = vpop.permute.xlu0 %1483 }
 0x1f3   : > { %6028 = vst [vmem:[#allocation141_spill] sm:$0xff] %v4076_v5 }
 0x1f4   : > { %1795 = vperm.xlu1 %3055, %v3567_v4  }
 0x1f5   : > { %1931 = vperm.xlu0 %3057, %v3435_v46  }
 0x1f6   : > { %v4080_v38 = vpop.permute.xlu1 %1467  ;;  %v4082_v25 = vpop.permute.xlu0 %1491 }
 0x1f7   : > { %6029 = vst [vmem:[#allocation142_spill] sm:$0xff] %v4080_v38  ;;  %6030 = vst [vmem:[#allocation143_spill] sm:$0xff] %v4082_v25 }
 0x1f8   : > { %1803 = vperm.xlu1 %3055, %v3579_v6  }
 0x1f9   : > { %1939 = vperm.xlu0 %3057, %v3447_v48  }
 0x1fa   : > { %v4086_v10 = vpop.permute.xlu1 %1475  ;;  %v4088_v37 = vpop.permute.xlu0 %1499 }
 0x1fb   : > { %6031 = vst [vmem:[#allocation144_spill] sm:$0xff] %v4086_v10  ;;  %6032 = vst [vmem:[#allocation145_spill] sm:$0xff] %v4088_v37 }
 0x1fc   : > { %1811 = vperm.xlu1 %3055, %v3591_v8  }
 0x1fd   : > { %1947 = vperm.xlu0 %3057, %v3459_v50  }
 0x1fe   : > { %v4092_v5 = vpop.permute.xlu1 %1479  ;;  %v4094_v27 = vpop.permute.xlu0 %1507 }
 0x1ff   : > { %6033 = vst [vmem:[#allocation146_spill] sm:$0xff] %v4092_v5  ;;  %6034 = vst [vmem:[#allocation147_spill] sm:$0xff] %v4094_v27 }
 0x200   : > { %3056 = vset.pattern.permute.xlu1 %v6035_v36 }
 0x201   : > { %1915 = vperm.xlu1 %3056, %v3411_v42   ;;  %1955 = vperm.xlu0 %3057, %v3471_v52  }
 0x202   : > { %v4099_v25 = vpop.permute.xlu1 %1487  ;;  %v4101_v38 = vpop.permute.xlu0 %1515 }
 0x203   : > { %6036 = vst [vmem:[#allocation148_spill] sm:$0xff] %v4099_v25  ;;  %6037 = vst [vmem:[#allocation149_spill] sm:$0xff] %v4101_v38 }
 0x205   : > { %1923 = vperm.xlu1 %3056, %v3423_v44   ;;  %1963 = vperm.xlu0 %3057, %v3483_v54  }
 0x206   : > { %v4105_v37 = vpop.permute.xlu1 %1495  ;;  %v4107_v10 = vpop.permute.xlu0 %1523 }
 0x207   : > { %6038 = vst [vmem:[#allocation150_spill] sm:$0xff] %v4105_v37  ;;  %6039 = vst [vmem:[#allocation151_spill] sm:$0xff] %v4107_v10 }
 0x209   : > { %1927 = vperm.xlu1 %3056, %v3418_v43   ;;  %1971 = vperm.xlu0 %3057, %v3495_v56  }
 0x20a   : > { %v4111_v27 = vpop.permute.xlu1 %1503  ;;  %v4113_v5 = vpop.permute.xlu0 %1531 }
 0x20b   : > { %6040 = vst [vmem:[#allocation152_spill] sm:$0xff] %v4111_v27  ;;  %6041 = vst [vmem:[#allocation153_spill] sm:$0xff] %v4113_v5 }
 0x20d   : > { %1935 = vperm.xlu1 %3056, %v3430_v45   ;;  %1979 = vperm.xlu0 %3057, %v3507_v58  }
 0x20e   : > { %v4117_v25 = vpop.permute.xlu1 %1511  ;;  %v4119_v38 = vpop.permute.xlu0 %1539 }
 0x20f   : > { %6042 = vst [vmem:[#allocation154_spill] sm:$0xff] %v4117_v25  ;;  %6043 = vst [vmem:[#allocation155_spill] sm:$0xff] %v4119_v38 }
 0x211   : > { %1943 = vperm.xlu1 %3056, %v3442_v47   ;;  %1987 = vperm.xlu0 %3057, %v3519_v60  }
 0x212   : > { %v4123_v37 = vpop.permute.xlu1 %1519  ;;  %v4125_v10 = vpop.permute.xlu0 %1547 }
 0x213   : > { %6044 = vst [vmem:[#allocation156_spill] sm:$0xff] %v4123_v37  ;;  %6045 = vst [vmem:[#allocation157_spill] sm:$0xff] %v4125_v10 }
 0x215   : > { %1951 = vperm.xlu1 %3056, %v3454_v49   ;;  %1995 = vperm.xlu0 %3057, %v3531_v62  }
 0x216   : > { %v4129_v27 = vpop.permute.xlu1 %1527  ;;  %v4131_v5 = vpop.permute.xlu0 %1555 }
 0x217   : > { %6046 = vst [vmem:[#allocation158_spill] sm:$0xff] %v4129_v27  ;;  %6047 = vst [vmem:[#allocation159_spill] sm:$0xff] %v4131_v5 }
 0x219   : > { %1959 = vperm.xlu1 %3056, %v3466_v51   ;;  %2003 = vperm.xlu0 %3057, %v3543_v0  }
 0x21a   : > { %v4135_v25 = vpop.permute.xlu1 %1535  ;;  %v4137_v38 = vpop.permute.xlu0 %1563 }
 0x21b   : > { %6048 = vst [vmem:[#allocation160_spill] sm:$0xff] %v4135_v25 }
 0x21d   : > { %1967 = vperm.xlu1 %3056, %v3478_v53   ;;  %2011 = vperm.xlu0 %3057, %v3555_v2   ;;  %v5820_v2 = vmov 7  }
 0x21e   : > { %v4141_v10 = vpop.permute.xlu1 %1543  ;;  %v4143_v37 = vpop.permute.xlu0 %1571 }
 0x21f   : > { %6049 = vst [vmem:[#allocation161_spill] sm:$0xff] %v4141_v10 }
 0x221   : > { %1975 = vperm.xlu1 %3056, %v3490_v55   ;;  %2019 = vperm.xlu0 %3057, %v3567_v4  }
 0x222   : > { %v4147_v62 = vpop.permute.xlu1 %1551  ;;  %v4149_v5 = vpop.permute.xlu0 %1579 }
 0x223   : > { %6050 = vst [vmem:[#allocation162_spill] sm:$0xff] %v4147_v62 }
 0x225   : > { %1983 = vperm.xlu1 %3056, %v3502_v57   ;;  %2035 = vperm.xlu0 %3057, %v3591_v8  }
 0x226   : > { %v4153_v0 = vpop.permute.xlu1 %1559  ;;  %v4155_v25 = vpop.permute.xlu0 %1587 }
 0x227   : > { %6051 = vst [vmem:[#allocation163_spill] sm:$0xff] %v4153_v0 }
 0x229   : > { %1991 = vperm.xlu1 %3056, %v3514_v59   ;;  %3064 = vset.pattern.permute.xlu0 %v5820_v2 }
 0x22a   : > { %v4159_v55 = vpop.permute.xlu1 %1567  ;;  %2139 = vperm.xlu0 %3064, %v3411_v42  }
 0x22b   : > { %6052 = vst [vmem:[#allocation164_spill] sm:$0xff] %v4159_v55  ;;  %v4162_v4 = vpop.permute.xlu0 %1691  ;;  %v6057_v55 = vmov 7  }
 0x22d   : > { %1999 = vperm.xlu1 %3056, %v3526_v61  }
 0x22e   : > { %v4165_v62 = vpop.permute.xlu1 %1575  ;;  %2159 = vperm.xlu0 %3064, %v3430_v45  }
 0x22f   : > { %6053 = vst [vmem:[#allocation165_spill] sm:$0xff] %v4165_v62  ;;  %v4168_v8 = vpop.permute.xlu0 %1703  ;;  %v4237_v62 = vld [vmem:[%s3303_s17 + $0x20] sm:$0xff] }
 0x230   : > { %6054 = vst [vmem:[#allocation166_spill] sm:$0xff] %v4168_v8 }
 0x231   : > { %2007 = vperm.xlu1 %3056, %v3538_v63  }
 0x232   : > { %v4171_v0 = vpop.permute.xlu1 %1583  ;;  %2163 = vperm.xlu0 %3064, %v3447_v48  }
 0x233   : > { %6055 = vst [vmem:[#allocation167_spill] sm:$0xff] %v4171_v0  ;;  %v4174_v2 = vpop.permute.xlu0 %1711  ;;  %v4234_v0 = vld [vmem:[%s3303_s17 + $0x18] sm:$0xff] }
 0x234   : > { %6056 = vst [vmem:[#allocation168_spill] sm:$0xff] %v4174_v2 }
 0x235   : > { %3058 = vset.pattern.permute.xlu1 %v6057_v55 }
 0x236   : > { %2143 = vperm.xlu1 %3058, %v3406_v41   ;;  %v4178_v42 = vpop.permute.xlu1 %1591  ;;  %2175 = vperm.xlu0 %3064, %v3454_v49  }
 0x237   : > { %6058 = vst [vmem:[#allocation169_spill] sm:$0xff] %v4178_v42  ;;  %v4181_v61 = vpop.permute.xlu0 %1719  ;;  %v4231_v42 = vld [vmem:[%s3303_s17 + $0x10] sm:$0xff] }
 0x238   : > { %6059 = vst [vmem:[#allocation170_spill] sm:$0xff] %v4181_v61 }
 0x23a   : > { %2155 = vperm.xlu1 %3058, %v3435_v46   ;;  %2167 = vperm.xlu0 %3064, %v3442_v47  }
 0x23b   : > { %v4185_v45 = vpop.permute.xlu1 %1695  ;;  %v4187_v63 = vpop.permute.xlu0 %1727 }
 0x23c   : > { %6060 = vst [vmem:[#allocation171_spill] sm:$0xff] %v4185_v45  ;;  %6061 = vst [vmem:[#allocation172_spill] sm:$0xff] %v4187_v63 }
 0x23e   : > { %2147 = vperm.xlu1 %3058, %v3423_v44   ;;  %2187 = vperm.xlu0 %3064, %v3483_v54   ;;  %v698_v44 = vlaneseq }
 0x23f   : > { %v4191_v48 = vpop.permute.xlu1 %1699  ;;  %v4193_v41 = vpop.permute.xlu0 %1735 }
 0x240   : > { %6062 = vst [vmem:[#allocation173_spill] sm:$0xff] %v4191_v48  ;;  %6063 = vst [vmem:[#allocation174_spill] sm:$0xff] %v4193_v41 }
 0x242   : > { %2171 = vperm.xlu1 %3058, %v3459_v50   ;;  %2183 = vperm.xlu0 %3064, %v3466_v51   ;;  %v4209_v50 = vshrl.u32 %v698_v44, 7  ;;  %v4228_v44 = vld [vmem:[%s3303_s17 + $0x8] sm:$0xff] }
 0x243   : > { %v4197_v49 = vpop.permute.xlu1 %1707  ;;  %v4199_v46 = vpop.permute.xlu0 %1743  ;;  %6073 = vst [vmem:[#allocation184_spill] sm:$0xff] %v4228_v44 }
 0x244   : > { %6064 = vst [vmem:[#allocation175_spill] sm:$0xff] %v4197_v49  ;;  %6065 = vst [vmem:[#allocation176_spill] sm:$0xff] %v4199_v46 }
 0x246   : > { %2151 = vperm.xlu1 %3058, %v3418_v43   ;;  %2203 = vperm.xlu0 %3064, %v3507_v58   ;;  %v4218_v58 = vsub.s32 0, %v4209_v50 }
 0x247   : > { %v4203_v47 = vpop.permute.xlu1 %1715  ;;  %v4205_v54 = vpop.permute.xlu0 %1751 }
 0x248   : > { %6066 = vst [vmem:[#allocation177_spill] sm:$0xff] %v4203_v47  ;;  %6067 = vst [vmem:[#allocation178_spill] sm:$0xff] %v4205_v54  ;;  %v4260_v45 = vrot.slane %v4228_v44, %v4218_v58  ;;  %v4272_v10 = vrot.slane %v4237_v62, %v4218_v58 }
 0x249   : > { %6070 = vst [vmem:[#allocation181_spill] sm:$0xff] %v4218_v58 }
 0x24a   : > { %2179 = vperm.xlu1 %3058, %v3471_v52   ;;  %2211 = vperm.xlu0 %3064, %v3519_v60   ;;  %v4225_v60 = vld [vmem:[%s3303_s17] sm:$0xff]  ;;  %6078 = vst [vmem:[#allocation189_spill] sm:$0xff] %v4260_v45  ;;  %6081 = vst [vmem:[#allocation192_spill] sm:$0xff] %v4272_v10 }
 0x24b   : > { %v4211_v51 = vpop.permute.xlu1 %1723  ;;  %v4213_v43 = vpop.permute.xlu0 %1759 }
 0x24c   : > { %6068 = vst [vmem:[#allocation179_spill] sm:$0xff] %v4211_v51  ;;  %6069 = vst [vmem:[#allocation180_spill] sm:$0xff] %v4213_v43  ;;  %v4252_v51 = vld [vmem:[%s3303_s17 + $0x38] sm:$0xff]  ;;  %v4275_v43 = vsub.s32 2, %v4209_v50 }
 0x24d   : > { %v4283_v54 = vrot.slane %v4252_v51, %v4218_v58 }
 0x24e   : > { %2191 = vperm.xlu1 %3058, %v3478_v53   ;;  %2215 = vperm.xlu0 %3064, %v3514_v59   ;;  %v4240_v53 = vsub.s32 1, %v4209_v50  ;;  %v4246_v59 = vrot.slane %v4225_v60, %v4218_v58  ;;  %6082 = vst [vmem:[#allocation193_spill] sm:$0xff] %v4275_v43 }
 0x24f   : > { %v4220_v47 = vpop.permute.xlu1 %1731  ;;  %v4222_v52 = vpop.permute.xlu0 %1767  ;;  %6084 = vst [vmem:[#allocation195_spill] sm:$0xff] %v4283_v54 }
 0x250   : > { %6071 = vst [vmem:[#allocation182_spill] sm:$0xff] %v4220_v47  ;;  %6072 = vst [vmem:[#allocation183_spill] sm:$0xff] %v4222_v52  ;;  %v4249_v47 = vld [vmem:[%s3303_s17 + $0x30] sm:$0xff]  ;;  %v4268_v52 = vrot.slane %v4234_v0, %v4218_v58  ;;  %v4287_v27 = vrot.slane %v4225_v60, %v4240_v53  ;;  %v730_v46 = vmul.f32 %v4246_v59, %v3691_v35 }
 0x251   : > { %6074 = vst [vmem:[#allocation185_spill] sm:$0xff] %v4240_v53  ;;  %6075 = vst [vmem:[#allocation186_spill] sm:$0xff] %v4246_v59  ;;  %v733_v41 = vmul.f32 %v4246_v59, %v3695_v39  ;;  %v4297_v63 = vrot.slane %v4228_v44, %v4240_v53  ;;  %v4315_v35 = vrot.slane %v4237_v62, %v4240_v53 }
 0x252   : > { %2195 = vperm.xlu1 %3058, %v3495_v56   ;;  %2239 = vperm.xlu0 %3064, %v3550_v1   ;;  %v4264_v56 = vrot.slane %v4231_v42, %v4218_v58  ;;  %6080 = vst [vmem:[#allocation191_spill] sm:$0xff] %v4268_v52  ;;  %6085 = vst [vmem:[#allocation196_spill] sm:$0xff] %v4287_v27  ;;  %v4319_v39 = vrot.slane %v4249_v47, %v4240_v53 }
 0x253   : > { %v4254_v48 = vpop.permute.xlu1 %1739  ;;  %v4256_v49 = vpop.permute.xlu0 %1775  ;;  %6086 = vst [vmem:[#allocation197_spill] sm:$0xff] %v4297_v63  ;;  %6091 = vst [vmem:[#allocation202_spill] sm:$0xff] %v4315_v35  ;;  %v737_v59 = vmul.f32 %v4260_v45, %v3707_v18  ;;  %v742_v18 = vmul.f32 %v4268_v52, %v3727_v13 }
 0x254   : > { %6076 = vst [vmem:[#allocation187_spill] sm:$0xff] %v4254_v48  ;;  %6077 = vst [vmem:[#allocation188_spill] sm:$0xff] %v4256_v49  ;;  %v4279_v49 = vrot.slane %v4249_v47, %v4218_v58  ;;  %v4301_v58 = vrot.slane %v4231_v42, %v4240_v53  ;;  %v741_v8 = vmul.f32 %v4264_v56, %v3719_v9 }
 0x255   : > { %6079 = vst [vmem:[#allocation190_spill] sm:$0xff] %v4264_v56  ;;  %6092 = vst [vmem:[#allocation203_spill] sm:$0xff] %v4319_v39  ;;  %v743_v48 = vmul.f32 %v4268_v52, %v3725_v20  ;;  %v4347_v9 = vrot.slane %v4228_v44, %v4275_v43 }
 0x256   : > { %6083 = vst [vmem:[#allocation194_spill] sm:$0xff] %v4279_v49  ;;  %2207 = vperm.xlu1 %3058, %v3502_v57   ;;  %2251 = vperm.xlu0 %3064, %v3579_v6   ;;  %6087 = vst [vmem:[#allocation198_spill] sm:$0xff] %v4301_v58  ;;  %v735_v57 = vmul.f32 %v4260_v45, %v3701_v14  ;;  %v4311_v6 = vrot.slane %v4234_v0, %v4240_v53 }
 0x257   : > { %v4303_v61 = vpop.permute.xlu1 %1747  ;;  %v4305_v2 = vpop.permute.xlu0 %1783  ;;  %v4327_v14 = vrot.slane %v4252_v51, %v4240_v53  ;;  %v765_v45 = vadd.f32 %v733_v41, %v3599_v12  ;;  %v744_v53 = vmul.f32 %v4268_v52, %v3733_v33  ;;  %v4361_v12 = vrot.slane %v4231_v42, %v4275_v43 }
 0x258   : > { %6088 = vst [vmem:[#allocation199_spill] sm:$0xff] %v4303_v61  ;;  %6089 = vst [vmem:[#allocation200_spill] sm:$0xff] %v4305_v2  ;;  %v739_v2 = vmul.f32 %v4264_v56, %v3713_v32  ;;  %v4331_v61 = vrot.slane %v4225_v60, %v4275_v43  ;;  %v762_v32 = vadd.f32 %v730_v46, %v3595_v11 }
 0x259   : > { %6090 = vst [vmem:[#allocation201_spill] sm:$0xff] %v4311_v6  ;;  %6093 = vst [vmem:[#allocation204_spill] sm:$0xff] %v4327_v14  ;;  %v767_v56 = vadd.f32 %v735_v57, %v3605_v15  ;;  %v748_v11 = vmul.f32 %v4272_v10, %v3745_v31  ;;  %v769_v33 = vadd.f32 %v737_v59, %v3611_v17 }
 0x25a   : > { %3059 = vset.pattern.permute.xlu1 %v6035_v36  ;;  %2247 = vperm.xlu0 %3064, %v3562_v3   ;;  %v746_v3 = vmul.f32 %v4272_v10, %v3739_v34  ;;  %v754_v41 = vmul.f32 %v4279_v49, %v3763_v16  ;;  %v4369_v15 = vrot.slane %v4234_v0, %v4275_v43 }
 0x25b   : > { %2015 = vperm.xlu1 %3059, %v3550_v1   ;;  %v4350_v20 = vpop.permute.xlu1 %1755  ;;  %v4352_v13 = vpop.permute.xlu0 %1791  ;;  %v771_v1 = vadd.f32 %v739_v2, %v3617_v19  ;;  %v4372_v34 = vadd.f32 %v741_v8, %v3623_v21  ;;  %v4375_v31 = vadd.f32 %v743_v48, %v3629_v23  ;;  %v4378_v46 = vadd.f32 %v742_v18, %v3631_v24  ;;  %v3142_v48 = vld [vmem:[%s5812_s2 + $0x78] sm:$0xff]  ;;  %v6103_v18 = vld [vmem:[#allocation48_spill] sm:$0xff] }
 0x25c   : > { %6094 = vst [vmem:[#allocation205_spill] sm:$0xff] %v4352_v13  ;;  %v756_v17 = vmul.f32 %v4279_v49, %v3769_v29  ;;  %v4384_v16 = vadd.f32 %v744_v53, %v3637_v26  ;;  %v758_v19 = vmul.f32 %v4283_v54, %v3775_v22  ;;  %v4390_v21 = vrot.slane %v4237_v62, %v4275_v43  ;;  %v6099_v22 = vld [vmem:[#allocation44_spill] sm:$0xff] }
 0x25d   : > { %6095 = vst [vmem:[#allocation206_spill] sm:$0xff] %v4372_v34  ;;  %6096 = vst [vmem:[#allocation207_spill] sm:$0xff] %v4375_v31  ;;  %v4393_v23 = vsub.s32 3, %v4209_v50  ;;  %v4404_v26 = vadd.f32 %v748_v11, %v3649_v30  ;;  %v760_v2 = vmul.f32 %v4283_v54, %v6099_v22  ;;  %v4410_v8 = vrot.slane %v4249_v47, %v4275_v43  ;;  %v6101_v53 = vld [vmem:[#allocation20_spill] sm:$0xff]  ;;  %v6102_v30 = vld [vmem:[#allocation46_spill] sm:$0xff] }
 0x25e   : > { %2263 = vperm.xlu0 %3064, %v3586_v7   ;;  %v4401_v7 = vadd.f32 %v746_v3, %v3643_v28  ;;  %v333_v28 = vld [vmem:[%s5814_s4 + $0x8] sm:$0xff]  ;;  %v786_v59 = vadd.f32 %v754_v41, %v6101_v53  ;;  %v954_v57 = vmul.f32 %v4287_v27, %v6102_v30  ;;  %v957_v3 = vmul.f32 %v4287_v27, %v6103_v18  ;;  %v6104_v11 = vld [vmem:[#allocation50_spill] sm:$0xff]  ;;  %v6106_v54 = vld [vmem:[#allocation69_spill] sm:$0xff] }
 0x25f   : > { %3060 = vset.pattern.permute.xlu1 %v6057_v55  ;;  %v4396_v24 = vpop.permute.xlu1 %1763  ;;  %v4398_v29 = vpop.permute.xlu0 %1799  ;;  %6100 = vst [vmem:[#allocation44_spill] sm:$0xff] %v4410_v8  ;;  %v959_v22 = vmul.f32 %v4297_v63, %v6104_v11  ;;  %v4430_v49 = vrot.slane %v4252_v51, %v4275_v43  ;;  %v4433_v41 = vsub.s32 4, %v4209_v50  ;;  %v6108_v53 = vmov 0   ;;  %v6109_v30 = vld [vmem:[#allocation24_spill] sm:$0xff]  ;;  %v6111_v11 = vld [vmem:[#allocation54_spill] sm:$0xff] }
 0x260   : > { %6097 = vst [vmem:[#allocation208_spill] sm:$0xff] %v4396_v24  ;;  %6098 = vst [vmem:[#allocation209_spill] sm:$0xff] %v4398_v29  ;;  %2199 = vperm.xlu1 %3060, %v3142_v48   ;;  %v6105_v29 = vld [vmem:[#allocation22_spill] sm:$0xff]  ;;  %v978_v48 = vmul.f32 %v4319_v39, %v6106_v54  ;;  %v790_v10 = vadd.f32 %v758_v19, %v6109_v30  ;;  %v6110_v18 = vld [vmem:[#allocation52_spill] sm:$0xff]  ;;  %v4443_v54 = vrot.slane %v4225_v60, %v4393_v23 }
 0x261   : > { %v788_v13 = vadd.f32 %v756_v17, %v6105_v29  ;;  %6107 = vst [vmem:[#allocation20_spill] sm:$0xff] %v4430_v49  ;;  %v961_v27 = vmul.f32 %v4297_v63, %v6110_v18  ;;  %v963_v17 = vmul.f32 %v4301_v58, %v6111_v11  ;;  %v6114_v31 = vld [vmem:[#allocation26_spill] sm:$0xff]  ;;  %v4456_v30 = vrot.slane %v4249_v47, %v4393_v23  ;;  %v6132_v24 = vld [vmem:[#allocation104_spill] sm:$0xff] }
 0x262   : > { %3069 = vset.pattern.permute.xlu0 %v6108_v53  ;;  %v4450_v52 = vadd.f32 %v760_v2, %v6114_v31  ;;  %v6115_v53 = vld [vmem:[#allocation100_spill] sm:$0xff]  ;;  %v4460_v18 = vrot.slane %v4249_v47, %v4433_v41  ;;  %v3143_v11 = vld [vmem:[%s5812_s2 + $0xa0] sm:$0xff]  ;;  %v4467_v31 = vadd.f32 %v957_v3, %v765_v45  ;;  %v4469_v2 = vadd.f32 %v959_v22, %v767_v56 }
 0x263   : > { %v4445_v29 = vpop.permute.xlu1 %1771  ;;  %v4447_v43 = vpop.permute.xlu0 %1807  ;;  %2766 = vperm.xlu0 %3069, %v333_v28   ;;  %v1202_v19 = vmul.f32 %v4410_v8, %v6115_v53  ;;  %6116 = vst [vmem:[#allocation50_spill] sm:$0xff] %v4456_v30  ;;  %v4465_v28 = vadd.f32 %v954_v57, %v762_v32  ;;  %v4473_v53 = vrot.slane %v4228_v44, %v4393_v23  ;;  %v6120_v56 = vld [vmem:[#allocation56_spill] sm:$0xff] }
 0x264   : > { %6112 = vst [vmem:[#allocation46_spill] sm:$0xff] %v4445_v29  ;;  %6113 = vst [vmem:[#allocation48_spill] sm:$0xff] %v4447_v43  ;;  %2219 = vperm.xlu1 %3060, %v3143_v11   ;;  %v1010_v43 = vadd.f32 %v978_v48, %v786_v59  ;;  %v6118_v29 = vld [vmem:[#allocation71_spill] sm:$0xff]  ;;  %v4479_v34 = vrot.slane %v4231_v42, %v4393_v23  ;;  %v1426_v32 = vmul.f32 %v4456_v30, %v4055_v40  ;;  %v6124_v11 = vld [vmem:[#allocation102_spill] sm:$0xff] }
 0x265   : > { %6117 = vst [vmem:[#allocation22_spill] sm:$0xff] %v4460_v18  ;;  %v980_v63 = vmul.f32 %v4319_v39, %v6118_v29  ;;  %v4483_v57 = vadd.f32 %v961_v27, %v769_v33  ;;  %v4485_v45 = vadd.f32 %v963_v17, %v771_v1  ;;  %v4489_v3 = vmul.f32 %v4301_v58, %v6120_v56  ;;  %v3144_v1 = vld [vmem:[%s5812_s2 + $0xa8] sm:$0xff]  ;;  %v6125_v17 = vld [vmem:[#allocation57_spill] sm:$0xff]  ;;  %v6129_v58 = vld [vmem:[#allocation136_spill] sm:$0xff] }
 0x266   : > { %v4493_v59 = vrot.slane %v4234_v0, %v4393_v23  ;;  %v1234_v29 = vadd.f32 %v1202_v19, %v1010_v43  ;;  %v1204_v40 = vmul.f32 %v4410_v8, %v6124_v11  ;;  %v1650_v27 = vmul.f32 %v4460_v18, %v4137_v38  ;;  %v6127_v19 = vld [vmem:[#allocation61_spill] sm:$0xff] }
 0x267   : > { %6119 = vst [vmem:[#allocation69_spill] sm:$0xff] %v4485_v45  ;;  %6121 = vst [vmem:[#allocation24_spill] sm:$0xff] %v4489_v3  ;;  %v4495_v22 = vpop.permute.xlu1 %1779  ;;  %v4497_v48 = vpop.permute.xlu0 %1815  ;;  %v4504_v33 = vsub.s32 5, %v4209_v50  ;;  %v966_v56 = vmul.f32 %v4311_v6, %v6125_v17  ;;  %v970_v11 = vmul.f32 %v4315_v35, %v6127_v19  ;;  %v1012_v8 = vadd.f32 %v980_v63, %v788_v13  ;;  %v6131_v3 = vld [vmem:[#allocation63_spill] sm:$0xff] }
 0x268   : > { %6122 = vst [vmem:[#allocation52_spill] sm:$0xff] %v4495_v22  ;;  %6123 = vst [vmem:[#allocation54_spill] sm:$0xff] %v4497_v48  ;;  %2223 = vperm.xlu1 %3060, %v3144_v1   ;;  %v6126_v22 = vld [vmem:[#allocation59_spill] sm:$0xff]  ;;  %v6128_v48 = vld [vmem:[#allocation73_spill] sm:$0xff]  ;;  %v1458_v39 = vadd.f32 %v1426_v32, %v1234_v29  ;;  %v1428_v45 = vmul.f32 %v4456_v30, %v6129_v58  ;;  %v972_v17 = vmul.f32 %v4315_v35, %v6131_v3 }
 0x269   : > { %v968_v43 = vmul.f32 %v4311_v6, %v6126_v22  ;;  %v982_v38 = vmul.f32 %v4327_v14, %v6128_v48  ;;  %v4521_v1 = vrot.slane %v4249_v47, %v4504_v33  ;;  %v1206_v22 = vmul.f32 %v4430_v49, %v6132_v24  ;;  %v6135_v30 = vld [vmem:[#allocation75_spill] sm:$0xff] }
 0x26a   : > { %v4529_v19 = vrot.slane %v4252_v51, %v4393_v23  ;;  %v4533_v63 = vrot.slane %v4252_v51, %v4433_v41  ;;  %v1236_v58 = vadd.f32 %v1204_v40, %v1012_v8  ;;  %v1682_v32 = vadd.f32 %v1650_v27, %v1458_v39  ;;  %v6136_v40 = vld [vmem:[#allocation138_spill] sm:$0xff] }
 0x26b   : > { %6130 = vst [vmem:[#allocation26_spill] sm:$0xff] %v4521_v1  ;;  %v1788_v13 = vpop.permute.xlu1 %1787  ;;  %v1652_v47 = vmul.f32 %v4460_v18, %v4143_v37  ;;  %v998_v24 = vadd.f32 %v966_v56, %v4378_v46  ;;  %v1014_v29 = vadd.f32 %v982_v38, %v790_v10  ;;  %v984_v35 = vmul.f32 %v4327_v14, %v6135_v30  ;;  %v3145_v37 = vld [vmem:[%s5812_s2 + $0xe0] sm:$0xff]  ;;  %v6138_v56 = vld [vmem:[#allocation77_spill] sm:$0xff] }
 0x26c   : > { %6133 = vst [vmem:[#allocation100_spill] sm:$0xff] %v4529_v19  ;;  %6134 = vst [vmem:[#allocation71_spill] sm:$0xff] %v4533_v63  ;;  %v1874_v48 = vmul.f32 %v4521_v1, %v1788_v13  ;;  %3061 = vset.pattern.permute.xlu1 %v6035_v36  ;;  %v4539_v3 = vpop.permute.xlu0 %1919  ;;  %v4546_v6 = vrot.slane %v4237_v62, %v4393_v23  ;;  %v1000_v39 = vadd.f32 %v968_v43, %v4384_v16  ;;  %v6170_v14 = vld [vmem:[#allocation166_spill] sm:$0xff] }
 0x26d   : > { %2027 = vperm.xlu1 %3061, %v3145_v37   ;;  %v1460_v8 = vadd.f32 %v1428_v45, %v1236_v58  ;;  %v1430_v27 = vmul.f32 %v4529_v19, %v6136_v40  ;;  %v4557_v10 = vadd.f32 %v970_v11, %v4401_v7  ;;  %v4560_v30 = vadd.f32 %v972_v17, %v4404_v26  ;;  %v6139_v37 = vld [vmem:[#allocation106_spill] sm:$0xff]  ;;  %v6141_v26 = vld [vmem:[#allocation81_spill] sm:$0xff]  ;;  %v6142_v17 = vld [vmem:[#allocation83_spill] sm:$0xff] }
 0x26e   : > { %v4554_v46 = vadd.f32 %v1874_v48, %v1682_v32  ;;  %v1178_v38 = vmul.f32 %v4331_v61, %v6138_v56  ;;  %v1238_v13 = vadd.f32 %v1206_v22, %v1014_v29  ;;  %v1208_v16 = vmul.f32 %v4430_v49, %v6139_v37  ;;  %v6146_v40 = vld [vmem:[#allocation85_spill] sm:$0xff] }
 0x26f   : > { %v1796_v18 = vpop.permute.xlu1 %1795  ;;  %v1684_v45 = vadd.f32 %v1652_v47, %v1460_v8  ;;  %v1654_v43 = vmul.f32 %v4533_v63, %v4149_v5  ;;  %v1016_v7 = vadd.f32 %v984_v35, %v4450_v52  ;;  %v1181_v11 = vmul.f32 %v4331_v61, %v6141_v26  ;;  %v4583_v5 = vld [vmem:[%s5812_s2 + $0xe8] sm:$0xff]  ;;  %v6143_v47 = vld [vmem:[#allocation140_spill] sm:$0xff] }
 0x270   : > { %6137 = vst [vmem:[#allocation56_spill] sm:$0xff] %v4554_v46  ;;  %v1876_v58 = vmul.f32 %v4521_v1, %v1796_v18  ;;  %v4569_v32 = vpop.permute.xlu0 %1931  ;;  %v1183_v22 = vmul.f32 %v4347_v9, %v6142_v17  ;;  %v4578_v48 = vrot.slane %v4225_v60, %v4433_v41  ;;  %v1462_v18 = vadd.f32 %v1430_v27, %v1238_v13 }
 0x271   : > { %6140 = vst [vmem:[#allocation102_spill] sm:$0xff] %v4569_v32  ;;  %2031 = vperm.xlu1 %3061, %v4583_v5   ;;  %v1432_v52 = vmul.f32 %v4529_v19, %v6143_v47  ;;  %v4590_v35 = vrot.slane %v4252_v51, %v4504_v33  ;;  %v1210_v8 = vadd.f32 %v1178_v38, %v4465_v28  ;;  %v6157_v19 = vld [vmem:[#allocation94_spill] sm:$0xff] }
 0x272   : > { %v4592_v29 = vadd.f32 %v1876_v58, %v1684_v45  ;;  %v1185_v56 = vmul.f32 %v4347_v9, %v6146_v40  ;;  %v4599_v37 = vrot.slane %v4228_v44, %v4433_v41  ;;  %v4603_v27 = vrot.slane %v4231_v42, %v4433_v41  ;;  %v6148_v58 = vld [vmem:[#allocation88_spill] sm:$0xff] }
 0x273   : > { %6144 = vst [vmem:[#allocation57_spill] sm:$0xff] %v4590_v35  ;;  %v1804_v13 = vpop.permute.xlu1 %1803  ;;  %v1240_v26 = vadd.f32 %v1208_v16, %v1016_v7  ;;  %v1686_v17 = vadd.f32 %v1654_v43, %v1462_v18  ;;  %v1656_v51 = vmul.f32 %v4533_v63, %v4155_v25  ;;  %v1213_v38 = vadd.f32 %v1181_v11, %v4467_v31  ;;  %v6149_v40 = vld [vmem:[#allocation108_spill] sm:$0xff]  ;;  %v6150_v16 = vld [vmem:[#allocation90_spill] sm:$0xff] }
 0x274   : > { %6145 = vst [vmem:[#allocation59_spill] sm:$0xff] %v4592_v29  ;;  %v1878_v45 = vmul.f32 %v4590_v35, %v1804_v13  ;;  %v4608_v28 = vpop.permute.xlu0 %1939  ;;  %v1190_v47 = vmul.f32 %v4369_v15, %v6148_v58  ;;  %v1402_v29 = vmul.f32 %v4443_v54, %v6149_v40  ;;  %v4617_v46 = vrot.slane %v4225_v60, %v4504_v33  ;;  %v3147_v31 = vld [vmem:[%s5812_s2 + $0xb0] sm:$0xff]  ;;  %v6152_v13 = vld [vmem:[#allocation142_spill] sm:$0xff] }
 0x275   : > { %6147 = vst [vmem:[#allocation61_spill] sm:$0xff] %v4608_v28  ;;  %3062 = vset.pattern.permute.xlu1 %v6057_v55  ;;  %v1215_v25 = vadd.f32 %v1183_v22, %v4469_v2  ;;  %v1192_v43 = vmul.f32 %v4369_v15, %v6150_v16  ;;  %v1464_v7 = vadd.f32 %v1432_v52, %v1240_v26  ;;  %v4638_v22 = vsub.s32 6, %v4209_v50  ;;  %v6153_v26 = vld [vmem:[#allocation87_spill] sm:$0xff] }
 0x276   : > { %v4623_v18 = vadd.f32 %v1878_v45, %v1686_v17  ;;  %2227 = vperm.xlu1 %3062, %v3147_v31   ;;  %v4629_v11 = vadd.f32 %v1185_v56, %v4483_v57  ;;  %v1626_v58 = vmul.f32 %v4578_v48, %v6152_v13  ;;  %v4635_v2 = vrot.slane %v4234_v0, %v4433_v41  ;;  %v6154_v45 = vld [vmem:[#allocation123_spill] sm:$0xff] }
 0x277   : > { %v1812_v52 = vpop.permute.xlu1 %1811  ;;  %v4642_v17 = vmul.f32 %v4361_v12, %v6153_v26  ;;  %v1414_v40 = vmul.f32 %v4493_v59, %v6154_v45  ;;  %v1688_v57 = vadd.f32 %v1656_v51, %v1464_v7  ;;  %v1222_v31 = vadd.f32 %v1190_v47, %v998_v24  ;;  %v6156_v26 = vld [vmem:[#allocation92_spill] sm:$0xff]  ;;  %v3148_v24 = vld [vmem:[%s5812_s2 + $0xc0] sm:$0xff] }
 0x278   : > { %6151 = vst [vmem:[#allocation73_spill] sm:$0xff] %v4623_v18  ;;  %v1880_v56 = vmul.f32 %v4590_v35, %v1812_v52  ;;  %v4647_v16 = vpop.permute.xlu0 %1947  ;;  %v1434_v13 = vadd.f32 %v1402_v29, %v1210_v8  ;;  %v4651_v28 = vrot.slane %v4237_v62, %v4433_v41  ;;  %v1850_v18 = vmul.f32 %v4617_v46, %v4162_v4  ;;  %v6159_v8 = vld [vmem:[#allocation149_spill] sm:$0xff]  ;;  %v6161_v52 = vld [vmem:[#allocation112_spill] sm:$0xff] }
 0x279   : > { %6155 = vst [vmem:[#allocation136_spill] sm:$0xff] %v4647_v16  ;;  %v1224_v1 = vadd.f32 %v1192_v43, %v1000_v39  ;;  %v1194_v63 = vmul.f32 %v4390_v21, %v6156_v26  ;;  %v1196_v51 = vmul.f32 %v4390_v21, %v6157_v19  ;;  %v1638_v47 = vmul.f32 %v4635_v2, %v6159_v8  ;;  %v6160_v19 = vld [vmem:[#allocation110_spill] sm:$0xff]  ;;  %v6164_v8 = vld [vmem:[#allocation187_spill] sm:$0xff] }
 0x27a   : > { %v4659_v7 = vadd.f32 %v1880_v56, %v1688_v57  ;;  %2235 = vperm.xlu1 %3062, %v3148_v24   ;;  %v1658_v29 = vadd.f32 %v1626_v58, %v1434_v13  ;;  %v4668_v4 = vrot.slane %v4234_v0, %v4504_v33  ;;  %v4672_v39 = vrot.slane %v4225_v60, %v4638_v22  ;;  %v6162_v56 = vld [vmem:[#allocation125_spill] sm:$0xff] }
 0x27b   : > { %v1405_v43 = vmul.f32 %v4443_v54, %v6160_v19  ;;  %v1407_v45 = vmul.f32 %v4473_v53, %v6161_v52  ;;  %v1446_v57 = vadd.f32 %v1414_v40, %v1222_v31  ;;  %v1416_v58 = vmul.f32 %v4493_v59, %v6162_v56  ;;  %v6165_v31 = vld [vmem:[#allocation146_spill] sm:$0xff] }
 0x27c   : > { %6158 = vst [vmem:[#allocation63_spill] sm:$0xff] %v4659_v7  ;;  %v1916_v13 = vpop.permute.xlu1 %1915  ;;  %v4680_v26 = vpop.permute.xlu0 %1955  ;;  %v1882_v24 = vadd.f32 %v1850_v18, %v1658_v29  ;;  %v1862_v7 = vmul.f32 %v4668_v4, %v6164_v8  ;;  %v4687_v49 = vrot.slane %v4234_v0, %v4638_v22  ;;  %v1226_v19 = vadd.f32 %v1194_v63, %v4557_v10  ;;  %v6166_v18 = vld [vmem:[#allocation127_spill] sm:$0xff]  ;;  %v3149_v63 = vld [vmem:[%s5812_s2 + $0xd8] sm:$0xff] }
 0x27d   : > { %6163 = vst [vmem:[#allocation104_spill] sm:$0xff] %v4680_v26  ;;  %v2074_v35 = vmul.f32 %v4672_v39, %v1916_v13  ;;  %v1228_v40 = vadd.f32 %v1196_v51, %v4560_v30  ;;  %v1629_v52 = vmul.f32 %v4578_v48, %v6165_v31  ;;  %v4695_v56 = vrot.slane %v4228_v44, %v4504_v33  ;;  %v6167_v8 = vld [vmem:[#allocation151_spill] sm:$0xff]  ;;  %v6169_v51 = vld [vmem:[#allocation114_spill] sm:$0xff] }
 0x27e   : > { %3063 = vset.pattern.permute.xlu1 %v6035_v36  ;;  %v1418_v29 = vmul.f32 %v4546_v6, %v6166_v18  ;;  %v1670_v13 = vadd.f32 %v1638_v47, %v1446_v57  ;;  %v1640_v0 = vmul.f32 %v4635_v2, %v6167_v8  ;;  %v1437_v10 = vadd.f32 %v1405_v43, %v1213_v38 }
 0x27f   : > { %v4702_v26 = vadd.f32 %v2074_v35, %v1882_v24  ;;  %2023 = vperm.xlu1 %3063, %v3149_v63   ;;  %v1439_v30 = vadd.f32 %v1407_v45, %v1215_v25  ;;  %v1409_v31 = vmul.f32 %v4473_v53, %v6169_v51  ;;  %v1853_v16 = vmul.f32 %v4617_v46, %v6170_v14  ;;  %v6172_v35 = vld [vmem:[#allocation199_spill] sm:$0xff]  ;;  %v6173_v63 = vld [vmem:[#allocation148_spill] sm:$0xff] }
 0x280   : > { %v4711_v18 = vpop.permute.xlu1 %1923  ;;  %v1964_v47 = vpop.permute.xlu0 %1963  ;;  %v1448_v57 = vadd.f32 %v1416_v58, %v1224_v1  ;;  %v1894_v8 = vadd.f32 %v1862_v7, %v1670_v13  ;;  %v1864_v24 = vmul.f32 %v4668_v4, %v6172_v35  ;;  %v1661_v32 = vadd.f32 %v1629_v52, %v1437_v10  ;;  %v6174_v7 = vld [vmem:[#allocation153_spill] sm:$0xff]  ;;  %v6177_v51 = vld [vmem:[#allocation168_spill] sm:$0xff] }
 0x281   : > { %6168 = vst [vmem:[#allocation75_spill] sm:$0xff] %v4702_v26  ;;  %6171 = vst [vmem:[#allocation138_spill] sm:$0xff] %v4711_v18  ;;  %v2086_v26 = vmul.f32 %v4687_v49, %v1964_v47  ;;  %v1631_v38 = vmul.f32 %v4599_v37, %v6173_v63  ;;  %v4720_v25 = vrot.slane %v4231_v42, %v4504_v33  ;;  %v6176_v52 = vld [vmem:[#allocation129_spill] sm:$0xff] }
 0x282   : > { %v4724_v14 = vrot.slane %v4237_v62, %v4504_v33  ;;  %v1450_v43 = vadd.f32 %v1418_v29, %v1226_v19  ;;  %v1672_v1 = vadd.f32 %v1640_v0, %v1448_v57  ;;  %v1642_v45 = vmul.f32 %v4651_v28, %v6174_v7  ;;  %v3150_v35 = vld [vmem:[%s5812_s2 + $0xb8] sm:$0xff]  ;;  %v6178_v7 = vld [vmem:[#allocation150_spill] sm:$0xff] }
 0x283   : > { %v4728_v58 = vadd.f32 %v2086_v26, %v1894_v8  ;;  %3065 = vset.pattern.permute.xlu1 %v6057_v55  ;;  %v1420_v13 = vmul.f32 %v4546_v6, %v6176_v52  ;;  %v1885_v10 = vadd.f32 %v1853_v16, %v1661_v32  ;;  %v1855_v47 = vmul.f32 %v4695_v56, %v6177_v51 }
 0x284   : > { %2231 = vperm.xlu1 %3065, %v3150_v35   ;;  %v1928_v19 = vpop.permute.xlu1 %1927  ;;  %v1972_v29 = vpop.permute.xlu0 %1971  ;;  %v4740_v26 = vrot.slane %v4237_v62, %v4638_v22  ;;  %v1896_v0 = vadd.f32 %v1864_v24, %v1672_v1  ;;  %v1866_v57 = vmul.f32 %v4724_v14, %v4350_v20  ;;  %v1441_v8 = vadd.f32 %v1409_v31, %v4629_v11  ;;  %v6179_v35 = vld [vmem:[#allocation155_spill] sm:$0xff]  ;;  %v6183_v31 = vld [vmem:[#allocation170_spill] sm:$0xff] }
 0x285   : > { %6175 = vst [vmem:[#allocation77_spill] sm:$0xff] %v4728_v58  ;;  %v2077_v32 = vmul.f32 %v4672_v39, %v1928_v19  ;;  %v2088_v16 = vmul.f32 %v4687_v49, %v1972_v29  ;;  %v1663_v63 = vadd.f32 %v1631_v38, %v1439_v30  ;;  %v1633_v52 = vmul.f32 %v4599_v37, %v6178_v7  ;;  %v6182_v19 = vld [vmem:[#allocation116_spill] sm:$0xff] }
 0x286   : > { %v4751_v51 = vrot.slane %v4228_v44, %v4638_v22  ;;  %v1674_v62 = vadd.f32 %v1642_v45, %v1450_v43  ;;  %v1644_v24 = vmul.f32 %v4651_v28, %v6179_v35  ;;  %v1411_v29 = vmul.f32 %v4479_v34, %v6182_v19  ;;  %v3151_v7 = vld [vmem:[%s5812_s2 + $0xd0] sm:$0xff] }
 0x287   : > { %v4755_v1 = vadd.f32 %v2077_v32, %v1885_v10  ;;  %v4757_v20 = vadd.f32 %v2088_v16, %v1896_v0  ;;  %v1452_v11 = vadd.f32 %v1420_v13, %v1228_v40  ;;  %v1887_v30 = vadd.f32 %v1855_v47, %v1663_v63  ;;  %v6184_v10 = vld [vmem:[#allocation208_spill] sm:$0xff]  ;;  %v6185_v40 = vld [vmem:[#allocation206_spill] sm:$0xff]  ;;  %v6187_v63 = vld [vmem:[#allocation69_spill] sm:$0xff] }
 0x288   : > { %v1857_v38 = vmul.f32 %v4695_v56, %v6183_v31  ;;  %2243 = vperm.xlu1 %3065, %v3151_v7   ;;  %v1936_v43 = vpop.permute.xlu1 %1935  ;;  %v1980_v45 = vpop.permute.xlu0 %1979  ;;  %v1898_v35 = vadd.f32 %v1866_v57, %v1674_v62  ;;  %v1868_v0 = vmul.f32 %v4724_v14, %v6184_v10  ;;  %v6186_v13 = vld [vmem:[#allocation24_spill] sm:$0xff]  ;;  %v1219_v19 = vadd.f32 %v4642_v17, %v6187_v63  ;;  %v6188_v31 = vld [vmem:[#allocation89_spill] sm:$0xff] }
 0x289   : > { %6180 = vst [vmem:[#allocation106_spill] sm:$0xff] %v4755_v1  ;;  %6181 = vst [vmem:[#allocation81_spill] sm:$0xff] %v4757_v20  ;;  %v2079_v32 = vmul.f32 %v4751_v51, %v1936_v43  ;;  %v2090_v16 = vmul.f32 %v4740_v26, %v1980_v45  ;;  %v997_v47 = vadd.f32 %v6186_v13, %v6185_v40  ;;  %v6189_v1 = vld [vmem:[#allocation152_spill] sm:$0xff]  ;;  %v6191_v43 = vld [vmem:[#allocation58_spill] sm:$0xff] }
 0x28a   : > { %v1189_v20 = vmul.f32 %v4361_v12, %v6188_v31  ;;  %v1665_v7 = vadd.f32 %v1633_v52, %v1441_v8  ;;  %v1635_v57 = vmul.f32 %v4603_v27, %v6189_v1  ;;  %v1676_v62 = vadd.f32 %v1644_v24, %v1452_v11  ;;  %v6192_v45 = vld [vmem:[#allocation201_spill] sm:$0xff]  ;;  %v6193_v40 = vld [vmem:[#allocation118_spill] sm:$0xff]  ;;  %v6194_v52 = vld [vmem:[#allocation172_spill] sm:$0xff] }
 0x28b   : > { %v4778_v58 = vadd.f32 %v2079_v32, %v1887_v30  ;;  %v4780_v10 = vadd.f32 %v2090_v16, %v1898_v35  ;;  %v967_v18 = vmul.f32 %v6192_v45, %v6191_v43  ;;  %v1443_v44 = vadd.f32 %v1411_v29, %v1219_v19  ;;  %v6195_v35 = vld [vmem:[#allocation33_spill] sm:$0xff]  ;;  %v6196_v32 = vld [vmem:[#allocation191_spill] sm:$0xff] }
 0x28c   : > { %v1413_v13 = vmul.f32 %v4479_v34, %v6193_v40  ;;  %v1889_v17 = vadd.f32 %v1857_v38, %v1665_v7  ;;  %2255 = vperm.xlu1 %3065, %v4583_v5   ;;  %v1944_v63 = vpop.permute.xlu1 %1943  ;;  %v1988_v8 = vpop.permute.xlu0 %1987  ;;  %v1859_v1 = vmul.f32 %v4720_v25, %v6194_v52  ;;  %v1900_v24 = vadd.f32 %v1868_v0, %v1676_v62  ;;  %v6197_v19 = vld [vmem:[#allocation91_spill] sm:$0xff]  ;;  %v6198_v7 = vld [vmem:[#allocation154_spill] sm:$0xff] }
 0x28d   : > { %6190 = vst [vmem:[#allocation83_spill] sm:$0xff] %v4778_v58  ;;  %v2081_v11 = vmul.f32 %v4751_v51, %v1944_v63  ;;  %v2092_v30 = vmul.f32 %v4740_v26, %v1988_v8  ;;  %v745_v29 = vmul.f32 %v6196_v32, %v6195_v35  ;;  %v1221_v16 = vadd.f32 %v1189_v20, %v997_v47  ;;  %v6201_v40 = vld [vmem:[#allocation207_spill] sm:$0xff]  ;;  %v6202_v8 = vld [vmem:[#allocation60_spill] sm:$0xff] }
 0x28e   : > { %v1191_v38 = vmul.f32 %v4369_v15, %v6197_v19  ;;  %v4797_v5 = vrot.slane %v4231_v42, %v4638_v22  ;;  %v1667_v31 = vadd.f32 %v1635_v57, %v1443_v44  ;;  %v1637_v0 = vmul.f32 %v4603_v27, %v6198_v7  ;;  %v6203_v47 = vld [vmem:[#allocation120_spill] sm:$0xff]  ;;  %v4812_v32 = vld [vmem:[%s3303_s17 + $0x28] sm:$0xff]  ;;  %v6204_v19 = vld [vmem:[#allocation174_spill] sm:$0xff] }
 0x28f   : > { %v4801_v62 = vadd.f32 %v2081_v11, %v1889_v17  ;;  %v4803_v43 = vadd.f32 %v2092_v30, %v1900_v24  ;;  %v999_v63 = vadd.f32 %v967_v18, %v6201_v40  ;;  %v969_v20 = vmul.f32 %v6192_v45, %v6202_v8  ;;  %v3152_v18 = vld [vmem:[%s5812_s2 + $0xf8] sm:$0xff]  ;;  %v6205_v45 = vld [vmem:[#allocation12_spill] sm:$0xff]  ;;  %v6206_v30 = vld [vmem:[#allocation34_spill] sm:$0xff] }
 0x290   : > { %v1415_v52 = vmul.f32 %v4493_v59, %v6203_v47  ;;  %3066 = vset.pattern.permute.xlu1 %v6035_v36  ;;  %v1952_v35 = vpop.permute.xlu1 %1951  ;;  %v1445_v44 = vadd.f32 %v1413_v13, %v1221_v16  ;;  %v1891_v57 = vadd.f32 %v1859_v1, %v1667_v31  ;;  %v1861_v17 = vmul.f32 %v4720_v25, %v6204_v19  ;;  %v6207_v7 = vld [vmem:[#allocation192_spill] sm:$0xff]  ;;  %v6208_v8 = vld [vmem:[#allocation93_spill] sm:$0xff]  ;;  %v6276_v58 = vld [vmem:[#allocation171_spill] sm:$0xff] }
 0x291   : > { %6199 = vst [vmem:[#allocation140_spill] sm:$0xff] %v4801_v62  ;;  %6200 = vst [vmem:[#allocation85_spill] sm:$0xff] %v4803_v43  ;;  %v2083_v24 = vmul.f32 %v4797_v5, %v1952_v35  ;;  %2039 = vperm.xlu1 %3066, %v3152_v18   ;;  %v777_v11 = vadd.f32 %v745_v29, %v6205_v45  ;;  %v747_v36 = vmul.f32 %v6207_v7, %v6206_v30  ;;  %v6209_v16 = vld [vmem:[#allocation156_spill] sm:$0xff]  ;;  %v6211_v35 = vld [vmem:[#allocation181_spill] sm:$0xff] }
 0x292   : > { %v1223_v40 = vadd.f32 %v1191_v38, %v999_v63  ;;  %v1193_v13 = vmul.f32 %v4369_v15, %v6208_v8  ;;  %v1669_v1 = vadd.f32 %v1637_v0, %v1445_v44  ;;  %v1639_v31 = vmul.f32 %v4635_v2, %v6209_v16  ;;  %v6212_v43 = vld [vmem:[#allocation62_spill] sm:$0xff]  ;;  %v6215_v0 = vld [vmem:[#allocation176_spill] sm:$0xff]  ;;  %v6217_v16 = vld [vmem:[#allocation35_spill] sm:$0xff] }
 0x293   : > { %v4827_v47 = vadd.f32 %v2083_v24, %v1891_v57  ;;  %v4831_v19 = vrot.slane %v4812_v32, %v6211_v35  ;;  %v1001_v18 = vadd.f32 %v969_v20, %v777_v11  ;;  %v6213_v29 = vld [vmem:[#allocation202_spill] sm:$0xff]  ;;  %v1863_v44 = vmul.f32 %v4668_v4, %v6215_v0  ;;  %v6216_v24 = vld [vmem:[#allocation13_spill] sm:$0xff]  ;;  %v6223_v0 = vld [vmem:[#allocation64_spill] sm:$0xff] }
 0x294   : > { %v971_v45 = vmul.f32 %v6213_v29, %v6212_v43  ;;  %v1447_v62 = vadd.f32 %v1415_v52, %v1223_v40  ;;  %v1960_v30 = vpop.permute.xlu1 %1959  ;;  %v6214_v38 = vld [vmem:[#allocation122_spill] sm:$0xff]  ;;  %v1893_v15 = vadd.f32 %v1861_v17, %v1669_v1  ;;  %v779_v8 = vadd.f32 %v747_v36, %v6216_v24  ;;  %v6218_v11 = vld [vmem:[#allocation185_spill] sm:$0xff]  ;;  %v6219_v52 = vld [vmem:[#allocation95_spill] sm:$0xff] }
 0x295   : > { %6210 = vst [vmem:[#allocation88_spill] sm:$0xff] %v4827_v47  ;;  %v1417_v63 = vmul.f32 %v4493_v59, %v6214_v38  ;;  %v2085_v57 = vmul.f32 %v4797_v5, %v1960_v30  ;;  %3067 = vset.pattern.permute.xlu1 %v6057_v55  ;;  %v749_v20 = vmul.f32 %v6207_v7, %v6217_v16  ;;  %v3153_v17 = vld [vmem:[%s5812_s2 + $0xf0] sm:$0xff]  ;;  %v6220_v55 = vld [vmem:[#allocation158_spill] sm:$0xff]  ;;  %v6268_v47 = vld [vmem:[#allocation31_spill] sm:$0xff] }
 0x296   : > { %v4846_v43 = vrot.slane %v4812_v32, %v6218_v11  ;;  %v1195_v59 = vmul.f32 %v4390_v21, %v6219_v52  ;;  %2259 = vperm.xlu1 %3067, %v3153_v17   ;;  %v1225_v40 = vadd.f32 %v1193_v13, %v1001_v18  ;;  %v1671_v1 = vadd.f32 %v1639_v31, %v1447_v62  ;;  %v6222_v7 = vld [vmem:[#allocation36_spill] sm:$0xff]  ;;  %v332_v62 = vld [vmem:[%s5814_s4] sm:$0xff] }
 0x297   : > { %v1641_v36 = vmul.f32 %v4635_v2, %v6220_v55  ;;  %v4855_v35 = vadd.f32 %v2085_v57, %v1893_v15  ;;  %v751_v30 = vmul.f32 %v4831_v19, %v6222_v7  ;;  %v1003_v38 = vadd.f32 %v971_v45, %v779_v8  ;;  %v6224_v16 = vld [vmem:[#allocation124_spill] sm:$0xff]  ;;  %v6225_v2 = vld [vmem:[#allocation178_spill] sm:$0xff]  ;;  %v4868_v15 = vpop.permute.xlu0 %1995  ;;  %v6228_v7 = vld [vmem:[#allocation193_spill] sm:$0xff] }
 0x298   : > { %v973_v24 = vmul.f32 %v6213_v29, %v6223_v0  ;;  %v1419_v11 = vmul.f32 %v4546_v6, %v6224_v16  ;;  %v1968_v52 = vpop.permute.xlu1 %1967  ;;  %v1449_v13 = vadd.f32 %v1417_v63, %v1225_v40  ;;  %v1895_v31 = vadd.f32 %v1863_v44, %v1671_v1  ;;  %v6226_v57 = vld [vmem:[#allocation14_spill] sm:$0xff]  ;;  %v6230_v63 = vld [vmem:[#allocation97_spill] sm:$0xff]  ;;  %v6231_v40 = vld [vmem:[#allocation160_spill] sm:$0xff] }
 0x299   : > { %6221 = vst [vmem:[#allocation108_spill] sm:$0xff] %v4855_v35  ;;  %v1865_v18 = vmul.f32 %v4668_v4, %v6225_v2  ;;  %v2087_v45 = vmul.f32 %v4687_v49, %v1968_v52  ;;  %v781_v8 = vadd.f32 %v749_v20, %v6226_v57  ;;  %v6227_v29 = vld [vmem:[#allocation66_spill] sm:$0xff]  ;;  %v1227_v55 = vadd.f32 %v1195_v59, %v1003_v38  ;;  %v6233_v20 = vld [vmem:[#allocation15_spill] sm:$0xff]  ;;  %v6240_v35 = vld [vmem:[#allocation161_spill] sm:$0xff] }
 0x29a   : > { %v975_v17 = vmul.f32 %v4846_v43, %v6227_v29  ;;  %v4876_v0 = vrot.slane %v4812_v32, %v6228_v7  ;;  %v6229_v16 = vmov 0   ;;  %v1197_v44 = vmul.f32 %v4390_v21, %v6230_v63  ;;  %v334_v21 = vld [vmem:[%s5814_s4 + $0x10] sm:$0xff] }
 0x29b   : > { %3068 = vset.pattern.permute.xlu1 %v6229_v16  ;;  %v1673_v4 = vadd.f32 %v1641_v36, %v1449_v13  ;;  %v1643_v1 = vmul.f32 %v4651_v28, %v6231_v40  ;;  %v4883_v52 = vadd.f32 %v2087_v45, %v1895_v31  ;;  %v783_v2 = vadd.f32 %v751_v30, %v6233_v20  ;;  %v6234_v36 = vld [vmem:[#allocation126_spill] sm:$0xff]  ;;  %v6235_v31 = vld [vmem:[#allocation180_spill] sm:$0xff]  ;;  %v6239_v16 = vld [vmem:[#allocation99_spill] sm:$0xff] }
 0x29c   : > { %2761 = vperm.xlu1 %3068, %v332_v62   ;;  %v1005_v57 = vadd.f32 %v973_v24, %v781_v8  ;;  %v1451_v59 = vadd.f32 %v1419_v11, %v1227_v55  ;;  %v4888_v38 = vrot.slane %v4812_v32, %v4393_v23  ;;  %v1976_v29 = vpop.permute.xlu1 %1975  ;;  %v1421_v13 = vmul.f32 %v4546_v6, %v6234_v36  ;;  %v6236_v24 = vld [vmem:[#allocation27_spill] sm:$0xff]  ;;  %v6237_v11 = vld [vmem:[#allocation186_spill] sm:$0xff]  ;;  %v6244_v36 = vld [vmem:[#allocation128_spill] sm:$0xff] }
 0x29d   : > { %6232 = vst [vmem:[#allocation90_spill] sm:$0xff] %v4883_v52  ;;  %v1897_v7 = vadd.f32 %v1865_v18, %v1673_v4  ;;  %v1867_v62 = vmul.f32 %v4724_v14, %v6235_v31  ;;  %v2089_v30 = vmul.f32 %v4687_v49, %v1976_v29  ;;  %v731_v45 = vmul.f32 %v6237_v11, %v6236_v24  ;;  %v6238_v8 = vld [vmem:[#allocation38_spill] sm:$0xff]  ;;  %v4906_v18 = vpop.permute.xlu0 %2003  ;;  %v6243_v49 = vld [vmem:[#allocation68_spill] sm:$0xff] }
 0x29e   : > { %v753_v23 = vmul.f32 %v4831_v19, %v6238_v8  ;;  %v1007_v55 = vadd.f32 %v975_v17, %v783_v2  ;;  %v1199_v63 = vmul.f32 %v4876_v0, %v6239_v16  ;;  %v1229_v40 = vadd.f32 %v1197_v44, %v1005_v57  ;;  %6241 = vst [vmem:[#allocation142_spill] sm:$0xff] %v4906_v18  ;;  %v6245_v57 = vld [vmem:[#allocation183_spill] sm:$0xff]  ;;  %v6250_v52 = vld [vmem:[#allocation162_spill] sm:$0xff]  ;;  %v6346_v18 = vld [vmem:[#allocation109_spill] sm:$0xff] }
 0x29f   : > { %v1675_v20 = vadd.f32 %v1643_v1, %v1451_v59  ;;  %v1645_v6 = vmul.f32 %v4651_v28, %v6240_v35  ;;  %v4908_v4 = vadd.f32 %v2089_v30, %v1897_v7  ;;  %v977_v29 = vmul.f32 %v4846_v43, %v6243_v49  ;;  %v335_v35 = vld [vmem:[%s5814_s4 + $0x18] sm:$0xff]  ;;  %v6246_v7 = vld [vmem:[#allocation28_spill] sm:$0xff]  ;;  %v6249_v49 = vld [vmem:[#allocation7_spill] sm:$0xff] }
 0x2a0   : > { %2771 = vperm.xlu1 %3068, %v334_v21   ;;  %v1423_v31 = vmul.f32 %v4888_v38, %v6244_v36  ;;  %v4916_v17 = vrot.slane %v4812_v32, %v4433_v41  ;;  %v4920_v44 = vrot.slane %v4812_v32, %v4504_v33  ;;  %v1984_v28 = vpop.permute.xlu1 %1983  ;;  %v1453_v1 = vadd.f32 %v1421_v13, %v1229_v40  ;;  %v6247_v30 = vld [vmem:[#allocation17_spill] sm:$0xff] }
 0x2a1   : > { %6242 = vst [vmem:[#allocation87_spill] sm:$0xff] %v4908_v4  ;;  %v1899_v2 = vadd.f32 %v1867_v62, %v1675_v20  ;;  %v1869_v59 = vmul.f32 %v4724_v14, %v6245_v57  ;;  %v2091_v21 = vmul.f32 %v4740_v26, %v1984_v28  ;;  %v732_v41 = vmul.f32 %v6237_v11, %v6246_v7  ;;  %v6248_v33 = vld [vmem:[#allocation101_spill] sm:$0xff]  ;;  %v6255_v11 = vld [vmem:[#allocation196_spill] sm:$0xff]  ;;  %v6256_v7 = vld [vmem:[#allocation130_spill] sm:$0xff] }
 0x2a2   : > { %v785_v24 = vadd.f32 %v753_v23, %v6247_v30  ;;  %v1231_v8 = vadd.f32 %v1199_v63, %v1007_v55  ;;  %v1201_v16 = vmul.f32 %v4876_v0, %v6248_v33  ;;  %v763_v36 = vadd.f32 %v731_v45, %v6249_v49  ;;  %v6252_v14 = vld [vmem:[#allocation29_spill] sm:$0xff] }
 0x2a3   : > { %v1677_v4 = vadd.f32 %v1645_v6, %v1453_v1  ;;  %v1647_v13 = vmul.f32 %v4916_v17, %v6250_v52  ;;  %v4936_v62 = vadd.f32 %v2091_v21, %v1899_v2  ;;  %v6253_v40 = vld [vmem:[#allocation189_spill] sm:$0xff]  ;;  %v1425_v30 = vmul.f32 %v4888_v38, %v6256_v7  ;;  %v6257_v6 = vld [vmem:[#allocation188_spill] sm:$0xff]  ;;  %v4946_v52 = vpop.permute.xlu0 %2011  ;;  %v6258_v2 = vld [vmem:[#allocation6_spill] sm:$0xff] }
 0x2a4   : > { %2776 = vperm.xlu1 %3068, %v335_v35   ;;  %v734_v20 = vmul.f32 %v6253_v40, %v6252_v14  ;;  %v6254_v28 = vld [vmem:[#allocation45_spill] sm:$0xff]  ;;  %v1009_v23 = vadd.f32 %v977_v29, %v785_v24  ;;  %v1455_v55 = vadd.f32 %v1423_v31, %v1231_v8  ;;  %v1992_v63 = vpop.permute.xlu1 %1991  ;;  %v1871_v1 = vmul.f32 %v4920_v44, %v6257_v6  ;;  %v6262_v8 = vld [vmem:[#allocation163_spill] sm:$0xff]  ;;  %v6265_v6 = vld [vmem:[#allocation80_spill] sm:$0xff] }
 0x2a5   : > { %6251 = vst [vmem:[#allocation123_spill] sm:$0xff] %v4936_v62  ;;  %v955_v57 = vmul.f32 %v6255_v11, %v6254_v28  ;;  %v1901_v45 = vadd.f32 %v1869_v59, %v1677_v4  ;;  %v2093_v35 = vmul.f32 %v4740_v26, %v1992_v63  ;;  %v764_v21 = vadd.f32 %v732_v41, %v6258_v2  ;;  %v6259_v33 = vld [vmem:[#allocation49_spill] sm:$0xff]  ;;  %v6261_v28 = vld [vmem:[#allocation78_spill] sm:$0xff]  ;;  %v6264_v26 = vld [vmem:[#allocation8_spill] sm:$0xff] }
 0x2a6   : > { %v6260_v49 = vld [vmem:[#allocation197_spill] sm:$0xff]  ;;  %v1179_v29 = vmul.f32 %v4331_v61, %v6261_v28  ;;  %v1233_v31 = vadd.f32 %v1201_v16, %v1009_v23  ;;  %v1679_v24 = vadd.f32 %v1647_v13, %v1455_v55  ;;  %v1649_v4 = vmul.f32 %v4916_v17, %v6262_v8  ;;  %v6267_v55 = vld [vmem:[#allocation200_spill] sm:$0xff] }
 0x2a7   : > { %v958_v14 = vmul.f32 %v6260_v49, %v6259_v33  ;;  %v4958_v59 = vrot.slane %v4812_v32, %v4638_v22  ;;  %v4960_v7 = vadd.f32 %v2093_v35, %v1901_v45  ;;  %v766_v63 = vadd.f32 %v734_v20, %v6264_v26  ;;  %v6266_v33 = vld [vmem:[#allocation111_spill] sm:$0xff]  ;;  %v6269_v45 = vld [vmem:[#allocation190_spill] sm:$0xff] }
 0x2a8   : > { %v987_v41 = vadd.f32 %v955_v57, %v763_v36  ;;  %v1182_v2 = vmul.f32 %v4347_v9, %v6265_v6  ;;  %v1403_v28 = vmul.f32 %v4443_v54, %v6266_v33  ;;  %v2000_v16 = vpop.permute.xlu1 %1999  ;;  %v1457_v13 = vadd.f32 %v1425_v30, %v1233_v31  ;;  %v6271_v57 = vld [vmem:[#allocation139_spill] sm:$0xff]  ;;  %v4978_v31 = vpop.permute.xlu0 %2019 }
 0x2a9   : > { %6263 = vst [vmem:[#allocation92_spill] sm:$0xff] %v4960_v7  ;;  %v1903_v23 = vadd.f32 %v1871_v1, %v1679_v24  ;;  %v1873_v8 = vmul.f32 %v4920_v44, %v6267_v55  ;;  %v2095_v62 = vmul.f32 %v4958_v59, %v2000_v16  ;;  %v738_v35 = vmul.f32 %v6269_v45, %v6268_v47  ;;  %v6270_v7 = vld [vmem:[#allocation47_spill] sm:$0xff] }
 0x2aa   : > { %v956_v36 = vmul.f32 %v6255_v11, %v6270_v7  ;;  %v1211_v20 = vadd.f32 %v1179_v29, %v987_v41  ;;  %v1627_v26 = vmul.f32 %v4578_v48, %v6271_v57  ;;  %v990_v6 = vadd.f32 %v958_v14, %v766_v63  ;;  %v6272_v33 = vld [vmem:[#allocation115_spill] sm:$0xff]  ;;  %6273 = vst [vmem:[#allocation94_spill] sm:$0xff] %v4978_v31  ;;  %v6277_v63 = vld [vmem:[#allocation141_spill] sm:$0xff] }
 0x2ab   : > { %v1406_v30 = vmul.f32 %v4473_v53, %v6272_v33  ;;  %v1681_v1 = vadd.f32 %v1649_v4, %v1457_v13  ;;  %v4980_v24 = vadd.f32 %v2095_v62, %v1903_v23  ;;  %v6275_v16 = vld [vmem:[#allocation79_spill] sm:$0xff]  ;;  %v1851_v11 = vmul.f32 %v4617_v46, %v6276_v58  ;;  %v6280_v58 = vld [vmem:[#allocation113_spill] sm:$0xff] }
 0x2ac   : > { %v1180_v55 = vmul.f32 %v4331_v61, %v6275_v16  ;;  %v1435_v47 = vadd.f32 %v1403_v28, %v1211_v20  ;;  %v4987_v29 = vsub.s32 7, %v4209_v50  ;;  %v2008_v7 = vpop.permute.xlu1 %2007  ;;  %v1214_v14 = vadd.f32 %v1182_v2, %v990_v6  ;;  %v6278_v28 = vld [vmem:[#allocation53_spill] sm:$0xff]  ;;  %v6279_v20 = vld [vmem:[#allocation198_spill] sm:$0xff]  ;;  %v6282_v6 = vld [vmem:[#allocation175_spill] sm:$0xff] }
 0x2ad   : > { %6274 = vst [vmem:[#allocation149_spill] sm:$0xff] %v4980_v24  ;;  %v1630_v41 = vmul.f32 %v4599_v37, %v6277_v63  ;;  %v1905_v4 = vadd.f32 %v1873_v8, %v1681_v1  ;;  %v2097_v13 = vmul.f32 %v4958_v59, %v2008_v7  ;;  %v988_v62 = vadd.f32 %v956_v36, %v764_v21  ;;  %v6283_v36 = vld [vmem:[#allocation10_spill] sm:$0xff]  ;;  %v6284_v1 = vld [vmem:[#allocation84_spill] sm:$0xff]  ;;  %v5009_v63 = vpop.permute.xlu0 %2035  ;;  %v6316_v24 = vld [vmem:[#allocation9_spill] sm:$0xff] }
 0x2ae   : > { %v1659_v23 = vadd.f32 %v1627_v26, %v1435_v47  ;;  %v2075_v61 = vmul.f32 %v4672_v39, %v4539_v3  ;;  %v962_v57 = vmul.f32 %v6279_v20, %v6278_v28  ;;  %v1404_v50 = vmul.f32 %v4443_v54, %v6280_v58  ;;  %6285 = vst [vmem:[#allocation112_spill] sm:$0xff] %v5009_v63  ;;  %v6323_v63 = vld [vmem:[#allocation51_spill] sm:$0xff] }
 0x2af   : > { %v1438_v33 = vadd.f32 %v1406_v30, %v1214_v14  ;;  %v4998_v16 = vadd.f32 %v2097_v13, %v1905_v4  ;;  %v1854_v8 = vmul.f32 %v4695_v56, %v6282_v6  ;;  %v5004_v21 = vrot.slane %v4225_v60, %v4987_v29  ;;  %v6286_v30 = vld [vmem:[#allocation144_spill] sm:$0xff]  ;;  %v6287_v4 = vld [vmem:[#allocation102_spill] sm:$0xff] }
 0x2b0   : > { %v1883_v2 = vadd.f32 %v1851_v11, %v1659_v23  ;;  %v770_v26 = vadd.f32 %v738_v35, %v6283_v36  ;;  %v1212_v3 = vadd.f32 %v1180_v55, %v988_v62  ;;  %v1186_v47 = vmul.f32 %v4361_v12, %v6284_v1  ;;  %v6288_v35 = vld [vmem:[#allocation119_spill] sm:$0xff]  ;;  %v6289_v62 = vld [vmem:[#allocation173_spill] sm:$0xff] }
 0x2b1   : > { %6281 = vst [vmem:[#allocation110_spill] sm:$0xff] %v4998_v16  ;;  %v1662_v7 = vadd.f32 %v1630_v41, %v1438_v33  ;;  %v2144_v54 = vpop.permute.xlu1 %2143  ;;  %v1628_v11 = vmul.f32 %v4578_v48, %v6286_v30  ;;  %v2078_v13 = vmul.f32 %v4751_v51, %v6287_v4  ;;  %v1410_v55 = vmul.f32 %v4479_v34, %v6288_v35  ;;  %v6290_v33 = vld [vmem:[#allocation184_spill] sm:$0xff]  ;;  %v6294_v30 = vld [vmem:[#allocation179_spill] sm:$0xff]  ;;  %v6314_v16 = vld [vmem:[#allocation42_spill] sm:$0xff] }
 0x2b2   : > { %v2107_v14 = vadd.f32 %v2075_v61, %v1883_v2  ;;  %v2299_v60 = vmul.f32 %v5004_v21, %v2144_v54  ;;  %v994_v23 = vadd.f32 %v962_v57, %v770_v26  ;;  %v1436_v28 = vadd.f32 %v1404_v50, %v1212_v3  ;;  %v6292_v2 = vld [vmem:[#allocation145_spill] sm:$0xff]  ;;  %v6293_v26 = vld [vmem:[#allocation138_spill] sm:$0xff] }
 0x2b3   : > { %v1852_v41 = vmul.f32 %v4617_v46, %v6289_v62  ;;  %v1886_v58 = vadd.f32 %v1854_v8, %v1662_v7  ;;  %v5022_v6 = vrot.slane %v6290_v33, %v4987_v29  ;;  %v1634_v36 = vmul.f32 %v4603_v27, %v6292_v2  ;;  %v5031_v46 = vpop.permute.xlu0 %2139 }
 0x2b4   : > { %v5024_v48 = vadd.f32 %v2299_v60, %v2107_v14  ;;  %v1218_v61 = vadd.f32 %v1186_v47, %v994_v23  ;;  %v1660_v57 = vadd.f32 %v1628_v11, %v1436_v28  ;;  %v2076_v3 = vmul.f32 %v4672_v39, %v6293_v26  ;;  %v6295_v23 = vld [vmem:[#allocation136_spill] sm:$0xff] }
 0x2b5   : > { %v2156_v1 = vpop.permute.xlu1 %2155  ;;  %v2110_v50 = vadd.f32 %v2078_v13, %v1886_v58  ;;  %v1858_v14 = vmul.f32 %v4720_v25, %v6294_v30  ;;  %v2082_v11 = vmul.f32 %v4797_v5, %v6295_v23  ;;  %v5042_v35 = vrot.slane %v4231_v42, %v4987_v29 }
 0x2b6   : > { %6291 = vst [vmem:[#allocation125_spill] sm:$0xff] %v5024_v48  ;;  %v2302_v54 = vmul.f32 %v5022_v6, %v2156_v1  ;;  %v1442_v8 = vadd.f32 %v1410_v55, %v1218_v61  ;;  %v1884_v7 = vadd.f32 %v1852_v41, %v1660_v57  ;;  %v6337_v48 = vld [vmem:[#allocation82_spill] sm:$0xff] }
 0x2b7   : > { %6296 = vst [vmem:[#allocation187_spill] sm:$0xff] %v5042_v35  ;;  %v5046_v62 = vpop.permute.xlu0 %2159 }
 0x2b8   : > { %v5035_v4 = vadd.f32 %v2302_v54, %v2110_v50  ;;  %v1666_v60 = vadd.f32 %v1634_v36, %v1442_v8  ;;  %v2108_v13 = vadd.f32 %v2076_v3, %v1884_v7  ;;  %v6307_v7 = vld [vmem:[#allocation30_spill] sm:$0xff] }
 0x2b9   : > { %v2148_v47 = vpop.permute.xlu1 %2147  ;;  %v736_v30 = vmul.f32 %v6253_v40, %v6307_v7  ;;  %v6317_v7 = vld [vmem:[#allocation11_spill] sm:$0xff] }
 0x2ba   : > { %v2300_v28 = vmul.f32 %v5004_v21, %v2148_v47  ;;  %v1890_v39 = vadd.f32 %v1858_v14, %v1666_v60  ;;  %v6308_v14 = vld [vmem:[#allocation32_spill] sm:$0xff]  ;;  %v6309_v60 = vld [vmem:[#allocation37_spill] sm:$0xff] }
 0x2bb   : > { %v5053_v36 = vpop.permute.xlu0 %2163  ;;  %v740_v47 = vmul.f32 %v6269_v45, %v6308_v14  ;;  %v750_v23 = vmul.f32 %v4831_v19, %v6309_v60  ;;  %v768_v40 = vadd.f32 %v736_v30, %v6316_v24  ;;  %v6318_v45 = vld [vmem:[#allocation43_spill] sm:$0xff] }
 0x2bc   : > { %v5044_v55 = vadd.f32 %v2300_v28, %v2108_v13  ;;  %v2114_v58 = vadd.f32 %v2082_v11, %v1890_v39  ;;  %6299 = vst [vmem:[#allocation151_spill] sm:$0xff] %v5053_v36  ;;  %v6310_v11 = vld [vmem:[#allocation39_spill] sm:$0xff]  ;;  %v6311_v28 = vld [vmem:[#allocation40_spill] sm:$0xff]  ;;  %v6312_v39 = vld [vmem:[#allocation194_spill] sm:$0xff] }
 0x2bd   : > { %v2172_v41 = vpop.permute.xlu1 %2171  ;;  %v752_v13 = vmul.f32 %v4831_v19, %v6310_v11  ;;  %v6321_v19 = vld [vmem:[#allocation16_spill] sm:$0xff]  ;;  %v6325_v24 = vld [vmem:[#allocation19_spill] sm:$0xff] }
 0x2be   : > { %6297 = vst [vmem:[#allocation146_spill] sm:$0xff] %v5044_v55  ;;  %v2306_v33 = vmul.f32 %v5042_v35, %v2172_v41  ;;  %v755_v41 = vmul.f32 %v6312_v39, %v6311_v28  ;;  %v6315_v55 = vld [vmem:[#allocation195_spill] sm:$0xff]  ;;  %v782_v11 = vadd.f32 %v750_v23, %v6321_v19  ;;  %v6322_v28 = vld [vmem:[#allocation18_spill] sm:$0xff]  ;;  %v6330_v23 = vld [vmem:[#allocation21_spill] sm:$0xff] }
 0x2bf   : > { %v5057_v57 = vpop.permute.xlu0 %2175  ;;  %v761_v14 = vmul.f32 %v6315_v55, %v6318_v45  ;;  %v784_v36 = vadd.f32 %v752_v13, %v6322_v28  ;;  %v6331_v13 = vld [vmem:[#allocation23_spill] sm:$0xff] }
 0x2c0   : > { %v5049_v61 = vadd.f32 %v2306_v33, %v2114_v58  ;;  %6301 = vst [vmem:[#allocation166_spill] sm:$0xff] %v5057_v57  ;;  %v6313_v58 = vld [vmem:[#allocation41_spill] sm:$0xff]  ;;  %v787_v30 = vadd.f32 %v755_v41, %v6325_v24 }
 0x2c1   : > { %v5051_v2 = vpop.permute.xlu1 %2151  ;;  %v757_v33 = vmul.f32 %v6312_v39, %v6313_v58  ;;  %v960_v39 = vmul.f32 %v6260_v49, %v6323_v63  ;;  %v6324_v58 = vld [vmem:[#allocation55_spill] sm:$0xff]  ;;  %v6333_v63 = vld [vmem:[#allocation74_spill] sm:$0xff]  ;;  %v6335_v41 = vld [vmem:[#allocation25_spill] sm:$0xff] }
 0x2c2   : > { %6298 = vst [vmem:[#allocation127_spill] sm:$0xff] %v5051_v2  ;;  %v793_v24 = vadd.f32 %v761_v14, %v6335_v41 }
 0x2c3   : > { %v5063_v26 = vpop.permute.xlu0 %2167  ;;  %v789_v19 = vadd.f32 %v757_v33, %v6330_v23 }
 0x2c4   : > { %6304 = vst [vmem:[#allocation153_spill] sm:$0xff] %v5063_v26  ;;  %v6336_v26 = vld [vmem:[#allocation76_spill] sm:$0xff] }
 0x2c5   : > { %v5055_v1 = vpop.permute.xlu1 %2179 }
 0x2c6   : > { %6300 = vst [vmem:[#allocation114_spill] sm:$0xff] %v5055_v1  ;;  %v772_v1 = vadd.f32 %v740_v47, %v6317_v7  ;;  %v6326_v47 = vld [vmem:[#allocation65_spill] sm:$0xff] }
 0x2c7   : > { %v5067_v54 = vpop.permute.xlu0 %2187  ;;  %v974_v7 = vmul.f32 %v4846_v43, %v6326_v47 }
 0x2c9   : > { %v5059_v42 = vpop.permute.xlu1 %2191  ;;  %v1006_v14 = vadd.f32 %v974_v7, %v782_v11 }
 0x2ca   : > { %6302 = vst [vmem:[#allocation199_spill] sm:$0xff] %v5059_v42 }
 0x2cb   : > { %v5089_v60 = vpop.permute.xlu0 %2183 }
 0x2cc   : > { %6319 = vst [vmem:[#allocation150_spill] sm:$0xff] %v5089_v60  ;;  %v6328_v60 = vld [vmem:[#allocation70_spill] sm:$0xff] }
 0x2cd   : > { %v5061_v50 = vpop.permute.xlu1 %2195 }
 0x2ce   : > { %6303 = vst [vmem:[#allocation148_spill] sm:$0xff] %v5061_v50  ;;  %v759_v50 = vmul.f32 %v6315_v55, %v6314_v16  ;;  %v964_v16 = vmul.f32 %v6279_v20, %v6324_v58  ;;  %v6327_v55 = vld [vmem:[#allocation67_spill] sm:$0xff]  ;;  %v6334_v20 = vld [vmem:[#allocation204_spill] sm:$0xff] }
 0x2cf   : > { %v976_v45 = vmul.f32 %v4846_v43, %v6327_v55  ;;  %v983_v58 = vmul.f32 %v6334_v20, %v6333_v63  ;;  %v985_v47 = vmul.f32 %v6334_v20, %v6336_v26  ;;  %v1184_v43 = vmul.f32 %v4347_v9, %v6337_v48  ;;  %v6338_v55 = vld [vmem:[#allocation86_spill] sm:$0xff]  ;;  %v6341_v26 = vld [vmem:[#allocation103_spill] sm:$0xff]  ;;  %v6342_v20 = vld [vmem:[#allocation44_spill] sm:$0xff]  ;;  %v2204_v9 = vpop.permute.xlu0 %2203 }
 0x2d0   : > { %v791_v28 = vadd.f32 %v759_v50, %v6331_v13  ;;  %v992_v50 = vadd.f32 %v960_v39, %v768_v40  ;;  %v996_v23 = vadd.f32 %v964_v16, %v772_v1  ;;  %v6339_v13 = vld [vmem:[#allocation96_spill] sm:$0xff]  ;;  %v1203_v42 = vmul.f32 %v6342_v20, %v6341_v26  ;;  %v6344_v40 = vld [vmem:[#allocation107_spill] sm:$0xff] }
 0x2d1   : > { %v5065_v3 = vpop.permute.xlu1 %2207  ;;  %v1008_v41 = vadd.f32 %v976_v45, %v784_v36  ;;  %v6345_v1 = vld [vmem:[#allocation20_spill] sm:$0xff]  ;;  %v1017_v16 = vadd.f32 %v985_v47, %v793_v24  ;;  %v6348_v45 = vld [vmem:[#allocation121_spill] sm:$0xff]  ;;  %v6351_v47 = vld [vmem:[#allocation50_spill] sm:$0xff] }
 0x2d2   : > { %6305 = vst [vmem:[#allocation129_spill] sm:$0xff] %v5065_v3  ;;  %v6332_v3 = vld [vmem:[#allocation72_spill] sm:$0xff]  ;;  %v1015_v35 = vadd.f32 %v983_v58, %v791_v28  ;;  %v1207_v39 = vmul.f32 %v6345_v1, %v6344_v40  ;;  %v6357_v26 = vld [vmem:[#allocation143_spill] sm:$0xff]  ;;  %v3154_v40 = vld [vmem:[%s3303_s17 + $0x18] sm:$0xff] }
 0x2d3   : > { %v6350_v24 = vld [vmem:[#allocation132_spill] sm:$0xff] }
 0x2d6   : > { %v5069_v8 = vpop.permute.xlu1 %2015 }
 0x2d7   : > { %6306 = vst [vmem:[#allocation168_spill] sm:$0xff] %v5069_v8 }
 0x2db   : > { %v5091_v8 = vpop.permute.xlu1 %2199 }
 0x2dc   : > { %6320 = vst [vmem:[#allocation155_spill] sm:$0xff] %v5091_v8  ;;  %v6329_v8 = vld [vmem:[#allocation203_spill] sm:$0xff] }
 0x2dd   : > { %v979_v2 = vmul.f32 %v6329_v8, %v6328_v60  ;;  %v981_v49 = vmul.f32 %v6329_v8, %v6332_v3  ;;  %v1188_v60 = vmul.f32 %v4361_v12, %v6338_v55  ;;  %v1198_v3 = vmul.f32 %v4876_v0, %v6339_v13  ;;  %v6340_v8 = vld [vmem:[#allocation98_spill] sm:$0xff]  ;;  %v6343_v12 = vld [vmem:[#allocation105_spill] sm:$0xff] }
 0x2de   : > { %v1200_v63 = vmul.f32 %v4876_v0, %v6340_v8  ;;  %v1205_v55 = vmul.f32 %v6342_v20, %v6343_v12  ;;  %v1216_v13 = vadd.f32 %v1184_v43, %v992_v50  ;;  %v1209_v0 = vmul.f32 %v6345_v1, %v6346_v18  ;;  %v6358_v12 = vld [vmem:[#allocation147_spill] sm:$0xff] }
 0x2df   : > { %v5119_v33 = vpop.permute.xlu1 %2219  ;;  %v1011_v31 = vadd.f32 %v979_v2, %v787_v30  ;;  %v1013_v48 = vadd.f32 %v981_v49, %v789_v19  ;;  %v1220_v57 = vadd.f32 %v1188_v60, %v996_v23  ;;  %v1230_v2 = vadd.f32 %v1198_v3, %v1006_v14  ;;  %v6347_v30 = vld [vmem:[#allocation117_spill] sm:$0xff]  ;;  %v6349_v49 = vld [vmem:[#allocation131_spill] sm:$0xff]  ;;  %v6353_v3 = vld [vmem:[#allocation134_spill] sm:$0xff] }
 0x2e0   : > { %v1232_v11 = vadd.f32 %v1200_v63, %v1008_v41  ;;  %v1408_v7 = vmul.f32 %v4473_v53, %v6347_v30  ;;  %v1412_v19 = vmul.f32 %v4479_v34, %v6348_v45  ;;  %v1422_v58 = vmul.f32 %v4888_v38, %v6349_v49  ;;  %v6352_v60 = vld [vmem:[#allocation133_spill] sm:$0xff] }
 0x2e1   : > { %v1235_v28 = vadd.f32 %v1203_v42, %v1011_v31  ;;  %v1427_v43 = vmul.f32 %v6351_v47, %v6350_v24  ;;  %v1424_v18 = vmul.f32 %v4888_v38, %v6352_v60  ;;  %v1237_v50 = vadd.f32 %v1205_v55, %v1013_v48  ;;  %v6354_v31 = vld [vmem:[#allocation135_spill] sm:$0xff]  ;;  %v6355_v42 = vld [vmem:[#allocation100_spill] sm:$0xff]  ;;  %v6356_v14 = vld [vmem:[#allocation137_spill] sm:$0xff]  ;;  %v5155_v38 = vpop.permute.xlu0 %2211 }
 0x2e2   : > { %v1239_v23 = vadd.f32 %v1207_v39, %v1015_v35  ;;  %v1429_v8 = vmul.f32 %v6351_v47, %v6353_v3  ;;  %v2298_v53 = vmul.f32 %v5004_v21, %v5031_v46  ;;  %v1241_v34 = vadd.f32 %v1209_v0, %v1017_v16  ;;  %v6359_v30 = vld [vmem:[#allocation157_spill] sm:$0xff]  ;;  %v6364_v3 = vld [vmem:[#allocation22_spill] sm:$0xff] }
 0x2e3   : > { %v5133_v36 = vpop.permute.xlu1 %2223  ;;  %v1431_v63 = vmul.f32 %v6355_v42, %v6354_v31  ;;  %v1433_v41 = vmul.f32 %v6355_v42, %v6356_v14  ;;  %v1632_v20 = vmul.f32 %v4599_v37, %v6357_v26  ;;  %v1440_v35 = vadd.f32 %v1408_v7, %v1216_v13  ;;  %v6360_v37 = vld [vmem:[#allocation159_spill] sm:$0xff]  ;;  %v3155_v7 = vld [vmem:[%s3303_s17 + $0x20] sm:$0xff] }
 0x2e4   : > { %v1444_v48 = vadd.f32 %v1412_v19, %v1220_v57  ;;  %v1636_v55 = vmul.f32 %v4603_v27, %v6358_v12  ;;  %v5161_v46 = vrot.slane %v3154_v40, %v4987_v29  ;;  %v1454_v39 = vadd.f32 %v1422_v58, %v1230_v2  ;;  %v6361_v13 = vld [vmem:[#allocation75_spill] sm:$0xff] }
 0x2e5   : > { %v1459_v16 = vadd.f32 %v1427_v43, %v1235_v28  ;;  %v1456_v0 = vadd.f32 %v1424_v18, %v1232_v11  ;;  %v1646_v45 = vmul.f32 %v4916_v17, %v6359_v30  ;;  %v1461_v49 = vadd.f32 %v1429_v8, %v1237_v50  ;;  %v6362_v28 = vld [vmem:[#allocation46_spill] sm:$0xff]  ;;  %v5192_v42 = vpop.permute.xlu0 %2215  ;;  %v6366_v26 = vld [vmem:[#allocation167_spill] sm:$0xff]  ;;  %v3157_v30 = vld [vmem:[%s3303_s17 + $0x38] sm:$0xff] }
 0x2e6   : > { %v1648_v24 = vmul.f32 %v4916_v17, %v6360_v37  ;;  %v5168_v57 = vadd.f32 %v2298_v53, %v6361_v13  ;;  %v5172_v27 = vrot.slane %v3155_v7, %v4987_v29  ;;  %v1463_v19 = vadd.f32 %v1431_v63, %v1239_v23  ;;  %v6363_v23 = vld [vmem:[#allocation164_spill] sm:$0xff]  ;;  %v6365_v53 = vld [vmem:[#allocation165_spill] sm:$0xff] }
 0x2e7   : > { %v1465_v47 = vadd.f32 %v1433_v41, %v1241_v34  ;;  %v1664_v2 = vadd.f32 %v1632_v20, %v1440_v35  ;;  %v1870_v11 = vmul.f32 %v4920_v44, %v6362_v28  ;;  %v1668_v58 = vadd.f32 %v1636_v55, %v1444_v48  ;;  %v3156_v63 = vld [vmem:[%s3303_s17 + $0x30] sm:$0xff]  ;;  %v6367_v20 = vld [vmem:[#allocation71_spill] sm:$0xff]  ;;  %v6368_v48 = vld [vmem:[#allocation169_spill] sm:$0xff]  ;;  %s5576_s17 = sld [smem:[#allocation2]] }
 0x2e8   : > { %v2028_v1 = vpop.permute.xlu1 %2027  ;;  %v2362_v43 = vadd.f32 %v5035_v4, %v5168_v57  ;;  %v2310_v17 = vmul.f32 %v5161_v46, %v5067_v54  ;;  %v5182_v60 = vrot.slane %v4812_v32, %v4987_v29  ;;  %v1678_v50 = vadd.f32 %v1646_v45, %v1454_v39  ;;  %v6369_v55 = vld [vmem:[#allocation177_spill] sm:$0xff]  ;;  %v6370_v39 = vld [vmem:[#allocation182_spill] sm:$0xff] }
 0x2e9   : > { %v1651_v8 = vmul.f32 %v6364_v3, %v6363_v23  ;;  %v1653_v34 = vmul.f32 %v6364_v3, %v6365_v53  ;;  %v2094_v31 = vmul.f32 %v4958_v59, %v4868_v15  ;;  %v1680_v54 = vadd.f32 %v1648_v24, %v1456_v0  ;;  %v6371_v37 = vld [vmem:[#allocation77_spill] sm:$0xff] }
 0x2ea   : > { %v5196_v32 = vrot.slane %v3156_v63, %v4638_v22  ;;  %v2363_v14 = vadd.f32 %v2362_v43, %v5049_v61  ;;  %v2314_v41 = vmul.f32 %v5172_v27, %v2204_v9  ;;  %v1655_v35 = vmul.f32 %v6367_v20, %v6366_v26  ;;  %v6372_v28 = vld [vmem:[#allocation205_spill] sm:$0xff]  ;;  %v6373_v43 = vld [vmem:[#allocation26_spill] sm:$0xff] }
 0x2eb   : > { %v1657_v12 = vmul.f32 %v6367_v20, %v6368_v48  ;;  %v1856_v15 = vmul.f32 %v4695_v56, %v6369_v55  ;;  %v1902_v40 = vadd.f32 %v1870_v11, %v1678_v50  ;;  %v1860_v0 = vmul.f32 %v4720_v25, %v6370_v39  ;;  %v5219_v11 = vpop.permute.xlu0 %2239  ;;  %v6381_v48 = vld [vmem:[#allocation73_spill] sm:$0xff] }
 0x2ec   : > { %v5184_v18 = vpop.permute.xlu1 %2031  ;;  %v5210_v45 = vrot.slane %v3157_v30, %v4638_v22  ;;  %v5213_v24 = vadd.f32 %v2310_v17, %v6371_v37  ;;  %v2318_v9 = vmul.f32 %v5182_v60, %v5119_v33  ;;  %v1683_v13 = vadd.f32 %v1651_v8, %v1459_v16  ;;  %v6375_v8 = vld [vmem:[#allocation209_spill] sm:$0xff]  ;;  %v6385_v37 = vld [vmem:[#allocation142_spill] sm:$0xff] }
 0x2ed   : > { %v1685_v7 = vadd.f32 %v1653_v34, %v1461_v49  ;;  %v1875_v23 = vmul.f32 %v6373_v43, %v6372_v28  ;;  %v2126_v56 = vadd.f32 %v2094_v31, %v1902_v40  ;;  %v2098_v22 = vmul.f32 %v5196_v32, %v4946_v52  ;;  %v6383_v39 = vld [vmem:[#allocation61_spill] sm:$0xff]  ;;  %s2660_s20 = ssub.f32 1.0, %s5576_s17 }
 0x2ee   : > { %v2364_v25 = vadd.f32 %v2363_v14, %v5213_v24  ;;  %v5227_v17 = vadd.f32 %v2314_v41, %v4780_v10  ;;  %v2102_v33 = vmul.f32 %v5210_v45, %v2028_v1  ;;  %v1687_v16 = vadd.f32 %v1655_v35, %v1463_v19  ;;  %v6377_v10 = vld [vmem:[#allocation48_spill] sm:$0xff]  ;;  %v6378_v41 = vld [vmem:[#allocation57_spill] sm:$0xff] }
 0x2ef   : > { %v1689_v49 = vadd.f32 %v1657_v12, %v1465_v47  ;;  %v1888_v3 = vadd.f32 %v1856_v15, %v1664_v2  ;;  %v1877_v53 = vmul.f32 %v6373_v43, %v6375_v8  ;;  %v1892_v34 = vadd.f32 %v1860_v0, %v1668_v58  ;;  %v6379_v1 = vld [vmem:[#allocation52_spill] sm:$0xff]  ;;  %v6382_v15 = vld [vmem:[#allocation54_spill] sm:$0xff] }
 0x2f0   : > { %6374 = vst [vmem:[#allocation116_spill] sm:$0xff] %v5227_v17  ;;  %v5233_v31 = vrot.slane %v3156_v63, %v4987_v29  ;;  %v5236_v26 = vrot.slane %v3157_v30, %v4987_v29  ;;  %v5238_v52 = vadd.f32 %v2318_v9, %v2126_v56  ;;  %v1907_v14 = vadd.f32 %v1875_v23, %v1683_v13  ;;  %v6380_v58 = vld [vmem:[#allocation56_spill] sm:$0xff]  ;;  %v2252_v30 = vpop.permute.xlu0 %2251  ;;  %v6386_v23 = vld [vmem:[#allocation83_spill] sm:$0xff] }
 0x2f1   : > { %v5221_v50 = vpop.permute.xlu1 %2227  ;;  %v1879_v20 = vmul.f32 %v6378_v41, %v6377_v10  ;;  %v1872_v19 = vmul.f32 %v4920_v44, %v6379_v1  ;;  %v2303_v47 = vmul.f32 %v5022_v6, %v5046_v62  ;;  %v2130_v35 = vadd.f32 %v2098_v22, %v6380_v58  ;;  %v6384_v0 = vld [vmem:[#allocation104_spill] sm:$0xff]  ;;  %v6388_v22 = vld [vmem:[#allocation166_spill] sm:$0xff] }
 0x2f2   : > { %6376 = vst [vmem:[#allocation170_spill] sm:$0xff] %v5238_v52  ;;  %v2365_v63 = vadd.f32 %v2364_v25, %v5227_v17  ;;  %v2134_v29 = vadd.f32 %v2102_v33, %v6381_v48  ;;  %v5250_v55 = vadd.f32 %v1877_v53, %v1685_v7  ;;  %v1881_v40 = vmul.f32 %v6378_v41, %v6382_v15  ;;  %v6389_v25 = vld [vmem:[#allocation187_spill] sm:$0xff]  ;;  %v6391_v53 = vld [vmem:[#allocation94_spill] sm:$0xff] }
 0x2f3   : > { %v2080_v44 = vmul.f32 %v4751_v51, %v6383_v39  ;;  %v2084_v62 = vmul.f32 %v4797_v5, %v6384_v0  ;;  %v2096_v9 = vmul.f32 %v4958_v59, %v6385_v37  ;;  %v2326_v13 = vmul.f32 %v5236_v26, %v2252_v30  ;;  %v6390_v33 = vld [vmem:[#allocation199_spill] sm:$0xff]  ;;  %v6399_v39 = vld [vmem:[#allocation90_spill] sm:$0xff] }
 0x2f4   : > { %v2366_v28 = vadd.f32 %v2365_v63, %v5238_v52  ;;  %v1911_v7 = vadd.f32 %v1879_v20, %v1687_v16  ;;  %v5265_v56 = vadd.f32 %v2303_v47, %v6386_v23  ;;  %v2307_v51 = vmul.f32 %v6389_v25, %v6388_v22  ;;  %v6393_v20 = vld [vmem:[#allocation125_spill] sm:$0xff]  ;;  %v6400_v37 = vld [vmem:[#allocation59_spill] sm:$0xff]  ;;  %v6403_v23 = vld [vmem:[#allocation140_spill] sm:$0xff] }
 0x2f5   : > { %v2236_v2 = vpop.permute.xlu1 %2235  ;;  %v2311_v5 = vmul.f32 %v5161_v46, %v6390_v33  ;;  %v1904_v8 = vadd.f32 %v1872_v19, %v1680_v54  ;;  %v2100_v59 = vmul.f32 %v5196_v32, %v6391_v53  ;;  %v5273_v10 = vadd.f32 %v2326_v13, %v2134_v29  ;;  %v6405_v22 = vld [vmem:[#allocation123_spill] sm:$0xff]  ;;  %v6406_v33 = vld [vmem:[#allocation168_spill] sm:$0xff] }
 0x2f6   : > { %v2322_v12 = vmul.f32 %v5233_v31, %v2236_v2  ;;  %6387 = vst [vmem:[#allocation208_spill] sm:$0xff] %v5265_v56  ;;  %v5278_v16 = vadd.f32 %v1881_v40, %v1689_v49  ;;  %v2369_v47 = vadd.f32 %v5265_v56, %v6393_v20  ;;  %v6394_v2 = vld [vmem:[#allocation153_spill] sm:$0xff]  ;;  %v2112_v19 = vadd.f32 %v2080_v44, %v1888_v3  ;;  %v6398_v49 = vld [vmem:[#allocation127_spill] sm:$0xff]  ;;  %v6401_v3 = vld [vmem:[#allocation112_spill] sm:$0xff] }
 0x2f7   : > { %6392 = vst [vmem:[#allocation206_spill] sm:$0xff] %v5273_v10  ;;  %v2305_v58 = vmul.f32 %v5022_v6, %v6394_v2  ;;  %v2116_v63 = vadd.f32 %v2084_v62, %v1892_v34  ;;  %v5286_v48 = vadd.f32 %v2096_v9, %v1904_v8  ;;  %v2301_v40 = vmul.f32 %v5004_v21, %v6398_v49  ;;  %v6402_v44 = vld [vmem:[#allocation151_spill] sm:$0xff]  ;;  %v6407_v8 = vld [vmem:[#allocation150_spill] sm:$0xff] }
 0x2f8   : > { %v5262_v43 = vadd.f32 %v2322_v12, %v2130_v35  ;;  %v6395_v35 = vld [vmem:[#allocation129_spill] sm:$0xff]  ;;  %v6396_v12 = vld [vmem:[#allocation88_spill] sm:$0xff]  ;;  %v5295_v0 = vadd.f32 %v2311_v5, %v6399_v39  ;;  %v2319_v30 = vmul.f32 %v5182_v60, %v5133_v36  ;;  %v5300_v13 = vadd.f32 %v2100_v59, %v6400_v37 }
 0x2f9   : > { %v2315_v54 = vmul.f32 %v5172_v27, %v6395_v35  ;;  %v5290_v15 = vadd.f32 %v2307_v51, %v6396_v12  ;;  %v2104_v34 = vmul.f32 %v5210_v45, %v6401_v3  ;;  %v2304_v62 = vmul.f32 %v5022_v6, %v6402_v44  ;;  %v6412_v44 = vld [vmem:[#allocation155_spill] sm:$0xff] }
 0x2fa   : > { %v2367_v41 = vadd.f32 %v2366_v28, %v5262_v43  ;;  %v5276_v1 = vpop.permute.xlu1 %2023  ;;  %v5308_v21 = vadd.f32 %v2305_v58, %v6403_v23  ;;  %v2099_v36 = vmul.f32 %v5196_v32, %v6406_v33  ;;  %v2309_v53 = vmul.f32 %v6389_v25, %v6407_v8  ;;  %v6410_v58 = vld [vmem:[#allocation114_spill] sm:$0xff] }
 0x2fb   : > { %6397 = vst [vmem:[#allocation24_spill] sm:$0xff] %v5290_v15  ;;  %v2370_v28 = vadd.f32 %v2369_v47, %v5290_v15  ;;  %v5311_v51 = vadd.f32 %v2315_v54, %v6405_v22  ;;  %v6408_v47 = vld [vmem:[#allocation106_spill] sm:$0xff]  ;;  %v2308_v35 = vmul.f32 %v6389_v25, %v6410_v58  ;;  %v2323_v49 = vmul.f32 %v5233_v31, %v5219_v11 }
 0x2fc   : > { %v2368_v29 = vadd.f32 %v2367_v41, %v5273_v10  ;;  %6404 = vst [vmem:[#allocation69_spill] sm:$0xff] %v5308_v21  ;;  %v5327_v2 = vadd.f32 %v2301_v40, %v6408_v47  ;;  %v2131_v25 = vadd.f32 %v2099_v36, %v1907_v14  ;;  %v5349_v11 = vadd.f32 %v2304_v62, %v2112_v19  ;;  %v6414_v47 = vld [vmem:[#allocation108_spill] sm:$0xff] }
 0x2fd   : > { %v2371_v54 = vadd.f32 %v2370_v28, %v5295_v0  ;;  %v2313_v28 = vmul.f32 %v5161_v46, %v6412_v44  ;;  %v5357_v58 = vadd.f32 %v2309_v53, %v6414_v47  ;;  %v2316_v36 = vmul.f32 %v5172_v27, %v5155_v38  ;;  %v6418_v44 = vld [vmem:[#allocation87_spill] sm:$0xff] }
 0x2fe   : > { %v2391_v9 = vmul.f32 0.125, %v2368_v29  ;;  %6409 = vst [vmem:[#allocation89_spill] sm:$0xff] %v5327_v2  ;;  %v6411_v29 = vld [vmem:[#allocation149_spill] sm:$0xff]  ;;  %6413 = vst [vmem:[#allocation152_spill] sm:$0xff] %v5349_v11  ;;  %v2383_v14 = vadd.f32 %v5308_v21, %v5327_v2  ;;  %v5364_v19 = vadd.f32 %v2308_v35, %v2116_v63 }
 0x2ff   : > { %v2232_v5 = vpop.permute.xlu1 %2231  ;;  %v5333_v12 = vadd.f32 %v2319_v30, %v6411_v29  ;;  %v2372_v3 = vadd.f32 %v2371_v54, %v5311_v51  ;;  %v2103_v30 = vmul.f32 %v5210_v45, %v5184_v18  ;;  %6415 = vst [vmem:[#allocation58_spill] sm:$0xff] %v5357_v58  ;;  %v5376_v47 = vadd.f32 %v2313_v28, %v6418_v44 }
 0x300   : > { %v5318_v59 = vsub.f32 %v5168_v57, %v2391_v9  ;;  %v5321_v6 = vsub.f32 %v5035_v4, %v2391_v9  ;;  %v5324_v41 = vsub.f32 %v5049_v61, %v2391_v9  ;;  %v5338_v39 = vsub.f32 %v5213_v24, %v2391_v9  ;;  %6416 = vst [vmem:[#allocation201_spill] sm:$0xff] %v5364_v19 }
 0x301   : > { %v5352_v22 = vsub.f32 %v5227_v17, %v2391_v9  ;;  %v2373_v18 = vadd.f32 %v2372_v3, %v5333_v12  ;;  %v5367_v62 = vsub.f32 %v5238_v52, %v2391_v9  ;;  %6419 = vst [vmem:[#allocation118_spill] sm:$0xff] %v5376_v47  ;;  %v2135_v38 = vadd.f32 %v2103_v30, %v1911_v7  ;;  %v2248_v7 = vpop.permute.xlu0 %2247 }
 0x302   : > { %v2427_v37 = vmul.f32 %v5318_v59, %v5318_v59  ;;  %v2431_v40 = vmul.f32 %v5321_v6, %v5321_v6  ;;  %v2435_v33 = vmul.f32 %v5324_v41, %v5324_v41  ;;  %v2439_v54 = vmul.f32 %v5338_v39, %v5338_v39 }
 0x303   : > { %v2244_v23 = vpop.permute.xlu1 %2243  ;;  %v5379_v63 = vsub.f32 %v5262_v43, %v2391_v9  ;;  %v2443_v35 = vmul.f32 %v5352_v22, %v5352_v22  ;;  %v5390_v28 = vsub.f32 %v5273_v10, %v2391_v9  ;;  %v2447_v30 = vmul.f32 %v5367_v62, %v5367_v62 }
 0x304   : > { %v2459_v8 = vadd.f32 %v2431_v40, %v2427_v37  ;;  %v6417_v37 = vld [vmem:[#allocation148_spill] sm:$0xff]  ;;  %v5373_v40 = vadd.f32 %v2323_v49, %v2131_v25  ;;  %v2321_v49 = vmul.f32 %v5182_v60, %v2232_v5 }
 0x305   : > { %v2312_v53 = vmul.f32 %v5161_v46, %v6417_v37  ;;  %v2384_v46 = vadd.f32 %v2383_v14, %v5357_v58  ;;  %v2101_v14 = vmul.f32 %v5196_v32, %v5276_v1  ;;  %v2451_v37 = vmul.f32 %v5379_v63, %v5379_v63  ;;  %v6428_v32 = vld [vmem:[#allocation85_spill] sm:$0xff] }
 0x306   : > { %v2460_v29 = vadd.f32 %v2459_v8, %v2435_v33  ;;  %v2317_v33 = vmul.f32 %v5172_v27, %v5192_v42  ;;  %v2374_v25 = vadd.f32 %v2373_v18, %v5373_v40  ;;  %v6421_v27 = vld [vmem:[#allocation81_spill] sm:$0xff]  ;;  %v6423_v18 = vld [vmem:[#allocation63_spill] sm:$0xff]  ;;  %v5417_v1 = vadd.f32 %v2316_v36, %v6428_v32 }
 0x307   : > { %v2256_v17 = vpop.permute.xlu1 %2255  ;;  %v5399_v42 = vadd.f32 %v2312_v53, %v6421_v27  ;;  %v2385_v5 = vadd.f32 %v2384_v46, %v5376_v47  ;;  %v2136_v9 = vadd.f32 %v2104_v34, %v6423_v18  ;;  %v6426_v53 = vld [vmem:[#allocation110_spill] sm:$0xff]  ;;  %v2455_v34 = vmul.f32 %v5390_v28, %v5390_v28  ;;  %v2264_v18 = vpop.permute.xlu0 %2263 }
 0x308   : > { %v2461_v3 = vadd.f32 %v2460_v29, %v2439_v54  ;;  %v2327_v52 = vmul.f32 %v5236_v26, %v2256_v17  ;;  %v6420_v17 = vld [vmem:[#allocation146_spill] sm:$0xff]  ;;  %v5413_v27 = vadd.f32 %v2321_v49, %v6426_v53  ;;  %6429 = vst [vmem:[#allocation91_spill] sm:$0xff] %v5417_v1  ;;  %v2329_v53 = vmul.f32 %v5236_v26, %v2264_v18 }
 0x309   : > { %v2376_v29 = vadd.f32 %v5349_v11, %v6420_v17  ;;  %6422 = vst [vmem:[#allocation172_spill] sm:$0xff] %v5399_v42 }
 0x30a   : > { %v2462_v8 = vadd.f32 %v2461_v3, %v2443_v35  ;;  %v5394_v54 = vadd.f32 %v2327_v52, %v2135_v38  ;;  %v6424_v3 = vld [vmem:[#allocation92_spill] sm:$0xff]  ;;  %6427 = vst [vmem:[#allocation191_spill] sm:$0xff] %v5413_v27 }
 0x30b   : > { %v2377_v35 = vadd.f32 %v2376_v29, %v5364_v19  ;;  %v5410_v10 = vadd.f32 %v2317_v33, %v6424_v3  ;;  %v2320_v29 = vmul.f32 %v5182_v60, %v5221_v50  ;;  %v2133_v33 = vadd.f32 %v2101_v14, %v5250_v55 }
 0x30c   : > { %v2463_v44 = vadd.f32 %v2462_v8, %v2447_v30  ;;  %v2375_v52 = vadd.f32 %v2374_v25, %v5394_v54  ;;  %v2040_v38 = vpop.permute.xlu1 %2039  ;;  %v2324_v60 = vmul.f32 %v5233_v31, %v2244_v23 }
 0x30d   : > { %6425 = vst [vmem:[#allocation33_spill] sm:$0xff] %v5410_v10  ;;  %v2105_v46 = vmul.f32 %v5210_v45, %v2040_v38  ;;  %v2378_v25 = vadd.f32 %v2377_v35, %v5399_v42  ;;  %v2386_v49 = vadd.f32 %v2385_v5, %v5410_v10 }
 0x30e   : > { %v2464_v30 = vadd.f32 %v2463_v44, %v2451_v37  ;;  %v2392_v8 = vmul.f32 0.125, %v2375_v52  ;;  %v2325_v44 = vmul.f32 %v5233_v31, %v2248_v7  ;;  %v5448_v7 = vadd.f32 %v2320_v29, %v5286_v48 }
 0x30f   : > { %v2387_v52 = vadd.f32 %v2386_v49, %v5413_v27  ;;  %v2137_v50 = vadd.f32 %v2105_v46, %v5278_v16  ;;  %v2379_v31 = vadd.f32 %v2378_v25, %v5417_v1  ;;  %v5460_v49 = vadd.f32 %v2324_v60, %v5300_v13 }
 0x310   : > { %v2465_v3 = vadd.f32 %v2464_v30, %v2455_v34  ;;  %v5427_v45 = vsub.f32 %v6393_v20, %v2392_v8  ;;  %v5430_v36 = vsub.f32 %v5265_v56, %v2392_v8  ;;  %v5433_v37 = vsub.f32 %v5290_v15, %v2392_v8 }
 0x311   : > { %v5440_v5 = vsub.f32 %v5295_v0, %v2392_v8  ;;  %v2260_v35 = vpop.permute.xlu1 %2259  ;;  %v5451_v23 = vadd.f32 %v2325_v44, %v2133_v33  ;;  %v5454_v46 = vsub.f32 %v5311_v51, %v2392_v8  ;;  %v5462_v18 = vadd.f32 %v2329_v53, %v2137_v50 }
 0x312   : > { %v2488_v55 = vmul.f32 0.14285715, %v2465_v3  ;;  %v2428_v14 = vmul.f32 %v5427_v45, %v5427_v45  ;;  %v2432_v38 = vmul.f32 %v5430_v36, %v5430_v36  ;;  %v2436_v32 = vmul.f32 %v5433_v37, %v5433_v37 }
 0x313   : > { %6430 = vst [vmem:[#allocation154_spill] sm:$0xff] %v5451_v23  ;;  %v2388_v30 = vadd.f32 %v2387_v52, %v5451_v23  ;;  %v2328_v48 = vmul.f32 %v5236_v26, %v2260_v35  ;;  %v5466_v25 = vsub.f32 %v5333_v12, %v2392_v8  ;;  %v2440_v29 = vmul.f32 %v5440_v5, %v5440_v5 }
 0x314   : > { %v2492_v16 = vadd.f32 1e-09, %v2488_v55  ;;  %v2466_v34 = vadd.f32 %v2432_v38, %v2428_v14  ;;  %v2380_v3 = vadd.f32 %v2379_v31, %v5448_v7  ;;  %v2444_v13 = vmul.f32 %v5454_v46, %v5454_v46 }
 0x315   : > { %v2389_v44 = vadd.f32 %v2388_v30, %v5462_v18  ;;  %v5472_v52 = vadd.f32 %v2328_v48, %v2136_v9  ;;  %v5478_v55 = vsub.f32 %v5373_v40, %v2392_v8  ;;  %v2448_v14 = vmul.f32 %v5466_v25, %v5466_v25 }
 0x316   : > { %3070 = vrsqrt.f32 %v2492_v16  ;;  %v2467_v33 = vadd.f32 %v2466_v34, %v2436_v32  ;;  %v2381_v26 = vadd.f32 %v2380_v3, %v5460_v49  ;;  %v5493_v32 = vsub.f32 %v5394_v54, %v2392_v8 }
 0x317   : > { %v2394_v50 = vmul.f32 0.125, %v2389_v44  ;;  %v2452_v48 = vmul.f32 %v5478_v55, %v5478_v55 }
 0x318   : > { %v2468_v60 = vadd.f32 %v2467_v33, %v2440_v29  ;;  %v2382_v31 = vadd.f32 %v2381_v26, %v5472_v52  ;;  %v2456_v8 = vmul.f32 %v5493_v32, %v5493_v32 }
 0x319   : > { %v5483_v35 = vsub.f32 %v5327_v2, %v2394_v50  ;;  %v5486_v9 = vsub.f32 %v5308_v21, %v2394_v50  ;;  %v5489_v53 = vsub.f32 %v5357_v58, %v2394_v50  ;;  %v5502_v29 = vsub.f32 %v5376_v47, %v2394_v50 }
 0x31a   : > { %v2469_v38 = vadd.f32 %v2468_v60, %v2444_v13  ;;  %v2393_v44 = vmul.f32 0.125, %v2382_v31  ;;  %v5509_v26 = vsub.f32 %v5410_v10, %v2394_v50  ;;  %v5520_v31 = vsub.f32 %v5462_v18, %v2394_v50 }
 0x31b   : > { %v2430_v34 = vmul.f32 %v5483_v35, %v5483_v35  ;;  %v2434_v30 = vmul.f32 %v5486_v9, %v5486_v9  ;;  %v2438_v33 = vmul.f32 %v5489_v53, %v5489_v53  ;;  %v2442_v47 = vmul.f32 %v5502_v29, %v5502_v29 }
 0x31c   : > { %v2470_v16 = vadd.f32 %v2469_v38, %v2448_v14  ;;  %v5512_v14 = vsub.f32 %v5413_v27, %v2394_v50  ;;  %v5515_v38 = vsub.f32 %v5451_v23, %v2394_v50  ;;  %v2446_v2 = vmul.f32 %v5509_v26, %v5509_v26 }
 0x31d   : > { %v2480_v3 = vadd.f32 %v2434_v30, %v2430_v34  ;;  %v5552_v10 = vsub.f32 %v5417_v1, %v2393_v44 }
 0x31e   : > { %v2471_v13 = vadd.f32 %v2470_v16, %v2452_v48  ;;  %v5523_v16 = vsub.f32 %v6420_v17, %v2393_v44  ;;  %v2450_v50 = vmul.f32 %v5512_v14, %v5512_v14  ;;  %v2454_v15 = vmul.f32 %v5515_v38, %v5515_v38 }
 0x31f   : > { %v2481_v60 = vadd.f32 %v2480_v3, %v2438_v33  ;;  %v5527_v33 = vsub.f32 %v5349_v11, %v2393_v44 }
 0x320   : > { %v2472_v30 = vadd.f32 %v2471_v13, %v2456_v8  ;;  %v5541_v13 = vsub.f32 %v5364_v19, %v2393_v44 }
 0x321   : > { %v2482_v48 = vadd.f32 %v2481_v60, %v2442_v47  ;;  %v2458_v47 = vmul.f32 %v5520_v31, %v5520_v31  ;;  %v2433_v23 = vmul.f32 %v5527_v33, %v5527_v33 }
 0x322   : > { %v2489_v8 = vmul.f32 0.14285715, %v2472_v30 }
 0x323   : > { %v3071_v58 = vpop.eup %3070  ;;  %v2483_v60 = vadd.f32 %v2482_v48, %v2446_v2 }
 0x324   : > { %v2500_v34 = vmul.f32 %v3071_v58, %v5318_v59  ;;  %v2504_v3 = vmul.f32 %v3071_v58, %v5321_v6  ;;  %v2524_v21 = vmul.f32 %v3071_v58, %v5379_v63  ;;  %v2508_v59 = vmul.f32 %v3071_v58, %v5324_v41 }
 0x325   : > { %v2429_v6 = vmul.f32 %v5523_v16, %v5523_v16  ;;  %v2512_v27 = vmul.f32 %v3071_v58, %v5338_v39  ;;  %v5549_v41 = vsub.f32 %v5399_v42, %v2393_v44  ;;  %v2516_v20 = vmul.f32 %v3071_v58, %v5352_v22 }
 0x326   : > { %v2532_v63 = vmul.f32 0.5, %v2500_v34  ;;  %v2536_v56 = vmul.f32 0.5, %v2504_v3  ;;  %v2556_v19 = vmul.f32 0.5, %v2524_v21  ;;  %v2484_v11 = vadd.f32 %v2483_v60, %v2450_v50 }
 0x327   : > { %v5556_v34 = vsub.f32 %v5448_v7, %v2393_v44  ;;  %v2520_v2 = vmul.f32 %v3071_v58, %v5367_v62  ;;  %v2540_v30 = vmul.f32 0.5, %v2508_v59  ;;  %v2437_v39 = vmul.f32 %v5541_v13, %v5541_v13 }
 0x328   : > { %v2473_v48 = vadd.f32 %v2433_v23, %v2429_v6  ;;  %v2528_v3 = vmul.f32 %v3071_v58, %v5390_v28  ;;  %3072 = vtanh.f32 %v2532_v63  ;;  %v2493_v42 = vadd.f32 1e-09, %v2489_v8 }
 0x329   : > { %v2485_v17 = vadd.f32 %v2484_v11, %v2454_v15  ;;  %v2544_v1 = vmul.f32 0.5, %v2512_v27  ;;  %3074 = vtanh.f32 %v2536_v56  ;;  %v2441_v21 = vmul.f32 %v5549_v41, %v5549_v41 }
 0x32a   : > { %v2474_v22 = vadd.f32 %v2473_v48, %v2437_v39  ;;  %v2548_v50 = vmul.f32 0.5, %v2516_v20  ;;  %3076 = vtanh.f32 %v2556_v19  ;;  %v5565_v62 = vsub.f32 %v5460_v49, %v2393_v44 }
 0x32b   : > { %v2486_v60 = vadd.f32 %v2485_v17, %v2458_v47  ;;  %v2552_v59 = vmul.f32 0.5, %v2520_v2  ;;  %3078 = vtanh.f32 %v2540_v30  ;;  %v2445_v58 = vmul.f32 %v5552_v10, %v5552_v10 }
 0x32c   : > { %v2475_v28 = vadd.f32 %v2474_v22, %v2441_v21  ;;  %3080 = vrsqrt.f32 %v2493_v42  ;;  %v5570_v56 = vsub.f32 %v5472_v52, %v2393_v44  ;;  %v2560_v11 = vmul.f32 0.5, %v2528_v3 }
 0x32d   : > { %v2491_v15 = vmul.f32 0.14285715, %v2486_v60  ;;  %3082 = vtanh.f32 %v2544_v1  ;;  %v2449_v20 = vmul.f32 %v5556_v34, %v5556_v34  ;;  %v2453_v27 = vmul.f32 %v5565_v62, %v5565_v62 }
 0x32e   : > { %v2476_v19 = vadd.f32 %v2475_v28, %v2445_v58  ;;  %3084 = vtanh.f32 %v2548_v50  ;;  %v2457_v42 = vmul.f32 %v5570_v56, %v5570_v56 }
 0x32f   : > { %v2495_v17 = vadd.f32 1e-09, %v2491_v15  ;;  %3086 = vtanh.f32 %v2552_v59 }
 0x330   : > { %v2477_v23 = vadd.f32 %v2476_v19, %v2449_v20 }
 0x331   : > { %3088 = vrsqrt.f32 %v2495_v17 }
 0x332   : > { %3090 = vtanh.f32 %v2560_v11  ;;  %v2478_v1 = vadd.f32 %v2477_v23, %v2453_v27 }
 0x334   : > { %v2479_v44 = vadd.f32 %v2478_v1, %v2457_v42 }
 0x335   : > { %v3073_v47 = vpop.eup %3072 }
 0x336   : > { %v2490_v6 = vmul.f32 0.14285715, %v2479_v44  ;;  %v3075_v63 = vpop.eup %3074  ;;  %v2596_v48 = vadd.f32 1.0, %v3073_v47  ;;  %v5598_v47 = vstv %s5576_s17 }
 0x337   : > { %v3077_v8 = vpop.eup %3076  ;;  %v2600_v60 = vadd.f32 1.0, %v3075_v63 }
 0x338   : > { %v2494_v2 = vadd.f32 1e-09, %v2490_v6  ;;  %v3079_v30 = vpop.eup %3078  ;;  %v2620_v39 = vadd.f32 1.0, %v3077_v8  ;;  %v2628_v27 = vmul.f32 0.5, %v2596_v48 }
 0x339   : > { %v5580_v3 = vpop.eup %3080  ;;  %v2604_v11 = vadd.f32 1.0, %v3079_v30  ;;  %v2632_v6 = vmul.f32 0.5, %v2600_v60 }
 0x33a   : > { %3092 = vrsqrt.f32 %v2494_v2  ;;  %v3083_v21 = vpop.eup %3082  ;;  %v2513_v22 = vmul.f32 %v5580_v3, %v5440_v5  ;;  %v2517_v50 = vmul.f32 %v5580_v3, %v5454_v46  ;;  %v2521_v58 = vmul.f32 %v5580_v3, %v5466_v25 }
 0x33b   : > { %v3085_v59 = vpop.eup %3084  ;;  %v2525_v28 = vmul.f32 %v5580_v3, %v5478_v55  ;;  %v2529_v15 = vmul.f32 %v5580_v3, %v5493_v32  ;;  %v2652_v19 = vmul.f32 0.5, %v2620_v39  ;;  %v5595_v46 = vstv %s2660_s20 }
 0x33c   : > { %v3087_v20 = vpop.eup %3086  ;;  %v2545_v17 = vmul.f32 0.5, %v2513_v22  ;;  %v2549_v5 = vmul.f32 0.5, %v2517_v50  ;;  %v2608_v42 = vadd.f32 1.0, %v3083_v21  ;;  %v2553_v1 = vmul.f32 0.5, %v2521_v58 }
 0x33d   : > { %v2557_v44 = vmul.f32 0.5, %v2525_v28  ;;  %v2561_v55 = vmul.f32 0.5, %v2529_v15  ;;  %v2612_v32 = vadd.f32 1.0, %v3085_v59  ;;  %v2636_v8 = vmul.f32 0.5, %v2604_v11 }
 0x33e   : > { %v5593_v23 = vpop.eup %3088  ;;  %3094 = vtanh.f32 %v2545_v17  ;;  %v2616_v2 = vadd.f32 1.0, %v3087_v20  ;;  %v2686_v30 = vmul.f32 %v5595_v46, %v2652_v19  ;;  %v2662_v39 = vmul.f32 %v5595_v46, %v2628_v27 }
 0x33f   : > { %v3091_v25 = vpop.eup %3090  ;;  %3096 = vtanh.f32 %v2549_v5  ;;  %v2531_v63 = vmul.f32 %v5593_v23, %v5520_v31  ;;  %v2509_v21 = vmul.f32 %v5580_v3, %v5433_v37  ;;  %v2640_v22 = vmul.f32 0.5, %v2608_v42 }
 0x340   : > { %3098 = vtanh.f32 %v2553_v1  ;;  %v2624_v48 = vadd.f32 1.0, %v3091_v25  ;;  %v2644_v60 = vmul.f32 0.5, %v2612_v32  ;;  %v2666_v59 = vmul.f32 %v5595_v46, %v2632_v6 }
 0x341   : > { %3100 = vtanh.f32 %v2557_v44  ;;  %v2563_v50 = vmul.f32 0.5, %v2531_v63  ;;  %v5608_v31 = vmul.f32 %v5595_v46, %v2636_v8  ;;  %v2648_v58 = vmul.f32 0.5, %v2616_v2 }
 0x342   : > { %3102 = vtanh.f32 %v2561_v55  ;;  %v2719_v28 = vadd.f32 %v5598_v47, %v2686_v30  ;;  %v2519_v15 = vmul.f32 %v5593_v23, %v5509_v26  ;;  %v5614_v11 = vadd.f32 %v5598_v47, %v2662_v39 }
 0x343   : > { %v2656_v37 = vmul.f32 0.5, %v2624_v48  ;;  %v5616_v20 = vmul.f32 0.5, %v2509_v21  ;;  %v2501_v19 = vmul.f32 %v5580_v3, %v5427_v45  ;;  %v5621_v17 = vmul.f32 %v5595_v46, %v2640_v22 }
 0x344   : > { %v5625_v27 = vmul.f32 %v5593_v23, %v5502_v29  ;;  %v2523_v26 = vmul.f32 %v5593_v23, %v5512_v14  ;;  %v2527_v42 = vmul.f32 %v5593_v23, %v5515_v38  ;;  %3104 = vtanh.f32 %v2563_v50 }
 0x345   : > { %v5636_v55 = vmul.f32 %v2719_v28, %v5262_v43  ;;  %v2551_v29 = vmul.f32 0.5, %v2519_v15  ;;  %v2533_v30 = vmul.f32 0.5, %v2501_v19  ;;  %v2678_v48 = vmul.f32 %v5595_v46, %v2644_v60 }
 0x346   : > { %v2690_v19 = vmul.f32 %v5595_v46, %v2656_v37 }
 0x347   : > { %v3093_v5 = vpop.eup %3092 }
 0x348   : > { %v2502_v1 = vmul.f32 %v3093_v5, %v5523_v16  ;;  %v2506_v44 = vmul.f32 %v3093_v5, %v5527_v33  ;;  %v2510_v45 = vmul.f32 %v3093_v5, %v5541_v13  ;;  %v2514_v25 = vmul.f32 %v3093_v5, %v5549_v41 }
 0x349   : > { %v2518_v6 = vmul.f32 %v3093_v5, %v5552_v10  ;;  %v2522_v14 = vmul.f32 %v3093_v5, %v5556_v34  ;;  %v2526_v32 = vmul.f32 %v3093_v5, %v5565_v62  ;;  %v5641_v16 = vmul.f32 0.5, %v2523_v26 }
 0x34a   : > { %v2534_v38 = vmul.f32 0.5, %v2502_v1  ;;  %v2538_v63 = vmul.f32 0.5, %v2506_v44  ;;  %v2542_v8 = vmul.f32 0.5, %v2510_v45  ;;  %v5643_v33 = vmul.f32 0.5, %v2527_v42 }
 0x34b   : > { %v2530_v13 = vmul.f32 %v3093_v5, %v5570_v56  ;;  %v2546_v41 = vmul.f32 0.5, %v2514_v25  ;;  %v3095_v2 = vpop.eup %3094  ;;  %v2550_v43 = vmul.f32 0.5, %v2518_v6  ;;  %v2505_v10 = vmul.f32 %v5580_v3, %v5430_v36 }
 0x34c   : > { %3106 = vtanh.f32 %v2534_v38  ;;  %v3097_v34 = vpop.eup %3096  ;;  %v2554_v39 = vmul.f32 0.5, %v2522_v14  ;;  %v2609_v62 = vadd.f32 1.0, %v3095_v2  ;;  %v2558_v22 = vmul.f32 0.5, %v2526_v32 }
 0x34d   : > { %3108 = vtanh.f32 %v2538_v63  ;;  %v3099_v21 = vpop.eup %3098  ;;  %v2613_v50 = vadd.f32 1.0, %v3097_v34  ;;  %v2682_v56 = vmul.f32 %v5595_v46, %v2648_v58  ;;  %v2562_v15 = vmul.f32 0.5, %v2530_v13 }
 0x34e   : > { %3110 = vtanh.f32 %v2542_v8  ;;  %v3101_v28 = vpop.eup %3100  ;;  %v2617_v5 = vadd.f32 1.0, %v3099_v21  ;;  %v2641_v26 = vmul.f32 0.5, %v2609_v62  ;;  %v2699_v44 = vadd.f32 %v5598_v47, %v2666_v59 }
 0x34f   : > { %3112 = vtanh.f32 %v2546_v41  ;;  %v3103_v42 = vpop.eup %3102  ;;  %v2621_v36 = vadd.f32 1.0, %v3101_v28  ;;  %v2645_v3 = vmul.f32 0.5, %v2613_v50  ;;  %v2537_v14 = vmul.f32 0.5, %v2505_v10  ;;  %v6433_v28 = vld [vmem:[#allocation206_spill] sm:$0xff] }
 0x350   : > { %3114 = vtanh.f32 %v2550_v43  ;;  %v2625_v1 = vadd.f32 1.0, %v3103_v42  ;;  %v2649_v60 = vmul.f32 0.5, %v2617_v5  ;;  %v2675_v58 = vmul.f32 %v5595_v46, %v2641_v26  ;;  %v5689_v42 = vpop.permute.xlu0 %2766 }
 0x351   : > { %3116 = vtanh.f32 %v2554_v39  ;;  %v2653_v45 = vmul.f32 0.5, %v2621_v36  ;;  %v2679_v25 = vmul.f32 %v5595_v46, %v2645_v3  ;;  %v2703_v32 = vadd.f32 %v5598_v47, %v5608_v31  ;;  %v3105_v38 = vpop.eup %3104  ;;  %v2762_v39 = vpop.permute.xlu1 %2761 }
 0x352   : > { %3118 = vtanh.f32 %v2558_v22  ;;  %v2657_v6 = vmul.f32 0.5, %v2625_v1  ;;  %v2683_v37 = vmul.f32 %v5595_v46, %v2649_v60  ;;  %v2707_v59 = vadd.f32 %v5598_v47, %v5621_v17  ;;  %v6432_v22 = vld [vmem:[#allocation170_spill] sm:$0xff] }
 0x353   : > { %3120 = vtanh.f32 %v2562_v15  ;;  %v2687_v63 = vmul.f32 %v5595_v46, %v2653_v45  ;;  %v2711_v8 = vadd.f32 %v5598_v47, %v2678_v48  ;;  %v2715_v13 = vadd.f32 %v5598_v47, %v2682_v56 }
 0x354   : > { %3122 = vtanh.f32 %v2551_v29  ;;  %v2723_v41 = vadd.f32 %v5598_v47, %v2690_v19  ;;  %v2727_v2 = vmul.f32 %v5614_v11, %v5168_v57  ;;  %v2708_v31 = vadd.f32 %v5598_v47, %v2675_v58 }
 0x355   : > { %3124 = vtanh.f32 %v2533_v30  ;;  %v2712_v29 = vadd.f32 %v5598_v47, %v2679_v25  ;;  %v2731_v43 = vmul.f32 %v2699_v44, %v5035_v4  ;;  %v2691_v10 = vmul.f32 %v5595_v46, %v2657_v6  ;;  %v6431_v4 = vld [vmem:[#allocation116_spill] sm:$0xff] }
 0x356   : > { %v2627_v34 = vadd.f32 1.0, %v3105_v38  ;;  %3126 = vtanh.f32 %v2537_v14  ;;  %v2735_v17 = vmul.f32 %v2703_v32, %v5049_v61  ;;  %v2716_v62 = vadd.f32 %v5598_v47, %v2683_v37 }
 0x357   : > { %3128 = vtanh.f32 %v5616_v20  ;;  %v2720_v57 = vadd.f32 %v5598_v47, %v2687_v63  ;;  %v2739_v11 = vmul.f32 %v2707_v59, %v5213_v24  ;;  %v5675_v48 = vmul.f32 0.5, %v5625_v27 }
 0x358   : > { %3130 = vtanh.f32 %v5641_v16  ;;  %v2743_v21 = vmul.f32 %v2711_v8, %v6431_v4  ;;  %v2747_v50 = vmul.f32 %v2715_v13, %v6432_v22  ;;  %v2740_v20 = vmul.f32 %v2708_v31, %v5295_v0 }
 0x359   : > { %v3107_v30 = vpop.eup %3106  ;;  %3132 = vtanh.f32 %v5643_v33  ;;  %v2744_v56 = vmul.f32 %v2712_v29, %v5311_v51  ;;  %v2755_v15 = vmul.f32 %v2723_v41, %v6433_v28  ;;  %v2724_v5 = vadd.f32 %v5598_v47, %v2691_v10 }
 0x35a   : > { %v3109_v61 = vpop.eup %3108  ;;  %v2659_v27 = vmul.f32 0.5, %v2627_v34  ;;  %v5685_v26 = vmul.f32 %v2762_v39, %v2727_v2  ;;  %v5687_v16 = vmul.f32 %v2762_v39, %v2731_v43  ;;  %v2748_v3 = vmul.f32 %v2716_v62, %v5333_v12 }
 0x35b   : > { %v3111_v24 = vpop.eup %3110  ;;  %v2752_v33 = vmul.f32 %v2720_v57, %v5373_v40  ;;  %v5693_v0 = vmul.f32 %v2762_v39, %v2735_v17  ;;  %v2791_v51 = vmul.f32 %v2762_v39, %v2739_v11  ;;  %v2598_v1 = vadd.f32 1.0, %v3107_v30 }
 0x35c   : > { %v3113_v36 = vpop.eup %3112  ;;  %v2795_v60 = vmul.f32 %v2762_v39, %v2743_v21  ;;  %v2799_v44 = vmul.f32 %v2762_v39, %v2747_v50  ;;  %v2803_v45 = vmul.f32 %v2762_v39, %v5636_v55  ;;  %v5696_v6 = vmul.f32 %v2762_v39, %v2755_v15 }
 0x35d   : > { %v3115_v19 = vpop.eup %3114  ;;  %v2792_v14 = vmul.f32 %v5689_v42, %v2740_v20  ;;  %v2796_v32 = vmul.f32 %v5689_v42, %v2744_v56  ;;  %v2756_v40 = vmul.f32 %v2724_v5, %v5394_v54  ;;  %v2693_v38 = vmul.f32 %v5595_v46, %v2659_v27 }
 0x35e   : > { %v3117_v58 = vpop.eup %3116  ;;  %v2614_v25 = vadd.f32 1.0, %v3115_v19  ;;  %v2503_v63 = vmul.f32 %v5593_v23, %v5483_v35  ;;  %v2602_v55 = vadd.f32 1.0, %v3109_v61  ;;  %v2800_v13 = vmul.f32 %v5689_v42, %v2748_v3 }
 0x35f   : > { %v3119_v12 = vpop.eup %3118  ;;  %v2618_v37 = vadd.f32 1.0, %v3117_v58  ;;  %v2804_v41 = vmul.f32 %v5689_v42, %v2752_v33  ;;  %v2606_v29 = vadd.f32 1.0, %v3111_v24  ;;  %v2630_v43 = vmul.f32 0.5, %v2598_v1 }
 0x360   : > { %v3121_v59 = vpop.eup %3120  ;;  %v2622_v8 = vadd.f32 1.0, %v3119_v12  ;;  %v2507_v54 = vmul.f32 %v5593_v23, %v5486_v9  ;;  %v2610_v34 = vadd.f32 1.0, %v3113_v36  ;;  %v2646_v17 = vmul.f32 0.5, %v2614_v25 }
 0x361   : > { %v3123_v2 = vpop.eup %3122  ;;  %v2626_v31 = vadd.f32 1.0, %v3121_v59  ;;  %v2650_v10 = vmul.f32 0.5, %v2618_v37  ;;  %v5708_v39 = vadd.f32 %v2792_v14, %v2791_v51  ;;  %v2726_v62 = vadd.f32 %v5598_v47, %v2693_v38 }
 0x362   : > { %v3125_v35 = vpop.eup %3124  ;;  %v2654_v57 = vmul.f32 0.5, %v2622_v8  ;;  %v5712_v11 = vmul.f32 %v5689_v42, %v2756_v40  ;;  %v5714_v30 = vadd.f32 %v2796_v32, %v2795_v60  ;;  %v2634_v22 = vmul.f32 0.5, %v2602_v55 }
 0x363   : > { %v3127_v4 = vpop.eup %3126  ;;  %v2658_v21 = vmul.f32 0.5, %v2626_v31  ;;  %v5716_v50 = vadd.f32 %v2800_v13, %v2799_v44  ;;  %v5718_v9 = vadd.f32 %v2804_v41, %v2803_v45  ;;  %v2638_v20 = vmul.f32 0.5, %v2606_v29 }
 0x364   : > { %v3129_v61 = vpop.eup %3128  ;;  %v2664_v56 = vmul.f32 %v5595_v46, %v2630_v43  ;;  %v2511_v28 = vmul.f32 %v5593_v23, %v5489_v53  ;;  %v2535_v15 = vmul.f32 0.5, %v2503_v63  ;;  %v2642_v5 = vmul.f32 0.5, %v2610_v34 }
 0x365   : > { %v3131_v24 = vpop.eup %3130  ;;  %v2680_v27 = vmul.f32 %v5595_v46, %v2646_v17  ;;  %v2684_v36 = vmul.f32 %v5595_v46, %v2650_v10  ;;  %v2597_v3 = vadd.f32 1.0, %v3125_v35  ;;  %v5726_v51 = vmul.f32 %v2726_v62, %v5462_v18 }
 0x366   : > { %v3133_v33 = vpop.eup %3132  ;;  %v2688_v19 = vmul.f32 %v5595_v46, %v2654_v57  ;;  %v2601_v1 = vadd.f32 1.0, %v3127_v4  ;;  %v2539_v60 = vmul.f32 0.5, %v2507_v54  ;;  %v2692_v44 = vmul.f32 %v5595_v46, %v2658_v21  ;;  %v6434_v54 = vld [vmem:[#allocation91_spill] sm:$0xff]  ;;  %v2772_v57 = vpop.permute.xlu1 %2771  ;;  %v6435_v4 = vld [vmem:[#allocation146_spill] sm:$0xff] }
 0x367   : > { %v2668_v53 = vmul.f32 %v5595_v46, %v2634_v22  ;;  %v2605_v23 = vadd.f32 1.0, %v3129_v61  ;;  %v2629_v45 = vmul.f32 0.5, %v2597_v3  ;;  %v2672_v58 = vmul.f32 %v5595_v46, %v2638_v20 }
 0x368   : > { %v2697_v25 = vadd.f32 %v5598_v47, %v2664_v56  ;;  %v2633_v14 = vmul.f32 0.5, %v2601_v1  ;;  %v2543_v32 = vmul.f32 0.5, %v2511_v28  ;;  %v2676_v12 = vmul.f32 %v5595_v46, %v2642_v5 }
 0x369   : > { %v2713_v18 = vadd.f32 %v5598_v47, %v2680_v27  ;;  %v2717_v40 = vadd.f32 %v5598_v47, %v2684_v36  ;;  %3134 = vtanh.f32 %v2535_v15  ;;  %v2721_v38 = vadd.f32 %v5598_v47, %v2688_v19 }
 0x36a   : > { %v2637_v37 = vmul.f32 0.5, %v2605_v23  ;;  %3136 = vtanh.f32 %v2539_v60  ;;  %v2615_v63 = vadd.f32 1.0, %v3123_v2  ;;  %v2725_v59 = vadd.f32 %v5598_v47, %v2692_v44  ;;  %v6438_v60 = vld [vmem:[#allocation125_spill] sm:$0xff] }
 0x36b   : > { %v2663_v8 = vmul.f32 %v5595_v46, %v2629_v45  ;;  %3138 = vtanh.f32 %v2543_v32  ;;  %v2619_v55 = vadd.f32 1.0, %v3131_v24  ;;  %v2667_v13 = vmul.f32 %v5595_v46, %v2633_v14  ;;  %v6436_v24 = vld [vmem:[#allocation152_spill] sm:$0xff]  ;;  %v6439_v23 = vld [vmem:[#allocation33_spill] sm:$0xff] }
 0x36c   : > { %3140 = vtanh.f32 %v5675_v48  ;;  %v2623_v41 = vadd.f32 1.0, %v3133_v33  ;;  %v2647_v31 = vmul.f32 0.5, %v2615_v63  ;;  %v2701_v29 = vadd.f32 %v5598_v47, %v2668_v53  ;;  %v6440_v14 = vld [vmem:[#allocation208_spill] sm:$0xff]  ;;  %v2777_v63 = vpop.permute.xlu1 %2776 }
 0x36d   : > { %v2705_v43 = vadd.f32 %v5598_v47, %v2672_v58  ;;  %v2745_v10 = vmul.f32 %v2713_v18, %v6434_v54  ;;  %v2651_v34 = vmul.f32 0.5, %v2619_v55  ;;  %v2749_v2 = vmul.f32 %v2717_v40, %v5448_v7  ;;  %v6442_v40 = vld [vmem:[#allocation172_spill] sm:$0xff] }
 0x36e   : > { %v2671_v17 = vmul.f32 %v5595_v46, %v2637_v37  ;;  %v2655_v35 = vmul.f32 0.5, %v2623_v41  ;;  %v2681_v62 = vmul.f32 %v5595_v46, %v2647_v31  ;;  %v2729_v21 = vmul.f32 %v2697_v25, %v6435_v4  ;;  %v6444_v31 = vld [vmem:[#allocation24_spill] sm:$0xff] }
 0x36f   : > { %v2753_v48 = vmul.f32 %v2721_v38, %v5460_v49  ;;  %v2696_v22 = vadd.f32 %v5598_v47, %v2663_v8  ;;  %v2685_v61 = vmul.f32 %v5595_v46, %v2651_v34  ;;  %v2757_v20 = vmul.f32 %v2725_v59, %v5472_v52  ;;  %v6437_v49 = vld [vmem:[#allocation201_spill] sm:$0xff]  ;;  %v6443_v59 = vld [vmem:[#allocation154_spill] sm:$0xff] }
 0x370   : > { %v2700_v56 = vadd.f32 %v5598_v47, %v2667_v13  ;;  %v2689_v7 = vmul.f32 %v5595_v46, %v2655_v35  ;;  %v2714_v28 = vadd.f32 %v5598_v47, %v2681_v62  ;;  %v2709_v15 = vadd.f32 %v5598_v47, %v2676_v12  ;;  %v6441_v12 = vld [vmem:[#allocation191_spill] sm:$0xff] }
 0x371   : > { %v2733_v5 = vmul.f32 %v2701_v29, %v6436_v24  ;;  %v2797_v27 = vmul.f32 %v2772_v57, %v2745_v10  ;;  %v2718_v36 = vadd.f32 %v5598_v47, %v2685_v61  ;;  %v2737_v3 = vmul.f32 %v2705_v43, %v6437_v49 }
 0x372   : > { %v2801_v33 = vmul.f32 %v2772_v57, %v2749_v2  ;;  %v2704_v19 = vadd.f32 %v5598_v47, %v2671_v17  ;;  %v2722_v52 = vadd.f32 %v5598_v47, %v2689_v7  ;;  %v2805_v1 = vmul.f32 %v2772_v57, %v2753_v48 }
 0x373   : > { %v2728_v44 = vmul.f32 %v2696_v22, %v6438_v60  ;;  %v2874_v53 = vadd.f32 %v5712_v11, %v5696_v6  ;;  %v2746_v45 = vmul.f32 %v2714_v28, %v6439_v23  ;;  %v2781_v58 = vmul.f32 %v2772_v57, %v2729_v21 }
 0x374   : > { %v2809_v25 = vmul.f32 %v2772_v57, %v2757_v20  ;;  %v2732_v32 = vmul.f32 %v2700_v56, %v6440_v14  ;;  %v2750_v18 = vmul.f32 %v2718_v36, %v6441_v12  ;;  %v2741_v38 = vmul.f32 %v2709_v15, %v6442_v40 }
 0x375   : > { %v2785_v37 = vmul.f32 %v2772_v57, %v2733_v5  ;;  %v2754_v8 = vmul.f32 %v2722_v52, %v6443_v59  ;;  %v2848_v55 = vadd.f32 %v5714_v30, %v2797_v27  ;;  %v2789_v41 = vmul.f32 %v2772_v57, %v2737_v3  ;;  %v6448_v59 = vld [vmem:[#allocation118_spill] sm:$0xff] }
 0x376   : > { %v3135_v13 = vpop.eup %3134  ;;  %v2736_v6 = vmul.f32 %v2704_v19, %v6444_v31  ;;  %v2810_v11 = vmul.f32 %v2777_v63, %v5726_v51  ;;  %v2857_v29 = vadd.f32 %v5716_v50, %v2801_v33  ;;  %v2780_v54 = vmul.f32 %v5689_v42, %v2728_v44  ;;  %v6445_v44 = vld [vmem:[#allocation89_spill] sm:$0xff] }
 0x377   : > { %v3137_v43 = vpop.eup %3136  ;;  %v2599_v10 = vadd.f32 1.0, %v3135_v13  ;;  %v2798_v34 = vmul.f32 %v2777_v63, %v2746_v45  ;;  %v2866_v2 = vadd.f32 %v5718_v9, %v2805_v1  ;;  %v2784_v35 = vmul.f32 %v5689_v42, %v2732_v32 }
 0x378   : > { %v3139_v17 = vpop.eup %3138  ;;  %v2603_v62 = vadd.f32 1.0, %v3137_v43  ;;  %v2802_v30 = vmul.f32 %v2777_v63, %v2750_v18  ;;  %v2875_v4 = vadd.f32 %v2874_v53, %v2809_v25  ;;  %v2806_v61 = vmul.f32 %v2777_v63, %v2754_v8  ;;  %v6446_v25 = vld [vmem:[#allocation69_spill] sm:$0xff]  ;;  %v6447_v18 = vld [vmem:[#allocation58_spill] sm:$0xff] }
 0x379   : > { %v3141_v21 = vpop.eup %3140  ;;  %v2607_v48 = vadd.f32 1.0, %v3139_v17  ;;  %v2631_v22 = vmul.f32 0.5, %v2599_v10  ;;  %v2849_v51 = vadd.f32 %v2848_v55, %v2798_v34  ;;  %v2788_v50 = vmul.f32 %v5689_v42, %v2736_v6 }
 0x37a   : > { %v2611_v20 = vadd.f32 1.0, %v3141_v21  ;;  %v2635_v56 = vmul.f32 0.5, %v2603_v62  ;;  %v2858_v7 = vadd.f32 %v2857_v29, %v2802_v30  ;;  %v2793_v28 = vmul.f32 %v2772_v57, %v2741_v38 }
 0x37b   : > { %v2639_v15 = vmul.f32 0.5, %v2607_v48  ;;  %v2665_v9 = vmul.f32 %v5595_v46, %v2631_v22  ;;  %v2867_v24 = vadd.f32 %v2866_v2, %v2806_v61  ;;  %v2811_v5 = vadd.f32 %v2780_v54, %v5685_v26 }
 0x37c   : > { %v2643_v27 = vmul.f32 0.5, %v2611_v20  ;;  %v2669_v36 = vmul.f32 %v5595_v46, %v2635_v56  ;;  %v2876_v49 = vadd.f32 %v2875_v4, %v2810_v11  ;;  %v2820_v3 = vadd.f32 %v2784_v35, %v5687_v16 }
 0x37d   : > { %v2673_v33 = vmul.f32 %v5595_v46, %v2639_v15  ;;  %v2698_v42 = vadd.f32 %v5598_v47, %v2665_v9  ;;  %v2850_v19 = vrot.slane %v2849_v51, 4  ;;  %v2829_v52 = vadd.f32 %v2788_v50, %v5693_v0 }
 0x37e   : > { %v2677_v57 = vmul.f32 %v5595_v46, %v2643_v27  ;;  %v2702_v1 = vadd.f32 %v5598_v47, %v2669_v36  ;;  %v2859_v60 = vrot.slane %v2858_v7, 4  ;;  %v2812_v23 = vadd.f32 %v2811_v5, %v2781_v58 }
 0x37f   : > { %v2706_v26 = vadd.f32 %v5598_v47, %v2673_v33  ;;  %v2730_v53 = vmul.f32 %v2698_v42, %v6445_v44  ;;  %v2868_v45 = vrot.slane %v2867_v24, 4  ;;  %v2821_v32 = vadd.f32 %v2820_v3, %v2785_v37 }
 0x380   : > { %v2710_v16 = vadd.f32 %v5598_v47, %v2677_v57  ;;  %v2734_v14 = vmul.f32 %v2702_v1, %v6446_v25  ;;  %v2877_v12 = vrot.slane %v2876_v49, 4  ;;  %v2830_v38 = vadd.f32 %v2829_v52, %v2789_v41 }
 0x381   : > { %v2738_v40 = vmul.f32 %v2706_v26, %v6447_v18  ;;  %v2782_v0 = vmul.f32 %v2777_v63, %v2730_v53  ;;  %v2851_v46 = vadd.f32 %v2850_v19, %v2849_v51  ;;  %v2839_v13 = vadd.f32 %v5708_v39, %v2793_v28 }
 0x382   : > { %v2742_v8 = vmul.f32 %v2710_v16, %v6448_v59  ;;  %v2786_v55 = vmul.f32 %v2777_v63, %v2734_v14  ;;  %v2860_v31 = vadd.f32 %v2859_v60, %v2858_v7  ;;  %v2869_v11 = vadd.f32 %v2868_v45, %v2867_v24 }
 0x383   : > { %v2790_v6 = vmul.f32 %v2777_v63, %v2738_v40  ;;  %v2813_v58 = vadd.f32 %v2812_v23, %v2782_v0  ;;  %v2878_v43 = vadd.f32 %v2877_v12, %v2876_v49  ;;  %v2852_v10 = vrot.slane %v2851_v46, 2 }
 0x384   : > { %v2794_v29 = vmul.f32 %v2777_v63, %v2742_v8  ;;  %v2822_v47 = vadd.f32 %v2821_v32, %v2786_v55  ;;  %v2861_v41 = vrot.slane %v2860_v31, 2  ;;  %v2870_v62 = vrot.slane %v2869_v11, 2 }
 0x385   : > { %v2814_v54 = vrot.slane %v2813_v58, 4  ;;  %v2831_v37 = vadd.f32 %v2830_v38, %v2790_v6  ;;  %v2879_v4 = vrot.slane %v2878_v43, 2  ;;  %v2853_v22 = vadd.f32 %v2852_v10, %v2851_v46 }
 0x386   : > { %v2823_v34 = vrot.slane %v2822_v47, 4  ;;  %v2840_v2 = vadd.f32 %v2839_v13, %v2794_v29  ;;  %v2862_v51 = vadd.f32 %v2861_v41, %v2860_v31  ;;  %v2871_v56 = vadd.f32 %v2870_v62, %v2869_v11 }
 0x387   : > { %v2815_v17 = vadd.f32 %v2814_v54, %v2813_v58  ;;  %v2832_v35 = vrot.slane %v2831_v37, 4  ;;  %v2880_v15 = vadd.f32 %v2879_v4, %v2878_v43  ;;  %v2854_v5 = vrot.slane %v2853_v22, 1 }
 0x388   : > { %v2824_v30 = vadd.f32 %v2823_v34, %v2822_v47  ;;  %v2841_v39 = vrot.slane %v2840_v2, 4  ;;  %v2883_v27 = vstv %s2998_s23  ;;  %v2863_v3 = vrot.slane %v2862_v51, 1 }
 0x389   : > { %v2816_v21 = vrot.slane %v2815_v17, 2  ;;  %v2833_v48 = vadd.f32 %v2832_v35, %v2831_v37  ;;  %v2872_v19 = vrot.slane %v2871_v56, 1  ;;  %v2881_v1 = vrot.slane %v2880_v15, 1 }
 0x38a   : > { %v2825_v63 = vrot.slane %v2824_v30, 2  ;;  %v2842_v61 = vadd.f32 %v2841_v39, %v2840_v2  ;;  %v2855_v26 = vadd.f32 %v2854_v5, %v2853_v22  ;;  %v2864_v23 = vadd.f32 %v2863_v3, %v2862_v51 }
 0x38b   : > { %v2817_v50 = vadd.f32 %v2816_v21, %v2815_v17  ;;  %v2834_v20 = vrot.slane %v2833_v48, 2  ;;  %v2873_v16 = vadd.f32 %v2872_v19, %v2871_v56  ;;  %v2882_v14 = vadd.f32 %v2881_v1, %v2880_v15 }
 0x38c   : > { %v2826_v7 = vadd.f32 %v2825_v63, %v2824_v30  ;;  %v2843_v28 = vrot.slane %v2842_v61, 2  ;;  %v2888_v18 = vadd.f32 %v2883_v27, %v2855_v26  ;;  %v2889_v0 = vadd.f32 %v2883_v27, %v2864_v23 }
 0x38d   : > { %v2818_v9 = vrot.slane %v2817_v50, 1  ;;  %v2835_v24 = vadd.f32 %v2834_v20, %v2833_v48  ;;  %v2890_v46 = vadd.f32 %v2883_v27, %v2873_v16  ;;  %v2891_v8 = vadd.f32 %v2883_v27, %v2882_v14 }
 0x38e   : > { %v2827_v36 = vrot.slane %v2826_v7, 1  ;;  %v2844_v49 = vadd.f32 %v2843_v28, %v2842_v61 }
 0x38f   : > { %v2819_v33 = vadd.f32 %v2818_v9, %v2817_v50  ;;  %v2836_v42 = vrot.slane %v2835_v24, 1 }
 0x390   : > { %v2828_v52 = vadd.f32 %v2827_v36, %v2826_v7  ;;  %v2845_v57 = vrot.slane %v2844_v49, 1 }
 0x391   : > { %v2837_v60 = vadd.f32 %v2836_v42, %v2835_v24  ;;  %v2884_v44 = vadd.f32 %v2883_v27, %v2819_v33 }
 0x392   : > { %v2846_v53 = vadd.f32 %v2845_v57, %v2844_v49  ;;  %v2885_v45 = vadd.f32 %v2883_v27, %v2828_v52 }
 0x393   : > { %v2886_v25 = vadd.f32 %v2883_v27, %v2837_v60 }
 0x394   : > { %v2887_v32 = vadd.f32 %v2883_v27, %v2846_v53  ;;  %v2901_v12 = vsel %vm2900_vm0, %v2885_v45, %v2884_v44 }
 0x395   : > { %v2903_v40 = vsel %vm2902_vm1, %v2886_v25, %v2901_v12 }
 0x396   : > { %v2905_v38 = vsel %vm2904_vm2, %v2887_v32, %v2903_v40 }
 0x397   : > { %v2907_v59 = vsel %vm2906_vm3, %v2888_v18, %v2905_v38 }
 0x398   : > { %v2909_v55 = vsel %vm2908_vm4, %v2889_v0, %v2907_v59 }
 0x399   : > { %v2911_v13 = vsel %vm2910_vm5, %v2890_v46, %v2909_v55 }
 0x39a   : > { %v2913_v31 = vsel %vm2912_vm6, %v2891_v8, %v2911_v13 }
 0x39b   : > { %2915 = vst [vmem:[%s299_s27] sm:$0xff] %v2913_v31 }
 0x39c PF: > { %p13_p6 = scmp.ge.s32.totalorder %s3259_s22, 4   ;;  %s6449_s18 = smov %s3195_s19 }
 0x39d   : > { %s6450_s19 = smov %s3269_s25  ;;  %s6451_s20 = smov %s3259_s22 }
 0x39e   :  { %15 = sbr.rel (!%p13_p6) target bundleno = 2 (0x2), region = 118 }
 0x3a3   :  { %2935 = vsyncpa [#allocation3], 1 }
 0x3a4   :  { %2937 = vsyncpa [#allocation3 + $0x1], 1 }

</bundles_post_ra>
